<compile_context>
chip_gen: v7x
topology: tpu7x:2x2x1
jax: 0.10.0
libtpu: 0.0.40
codegen_flags: <defaults>
</compile_context>

<pallas_src>
import jax
import jax.numpy as jnp
from jax.experimental import pallas as pl
from jax.experimental.pallas import tpu as pltpu


def _fused_add_relu_conv1x1_kernel(a_ref, b_ref, w_ref, o_ref):
    # a_ref, b_ref: (C_in, HW) f32 activations, channels-first, spatial flattened
    # w_ref:        (C_out_blk, C_in) bf16 weight slab
    # o_ref:        (C_out_blk, HW)   f32 output slab
    x = jnp.maximum(a_ref[...] + b_ref[...], 0.0)          # fused add + relu (VPU)
    x = x.astype(jnp.bfloat16)                              # single-pass MXU operands
    o_ref[...] = jnp.dot(                                   # 1x1 conv == matmul (MXU)
        w_ref[...], x, preferred_element_type=jnp.float32
    ).astype(o_ref.dtype)


def _default_cout_blocks():
    # Dual-TensorCore chips (v7x) benefit from a 2-way "parallel" C_out split;
    # on single-TC chips (v5e/v6e) extra grid steps are pure overhead.
    try:
        kind = jax.devices()[0].device_kind.lower()
    except Exception:
        return 1
    return 2 if "v7" in kind else 1


def add_relu_conv1x1(x160, x152, weight, *, cout_blocks=None):
    """x160, x152: (1, C_in, H, W) f32.  weight: (C_out, C_in, 1, 1) f32.

    Returns (1, C_out, H, W) f32, matching
    Conv2d(C_in, C_out, 1, bias=False)(relu(x160 + x152)) with bf16 weights /
    activations into the MXU and f32 accumulation.
    """
    N, C_in, H, W = x160.shape
    C_out = weight.shape[0]
    HW = H * W
    assert N == 1, "kernel specialized to N == 1 (as in the reference module)"

    if cout_blocks is None:
        cout_blocks = _default_cout_blocks()
    assert C_out % cout_blocks == 0
    tc = C_out // cout_blocks
    assert tc % 8 == 0 or tc == C_out

    # Pure reshapes (contiguous, free) — no NCHW<->NHWC transposes.
    a = x160.reshape(C_in, HW)
    b = x152.reshape(C_in, HW)
    # Pre-cast weight to bf16 once at parameter-prep time (halves the weight
    # read, the dominant HBM traffic).  Accumulation stays f32 in the kernel.
    w = weight.reshape(C_out, C_in).astype(jnp.bfloat16)

    cost = pl.CostEstimate(
        flops=2 * C_out * C_in * HW,
        transcendentals=0,
        bytes_accessed=(2 * C_in * HW + C_out * HW) * 4 + C_out * C_in * 2,
    )

    out_flat = pl.pallas_call(
        _fused_add_relu_conv1x1_kernel,
        out_shape=jax.ShapeDtypeStruct((C_out, HW), x160.dtype),
        grid_spec=pltpu.PrefetchScalarGridSpec(
            num_scalar_prefetch=0,
            grid=(cout_blocks,),
            in_specs=[
                pl.BlockSpec((C_in, HW), lambda j: (0, 0)),    # a (fetched once)
                pl.BlockSpec((C_in, HW), lambda j: (0, 0)),    # b (fetched once)
                pl.BlockSpec((tc, C_in), lambda j: (j, 0)),    # bf16 weight slab
            ],
            out_specs=pl.BlockSpec((tc, HW), lambda j: (j, 0)),
        ),
        compiler_params=pltpu.CompilerParams(
            dimension_semantics=("parallel",),
        ),
        cost_estimate=cost,
    )(a, b, w)

    # (C_out, H*W) -> (1, C_out, H, W): again a pure reshape.
    return out_flat.reshape(N, C_out, H, W)


if __name__ == "__main__":
    # Shapes from the module: inputs (1, 2048, 7, 7); conv 2048 -> 512, 1x1.
    N, C_in, H, W = 1, 2048, 7, 7
    C_out = 512

    key = jax.random.PRNGKey(0)
    k1, k2, k3 = jax.random.split(key, 3)
    x160 = jax.random.normal(k1, (N, C_in, H, W), dtype=jnp.float32)
    x152 = jax.random.normal(k2, (N, C_in, H, W), dtype=jnp.float32)
    # Deterministic synthetic conv weight (no checkpoint load).
    weight = jax.random.normal(k3, (C_out, C_in, 1, 1), dtype=jnp.float32) * 0.02

    out = jax.block_until_ready(add_relu_conv1x1(x160, x152, weight))
    assert out.shape == (N, C_out, H, W)

    # Reference 1: same math as the kernel (bf16 operands, f32 accumulation).
    x_act = jnp.maximum(x160 + x152, 0.0)
    w2d = weight.reshape(C_out, C_in)
    ref_bf16 = jnp.einsum(
        "nchw,oc->nohw",
        x_act.astype(jnp.bfloat16).astype(jnp.float32),
        w2d.astype(jnp.bfloat16).astype(jnp.float32),
    )
    assert jnp.allclose(out, ref_bf16, atol=1e-2, rtol=1e-2)

    # Reference 2: full-f32 module math (looser tolerance due to bf16 operands).
    ref_f32 = jnp.einsum("nchw,oc->nohw", x_act, w2d)
    assert jnp.allclose(out, ref_f32, atol=1e-1, rtol=5e-2)

    print("KERNEL_OK")
</pallas_src>

<mosaic_0001>
module attributes {stable_mosaic.version = 11 : i64} {
  func.func @_fused_add_relu_conv1x1_kernel(%arg0: i32, %arg1: memref<2048x49xf32, #tpu.memory_space<vmem>>, %arg2: memref<2048x49xf32, #tpu.memory_space<vmem>>, %arg3: memref<512x2048xbf16, #tpu.memory_space<vmem>>, %arg4: memref<512x49xf32, #tpu.memory_space<vmem>>) attributes {dimension_semantics = [#tpu.dimension_semantics<parallel>], iteration_bounds = array<i64: 1>, scalar_prefetch = 0 : i64, scratch_operands = 0 : i64, tpu.core_type = #tpu.core_type<tc>, window_params = [{pipeline_mode = #tpu.pipeline_mode<synchronous>, transform_indices = @transform_0, window_bounds = array<i64: 2048, 49>}, {pipeline_mode = #tpu.pipeline_mode<synchronous>, transform_indices = @transform_1, window_bounds = array<i64: 2048, 49>}, {transform_indices = @transform_2, window_bounds = array<i64: 512, 2048>}, {transform_indices = @transform_3, window_bounds = array<i64: 512, 49>}]} {
    %c0 = arith.constant 0 : index
    %c0_0 = arith.constant 0 : index
    %0 = vector.load %arg1[%c0, %c0_0] : memref<2048x49xf32, #tpu.memory_space<vmem>>, vector<2048x49xf32>
    %c0_1 = arith.constant 0 : index
    %c0_2 = arith.constant 0 : index
    %1 = vector.load %arg2[%c0_1, %c0_2] : memref<2048x49xf32, #tpu.memory_space<vmem>>, vector<2048x49xf32>
    %2 = arith.addf %0, %1 : vector<2048x49xf32>
    %cst = arith.constant 0.000000e+00 : f32
    %3 = vector.broadcast %cst : f32 to vector<2048x49xf32>
    %4 = arith.maximumf %2, %3 : vector<2048x49xf32>
    %5 = arith.truncf %4 : vector<2048x49xf32> to vector<2048x49xbf16>
    %c0_3 = arith.constant 0 : index
    %c0_4 = arith.constant 0 : index
    %6 = vector.load %arg3[%c0_3, %c0_4] : memref<512x2048xbf16, #tpu.memory_space<vmem>>, vector<512x2048xbf16>
    %cst_5 = arith.constant dense<0.000000e+00> : vector<512x49xf32>
    %7 = tpu.matmul %6, %5, %cst_5 {dimension_numbers = #tpu.dot_dimension_numbers<[1], [0], [0], [1], [0, 0, 1, 1], [], []>} : vector<512x2048xbf16>, vector<2048x49xbf16>, vector<512x49xf32> -> vector<512x49xf32>
    %c0_6 = arith.constant 0 : index
    %c0_7 = arith.constant 0 : index
    %8 = vector.load %arg4[%c0_6, %c0_7] : memref<512x49xf32, #tpu.memory_space<vmem>>, vector<512x49xf32>
    tpu.vector_store %arg4[%c0_6, %c0_7], %7 {strides = array<i32>} : memref<512x49xf32, #tpu.memory_space<vmem>>, vector<512x49xf32>,
    return
  }
  func.func @transform_0(%arg0: i32) -> (i32, i32) {
    %c0_i32 = arith.constant 0 : i32
    %c0_i32_0 = arith.constant 0 : i32
    %c0_i32_1 = arith.constant 0 : i32
    return %c0_i32, %c0_i32_0 : i32, i32
  }
  func.func @transform_1(%arg0: i32) -> (i32, i32) {
    %c0_i32 = arith.constant 0 : i32
    %c0_i32_0 = arith.constant 0 : i32
    %c0_i32_1 = arith.constant 0 : i32
    return %c0_i32, %c0_i32_0 : i32, i32
  }
  func.func @transform_2(%arg0: i32) -> (i32, i32) {
    %c0_i32 = arith.constant 0 : i32
    %c0_i32_0 = arith.constant 0 : i32
    return %arg0, %c0_i32 : i32, i32
  }
  func.func @transform_3(%arg0: i32) -> (i32, i32) {
    %c0_i32 = arith.constant 0 : i32
    %c0_i32_0 = arith.constant 0 : i32
    return %arg0, %c0_i32 : i32, i32
  }
}

</mosaic_0001>

<bundles_post_ra>
// kernel: tpu_custom_call.1
= control target key start
LH: loop header
LB: loop body
LE: loop exit
PB: predicated region body
PF: predicated region fallthrough
CT: control target
= control target key end

     0   :  { %v7965_v0 = vmov 0   ;;  %vm6551_vm0 = vcmask 400384   ;;  %s11730_s0 = inlined_call_operand.vmem [shape: f32[2048,49], index: 0, kind: input, shape index: {}]   ;;  %s11731_s1 = inlined_call_operand.vmem [shape: f32[2048,49], index: 1, kind: input, shape index: {}]   ;;  %s11732_s2 = inlined_call_operand.vmem [shape: bf16[512,2048], index: 2, kind: input, shape index: {}]   ;;  %s11733_s3 = inlined_call_operand.vmem [shape: f32[512,49], index: 3, kind: output, shape index: {}]  }
   0x1   :  { %4239 = vmatprep.subr.bf16.mxu1 %v7965_v0  ;;  %5395 = vmatprep.subr.bf16.mxu0 %v7965_v0  ;;  %v15_v1 = vld [vmem:[%s11730_s0] sm:$0xff]  ;;  %v16_v2 = vld [vmem:[%s11730_s0 + $0x8] sm:$0xff]  ;;  %v17_v11 = vld [vmem:[%s11730_s0 + $0x10] sm:$0xff] }
   0x2   :  { %v271_v3 = vld [vmem:[%s11731_s1] sm:$0xff]  ;;  %v272_v4 = vld [vmem:[%s11731_s1 + $0x8] sm:$0xff]  ;;  %v18_v15 = vld [vmem:[%s11730_s0 + $0x18] sm:$0xff] }
   0x3   :  { %v527_v5 = vadd.f32 %v271_v3, %v15_v1  ;;  %v143_v6 = vld [vmem:[%s11730_s0 + $0x400] sm:$0xff]  ;;  %v144_v7 = vld [vmem:[%s11730_s0 + $0x408] sm:$0xff]  ;;  %v528_v8 = vadd.f32 %v272_v4, %v16_v2  ;;  %v273_v16 = vld [vmem:[%s11731_s1 + $0x10] sm:$0xff] }
   0x4   :  { %v399_v9 = vld [vmem:[%s11731_s1 + $0x400] sm:$0xff]  ;;  %v400_v10 = vld [vmem:[%s11731_s1 + $0x408] sm:$0xff]  ;;  %v274_v17 = vld [vmem:[%s11731_s1 + $0x18] sm:$0xff]  ;;  %v529_v19 = vadd.f32 %v273_v16, %v17_v11 }
   0x5   :  { %v783_v12 = vmax.f32 %v527_v5, 0.0  ;;  %v655_v13 = vadd.f32 %v399_v9, %v143_v6  ;;  %v656_v14 = vadd.f32 %v400_v10, %v144_v7  ;;  %v784_v18 = vmax.f32 %v528_v8, 0.0  ;;  %v145_v21 = vld [vmem:[%s11730_s0 + $0x410] sm:$0xff]  ;;  %v146_v22 = vld [vmem:[%s11730_s0 + $0x418] sm:$0xff]  ;;  %v19_v28 = vld [vmem:[%s11730_s0 + $0x20] sm:$0xff] }
   0x6   :  { %v530_v20 = vadd.f32 %v274_v17, %v18_v15  ;;  %v401_v23 = vld [vmem:[%s11731_s1 + $0x410] sm:$0xff]  ;;  %v402_v26 = vld [vmem:[%s11731_s1 + $0x418] sm:$0xff]  ;;  %v20_v29 = vld [vmem:[%s11730_s0 + $0x28] sm:$0xff]  ;;  %v785_v31 = vmax.f32 %v529_v19, 0.0 }
   0x7   :  { %v911_v24 = vmax.f32 %v655_v13, 0.0  ;;  %v912_v25 = vmax.f32 %v656_v14, 0.0  ;;  %v657_v27 = vadd.f32 %v401_v23, %v145_v21  ;;  %v1039_v30 = vpack.c.bf16 %v784_v18, %v783_v12  ;;  %v275_v34 = vld [vmem:[%s11731_s1 + $0x20] sm:$0xff]  ;;  %v276_v35 = vld [vmem:[%s11731_s1 + $0x28] sm:$0xff]  ;;  %v21_v48 = vld [vmem:[%s11730_s0 + $0x30] sm:$0xff] }
   0x8   :  { %v786_v32 = vmax.f32 %v530_v20, 0.0  ;;  %v658_v33 = vadd.f32 %v402_v26, %v146_v22  ;;  %v147_v36 = vld [vmem:[%s11730_s0 + $0x420] sm:$0xff]  ;;  %v531_v39 = vadd.f32 %v275_v34, %v19_v28  ;;  %v532_v40 = vadd.f32 %v276_v35, %v20_v29  ;;  %v148_v41 = vld [vmem:[%s11730_s0 + $0x428] sm:$0xff]  ;;  %v22_v49 = vld [vmem:[%s11730_s0 + $0x38] sm:$0xff] }
   0x9   :  { %v1103_v37 = vpack.c.bf16 %v912_v25, %v911_v24  ;;  %v913_v38 = vmax.f32 %v657_v27, 0.0  ;;  %v403_v42 = vld [vmem:[%s11731_s1 + $0x420] sm:$0xff]  ;;  %v404_v43 = vld [vmem:[%s11731_s1 + $0x428] sm:$0xff]  ;;  %4240 = vmatpush1.bf16.msra.mxu1 %v1039_v30  ;;  %v277_v50 = vld [vmem:[%s11731_s1 + $0x30] sm:$0xff] }
   0xa   :  { %v1040_v44 = vpack.c.bf16 %v786_v32, %v785_v31  ;;  %v914_v45 = vmax.f32 %v658_v33, 0.0  ;;  %v659_v46 = vadd.f32 %v403_v42, %v147_v36  ;;  %v660_v47 = vadd.f32 %v404_v43, %v148_v41  ;;  %4241 = vmatprep.subr.bf16.mxu1 %v7965_v0  ;;  %v278_v53 = vld [vmem:[%s11731_s1 + $0x38] sm:$0xff]  ;;  %v149_v55 = vld [vmem:[%s11730_s0 + $0x430] sm:$0xff]  ;;  %v23_v63 = vld [vmem:[%s11730_s0 + $0x40] sm:$0xff] }
   0xb   :  { %5396 = vmatpush1.bf16.msra.mxu0 %v1103_v37  ;;  %v787_v51 = vmax.f32 %v531_v39, 0.0  ;;  %v788_v52 = vmax.f32 %v532_v40, 0.0  ;;  %v533_v54 = vadd.f32 %v277_v50, %v21_v48  ;;  %v150_v56 = vld [vmem:[%s11730_s0 + $0x438] sm:$0xff]  ;;  %v534_v60 = vadd.f32 %v278_v53, %v22_v49  ;;  %v405_v61 = vld [vmem:[%s11731_s1 + $0x430] sm:$0xff]  ;;  %v24_v4 = vld [vmem:[%s11730_s0 + $0x48] sm:$0xff] }
   0xc   :  { %5397 = vmatprep.subr.bf16.mxu0 %v7965_v0  ;;  %v1104_v57 = vpack.c.bf16 %v914_v45, %v913_v38  ;;  %v915_v58 = vmax.f32 %v659_v46, 0.0  ;;  %v916_v59 = vmax.f32 %v660_v47, 0.0  ;;  %v406_v62 = vld [vmem:[%s11731_s1 + $0x438] sm:$0xff]  ;;  %v661_v2 = vadd.f32 %v405_v61, %v149_v55  ;;  %v279_v5 = vld [vmem:[%s11731_s1 + $0x40] sm:$0xff]  ;;  %v280_v6 = vld [vmem:[%s11731_s1 + $0x48] sm:$0xff] }
   0xd   :  { %v789_v1 = vmax.f32 %v533_v54, 0.0  ;;  %v662_v3 = vadd.f32 %v406_v62, %v150_v56  ;;  %4242 = vmatpush1.bf16.msra.mxu1 %v1040_v44  ;;  %v1041_v7 = vpack.c.bf16 %v788_v52, %v787_v51  ;;  %v790_v8 = vmax.f32 %v534_v60, 0.0  ;;  %v151_v11 = vld [vmem:[%s11730_s0 + $0x440] sm:$0xff]  ;;  %v152_v12 = vld [vmem:[%s11730_s0 + $0x448] sm:$0xff]  ;;  %v25_v19 = vld [vmem:[%s11730_s0 + $0x50] sm:$0xff] }
   0xe   :  { %v535_v9 = vadd.f32 %v279_v5, %v23_v63  ;;  %v536_v10 = vadd.f32 %v280_v6, %v24_v4  ;;  %v407_v13 = vld [vmem:[%s11731_s1 + $0x440] sm:$0xff]  ;;  %4243 = vmatprep.subr.bf16.mxu1 %v7965_v0  ;;  %v1105_v14 = vpack.c.bf16 %v916_v59, %v915_v58  ;;  %v917_v15 = vmax.f32 %v661_v2, 0.0  ;;  %v408_v17 = vld [vmem:[%s11731_s1 + $0x448] sm:$0xff]  ;;  %v26_v20 = vld [vmem:[%s11730_s0 + $0x58] sm:$0xff] }
   0xf   :  { %5398 = vmatpush1.bf16.msra.mxu0 %v1104_v57  ;;  %v918_v16 = vmax.f32 %v662_v3, 0.0  ;;  %v663_v18 = vadd.f32 %v407_v13, %v151_v11  ;;  %v664_v21 = vadd.f32 %v408_v17, %v152_v12  ;;  %v281_v22 = vld [vmem:[%s11731_s1 + $0x50] sm:$0xff]  ;;  %v282_v23 = vld [vmem:[%s11731_s1 + $0x58] sm:$0xff]  ;;  %v1042_v25 = vpack.c.bf16 %v790_v8, %v789_v1  ;;  %v27_v35 = vld [vmem:[%s11730_s0 + $0x60] sm:$0xff] }
  0x10   :  { %5399 = vmatprep.subr.bf16.mxu0 %v7965_v0  ;;  %v153_v24 = vld [vmem:[%s11730_s0 + $0x450] sm:$0xff]  ;;  %v791_v26 = vmax.f32 %v535_v9, 0.0  ;;  %v792_v27 = vmax.f32 %v536_v10, 0.0  ;;  %v154_v28 = vld [vmem:[%s11730_s0 + $0x458] sm:$0xff]  ;;  %v537_v33 = vadd.f32 %v281_v22, %v25_v19  ;;  %v538_v34 = vadd.f32 %v282_v23, %v26_v20  ;;  %v28_v36 = vld [vmem:[%s11730_s0 + $0x68] sm:$0xff] }
  0x11   :  { %v409_v29 = vld [vmem:[%s11731_s1 + $0x450] sm:$0xff]  ;;  %v410_v30 = vld [vmem:[%s11731_s1 + $0x458] sm:$0xff]  ;;  %4244 = vmatpush1.bf16.msra.mxu1 %v1041_v7  ;;  %v919_v31 = vmax.f32 %v663_v18, 0.0  ;;  %v920_v32 = vmax.f32 %v664_v21, 0.0  ;;  %v283_v37 = vld [vmem:[%s11731_s1 + $0x60] sm:$0xff]  ;;  %v1106_v38 = vpack.c.bf16 %v918_v16, %v917_v15 }
  0x12   :  { %4245 = vmatprep.subr.bf16.mxu1 %v7965_v0  ;;  %v665_v39 = vadd.f32 %v409_v29, %v153_v24  ;;  %v666_v40 = vadd.f32 %v410_v30, %v154_v28  ;;  %v284_v41 = vld [vmem:[%s11731_s1 + $0x68] sm:$0xff]  ;;  %v155_v42 = vld [vmem:[%s11730_s0 + $0x460] sm:$0xff]  ;;  %v539_v46 = vadd.f32 %v283_v37, %v27_v35  ;;  %v29_v48 = vld [vmem:[%s11730_s0 + $0x70] sm:$0xff]  ;;  %v1043_v50 = vpack.c.bf16 %v792_v27, %v791_v26 }
  0x13   :  { %5400 = vmatpush1.bf16.msra.mxu0 %v1105_v14  ;;  %v156_v43 = vld [vmem:[%s11730_s0 + $0x468] sm:$0xff]  ;;  %v411_v44 = vld [vmem:[%s11731_s1 + $0x460] sm:$0xff]  ;;  %v540_v47 = vadd.f32 %v284_v41, %v28_v36  ;;  %v30_v49 = vld [vmem:[%s11730_s0 + $0x78] sm:$0xff]  ;;  %v1107_v51 = vpack.c.bf16 %v920_v32, %v919_v31  ;;  %v793_v52 = vmax.f32 %v537_v33, 0.0  ;;  %v794_v53 = vmax.f32 %v538_v34, 0.0 }
  0x14   :  { %5401 = vmatprep.subr.bf16.mxu0 %v7965_v0  ;;  %v412_v45 = vld [vmem:[%s11731_s1 + $0x468] sm:$0xff]  ;;  %v285_v54 = vld [vmem:[%s11731_s1 + $0x70] sm:$0xff]  ;;  %v286_v55 = vld [vmem:[%s11731_s1 + $0x78] sm:$0xff]  ;;  %v921_v57 = vmax.f32 %v665_v39, 0.0  ;;  %v922_v58 = vmax.f32 %v666_v40, 0.0  ;;  %v667_v59 = vadd.f32 %v411_v44, %v155_v42  ;;  %v795_v1 = vmax.f32 %v539_v46, 0.0 }
  0x15   :  { %4246 = vmatpush1.bf16.msra.mxu1 %v1042_v25  ;;  %v157_v56 = vld [vmem:[%s11730_s0 + $0x470] sm:$0xff]  ;;  %v668_v60 = vadd.f32 %v412_v45, %v156_v43  ;;  %v158_v61 = vld [vmem:[%s11730_s0 + $0x478] sm:$0xff]  ;;  %v796_v2 = vmax.f32 %v540_v47, 0.0  ;;  %v541_v3 = vadd.f32 %v285_v54, %v29_v48  ;;  %v542_v4 = vadd.f32 %v286_v55, %v30_v49  ;;  %v31_v8 = vld [vmem:[%s11730_s0 + $0x80] sm:$0xff] }
  0x16   :  { %4247 = vmatprep.subr.bf16.mxu1 %v7965_v0  ;;  %v413_v62 = vld [vmem:[%s11731_s1 + $0x470] sm:$0xff]  ;;  %v414_v63 = vld [vmem:[%s11731_s1 + $0x478] sm:$0xff]  ;;  %v1044_v5 = vpack.c.bf16 %v794_v53, %v793_v52  ;;  %v32_v9 = vld [vmem:[%s11730_s0 + $0x88] sm:$0xff]  ;;  %v1108_v10 = vpack.c.bf16 %v922_v58, %v921_v57  ;;  %v923_v11 = vmax.f32 %v667_v59, 0.0 }
  0x17   :  { %5402 = vmatpush1.bf16.msra.mxu0 %v1106_v38  ;;  %v669_v6 = vadd.f32 %v413_v62, %v157_v56  ;;  %v670_v7 = vadd.f32 %v414_v63, %v158_v61  ;;  %v924_v12 = vmax.f32 %v668_v60, 0.0  ;;  %v287_v13 = vld [vmem:[%s11731_s1 + $0x80] sm:$0xff]  ;;  %v288_v14 = vld [vmem:[%s11731_s1 + $0x88] sm:$0xff]  ;;  %v1045_v19 = vpack.c.bf16 %v796_v2, %v795_v1  ;;  %v33_v22 = vld [vmem:[%s11730_s0 + $0x90] sm:$0xff] }
  0x18   :  { %5403 = vmatprep.subr.bf16.mxu0 %v7965_v0  ;;  %v159_v15 = vld [vmem:[%s11730_s0 + $0x480] sm:$0xff]  ;;  %v160_v16 = vld [vmem:[%s11730_s0 + $0x488] sm:$0xff]  ;;  %v797_v20 = vmax.f32 %v541_v3, 0.0  ;;  %v798_v21 = vmax.f32 %v542_v4, 0.0  ;;  %v543_v25 = vadd.f32 %v287_v13, %v31_v8  ;;  %v544_v26 = vadd.f32 %v288_v14, %v32_v9  ;;  %v34_v27 = vld [vmem:[%s11730_s0 + $0x98] sm:$0xff] }
  0x19   :  { %4248 = vmatpush1.bf16.msra.mxu1 %v1043_v50  ;;  %v415_v17 = vld [vmem:[%s11731_s1 + $0x480] sm:$0xff]  ;;  %v416_v18 = vld [vmem:[%s11731_s1 + $0x488] sm:$0xff]  ;;  %v925_v23 = vmax.f32 %v669_v6, 0.0  ;;  %v926_v24 = vmax.f32 %v670_v7, 0.0  ;;  %v289_v28 = vld [vmem:[%s11731_s1 + $0x90] sm:$0xff]  ;;  %v1109_v30 = vpack.c.bf16 %v924_v12, %v923_v11 }
  0x1a   :  { %4249 = vmatprep.subr.bf16.mxu1 %v7965_v0  ;;  %v290_v29 = vld [vmem:[%s11731_s1 + $0x98] sm:$0xff]  ;;  %v671_v31 = vadd.f32 %v415_v17, %v159_v15  ;;  %v672_v32 = vadd.f32 %v416_v18, %v160_v16  ;;  %v161_v33 = vld [vmem:[%s11730_s0 + $0x490] sm:$0xff]  ;;  %v35_v37 = vld [vmem:[%s11730_s0 + $0xa0] sm:$0xff]  ;;  %v545_v38 = vadd.f32 %v289_v28, %v33_v22  ;;  %v1046_v43 = vpack.c.bf16 %v798_v21, %v797_v20 }
  0x1b   :  { %5404 = vmatpush1.bf16.msra.mxu0 %v1107_v51  ;;  %v162_v34 = vld [vmem:[%s11730_s0 + $0x498] sm:$0xff]  ;;  %v417_v35 = vld [vmem:[%s11731_s1 + $0x490] sm:$0xff]  ;;  %v546_v39 = vadd.f32 %v290_v29, %v34_v27  ;;  %v36_v40 = vld [vmem:[%s11730_s0 + $0xa8] sm:$0xff]  ;;  %v1110_v44 = vpack.c.bf16 %v926_v24, %v925_v23  ;;  %v799_v45 = vmax.f32 %v543_v25, 0.0  ;;  %v800_v46 = vmax.f32 %v544_v26, 0.0 }
  0x1c   :  { %5405 = vmatprep.subr.bf16.mxu0 %v7965_v0  ;;  %v418_v36 = vld [vmem:[%s11731_s1 + $0x498] sm:$0xff]  ;;  %v291_v41 = vld [vmem:[%s11731_s1 + $0xa0] sm:$0xff]  ;;  %v292_v42 = vld [vmem:[%s11731_s1 + $0xa8] sm:$0xff]  ;;  %v927_v48 = vmax.f32 %v671_v31, 0.0  ;;  %v928_v49 = vmax.f32 %v672_v32, 0.0  ;;  %v673_v50 = vadd.f32 %v417_v35, %v161_v33  ;;  %v801_v57 = vmax.f32 %v545_v38, 0.0 }
  0x1d   :  { %4250 = vmatpush1.bf16.msra.mxu1 %v1044_v5  ;;  %v163_v47 = vld [vmem:[%s11730_s0 + $0x4a0] sm:$0xff]  ;;  %v674_v51 = vadd.f32 %v418_v36, %v162_v34  ;;  %v164_v52 = vld [vmem:[%s11730_s0 + $0x4a8] sm:$0xff]  ;;  %v547_v55 = vadd.f32 %v291_v41, %v35_v37  ;;  %v548_v56 = vadd.f32 %v292_v42, %v36_v40  ;;  %v802_v58 = vmax.f32 %v546_v39, 0.0  ;;  %v37_v59 = vld [vmem:[%s11730_s0 + $0xb0] sm:$0xff] }
  0x1e   :  { %4251 = vmatprep.subr.bf16.mxu1 %v7965_v0  ;;  %v419_v53 = vld [vmem:[%s11731_s1 + $0x4a0] sm:$0xff]  ;;  %v420_v54 = vld [vmem:[%s11731_s1 + $0x4a8] sm:$0xff]  ;;  %v38_v60 = vld [vmem:[%s11730_s0 + $0xb8] sm:$0xff]  ;;  %v1047_v61 = vpack.c.bf16 %v800_v46, %v799_v45  ;;  %v1111_v4 = vpack.c.bf16 %v928_v49, %v927_v48  ;;  %v929_v5 = vmax.f32 %v673_v50, 0.0 }
  0x1f   :  { %5406 = vmatpush1.bf16.msra.mxu0 %v1108_v10  ;;  %v675_v62 = vadd.f32 %v419_v53, %v163_v47  ;;  %v676_v63 = vadd.f32 %v420_v54, %v164_v52  ;;  %v293_v1 = vld [vmem:[%s11731_s1 + $0xb0] sm:$0xff]  ;;  %v294_v2 = vld [vmem:[%s11731_s1 + $0xb8] sm:$0xff]  ;;  %v930_v6 = vmax.f32 %v674_v51, 0.0  ;;  %v803_v10 = vmax.f32 %v547_v55, 0.0  ;;  %v39_v15 = vld [vmem:[%s11730_s0 + $0xc0] sm:$0xff] }
  0x20   :  { %5407 = vmatprep.subr.bf16.mxu0 %v7965_v0  ;;  %v165_v3 = vld [vmem:[%s11730_s0 + $0x4b0] sm:$0xff]  ;;  %v166_v7 = vld [vmem:[%s11730_s0 + $0x4b8] sm:$0xff]  ;;  %v804_v11 = vmax.f32 %v548_v56, 0.0  ;;  %v1048_v12 = vpack.c.bf16 %v802_v58, %v801_v57  ;;  %v549_v13 = vadd.f32 %v293_v1, %v37_v59  ;;  %v550_v14 = vadd.f32 %v294_v2, %v38_v60  ;;  %v40_v20 = vld [vmem:[%s11730_s0 + $0xc8] sm:$0xff] }
  0x21   :  { %4252 = vmatpush1.bf16.msra.mxu1 %v1045_v19  ;;  %v421_v8 = vld [vmem:[%s11731_s1 + $0x4b0] sm:$0xff]  ;;  %v422_v9 = vld [vmem:[%s11731_s1 + $0x4b8] sm:$0xff]  ;;  %v931_v16 = vmax.f32 %v675_v62, 0.0  ;;  %v932_v17 = vmax.f32 %v676_v63, 0.0  ;;  %v295_v21 = vld [vmem:[%s11731_s1 + $0xc0] sm:$0xff]  ;;  %v1112_v23 = vpack.c.bf16 %v930_v6, %v929_v5 }
  0x22   :  { %4253 = vmatprep.subr.bf16.mxu1 %v7965_v0  ;;  %v677_v18 = vadd.f32 %v421_v8, %v165_v3  ;;  %v678_v19 = vadd.f32 %v422_v9, %v166_v7  ;;  %v296_v22 = vld [vmem:[%s11731_s1 + $0xc8] sm:$0xff]  ;;  %v167_v24 = vld [vmem:[%s11730_s0 + $0x4c0] sm:$0xff]  ;;  %v1049_v26 = vpack.c.bf16 %v804_v11, %v803_v10  ;;  %v806_v31 = vmax.f32 %v550_v14, 0.0  ;;  %v41_v40 = vld [vmem:[%s11730_s0 + $0xd0] sm:$0xff] }
  0x23   :  { %5408 = vmatpush1.bf16.msra.mxu0 %v1109_v30  ;;  %v168_v25 = vld [vmem:[%s11730_s0 + $0x4c8] sm:$0xff]  ;;  %v423_v27 = vld [vmem:[%s11731_s1 + $0x4c0] sm:$0xff]  ;;  %v805_v30 = vmax.f32 %v549_v13, 0.0  ;;  %v551_v32 = vadd.f32 %v295_v21, %v39_v15  ;;  %v552_v33 = vadd.f32 %v296_v22, %v40_v20  ;;  %v1113_v37 = vpack.c.bf16 %v932_v17, %v931_v16  ;;  %v297_v41 = vld [vmem:[%s11731_s1 + $0xd0] sm:$0xff] }
  0x24   :  { %5409 = vmatprep.subr.bf16.mxu0 %v7965_v0  ;;  %v424_v28 = vld [vmem:[%s11731_s1 + $0x4c8] sm:$0xff]  ;;  %v8321_v29 = vld [vmem:[%s11732_s2] sm:$0xff]  ;;  %v933_v38 = vmax.f32 %v677_v18, 0.0  ;;  %v934_v39 = vmax.f32 %v678_v19, 0.0  ;;  %v42_v45 = vld [vmem:[%s11730_s0 + $0xd8] sm:$0xff]  ;;  %v553_v54 = vadd.f32 %v297_v41, %v41_v40 }
  0x25   :  { %4254 = vmatpush1.bf16.msra.mxu1 %v1046_v43  ;;  %v8326_v34 = vld [vmem:[%s11732_s2 + $0x40] sm:$0xff]  ;;  %v679_v43 = vadd.f32 %v423_v27, %v167_v24  ;;  %v298_v46 = vld [vmem:[%s11731_s1 + $0xd8] sm:$0xff]  ;;  %v169_v47 = vld [vmem:[%s11730_s0 + $0x4d0] sm:$0xff]  ;;  %v807_v52 = vmax.f32 %v551_v32, 0.0  ;;  %v808_v53 = vmax.f32 %v552_v33, 0.0  ;;  %v1050_v57 = vpack.c.bf16 %v806_v31, %v805_v30 }
  0x26   :  { %4255 = vmatprep.subr.bf16.mxu1 %v7965_v0  ;;  %v8331_v35 = vld [vmem:[%s11732_s2 + $0x20] sm:$0xff]  ;;  %v6621_v42 = vcombine.high %v8321_v29, %v8326_v34  ;;  %v170_v49 = vld [vmem:[%s11730_s0 + $0x4d8] sm:$0xff]  ;;  %v425_v50 = vld [vmem:[%s11731_s1 + $0x4d0] sm:$0xff]  ;;  %v1114_v58 = vpack.c.bf16 %v934_v39, %v933_v38  ;;  %v554_v59 = vadd.f32 %v298_v46, %v42_v45  ;;  %v809_v8 = vmax.f32 %v553_v54, 0.0 }
  0x27   :  { %5410 = vmatpush1.bf16.msra.mxu0 %v1110_v44  ;;  %v8336_v36 = vld [vmem:[%s11732_s2 + $0x60] sm:$0xff]  ;;  %v680_v44 = vadd.f32 %v424_v28, %v168_v25  ;;  %v426_v51 = vld [vmem:[%s11731_s1 + $0x4d8] sm:$0xff]  ;;  %v44_v56 = vld [vmem:[%s11730_s0 + $0xe8] sm:$0xff]  ;;  %v935_v63 = vmax.f32 %v679_v43, 0.0  ;;  %v681_v2 = vadd.f32 %v425_v50, %v169_v47  ;;  %v1051_v7 = vpack.c.bf16 %v808_v53, %v807_v52 }
  0x28   :  { %5411 = vmatprep.subr.bf16.mxu0 %v7965_v0  ;;  %v6629_v48 = vcombine.high %v8331_v35, %v8336_v36  ;;  %4271 = vmatprep.mubr.bf16.mxu1 %v6621_v42  ;;  %v43_v55 = vld [vmem:[%s11730_s0 + $0xe0] sm:$0xff]  ;;  %v682_v3 = vadd.f32 %v426_v51, %v170_v49  ;;  %v428_v6 = vld [vmem:[%s11731_s1 + $0x4e8] sm:$0xff]  ;;  %v45_v10 = vld [vmem:[%s11730_s0 + $0xf0] sm:$0xff]  ;;  %v810_v11 = vmax.f32 %v554_v59, 0.0 }
  0x29   :  { %4256 = vmatpush1.bf16.msra.mxu1 %v1047_v61  ;;  %v299_v60 = vld [vmem:[%s11731_s1 + $0xe0] sm:$0xff]  ;;  %v300_v61 = vld [vmem:[%s11731_s1 + $0xe8] sm:$0xff]  ;;  %v936_v1 = vmax.f32 %v680_v44, 0.0  ;;  %v46_v15 = vld [vmem:[%s11730_s0 + $0xf8] sm:$0xff]  ;;  %v937_v19 = vmax.f32 %v681_v2, 0.0 }
  0x2a   :  { %4257 = vmatprep.subr.bf16.mxu1 %v7965_v0  ;;  %5427 = vmatprep.mubr.bf16.mxu0 %v6629_v48  ;;  %v171_v62 = vld [vmem:[%s11730_s0 + $0x4e0] sm:$0xff]  ;;  %v555_v9 = vadd.f32 %v299_v60, %v43_v55  ;;  %v301_v16 = vld [vmem:[%s11731_s1 + $0xf0] sm:$0xff]  ;;  %v302_v17 = vld [vmem:[%s11731_s1 + $0xf8] sm:$0xff]  ;;  %v938_v20 = vmax.f32 %v682_v3, 0.0  ;;  %v1052_v30 = vpack.c.bf16 %v810_v11, %v809_v8 }
  0x2b   :  { %5412 = vmatpush1.bf16.msra.mxu0 %v1111_v4  ;;  %v172_v4 = vld [vmem:[%s11730_s0 + $0x4e8] sm:$0xff]  ;;  %v427_v5 = vld [vmem:[%s11731_s1 + $0x4e0] sm:$0xff]  ;;  %v1115_v18 = vpack.c.bf16 %v936_v1, %v935_v63  ;;  %v173_v21 = vld [vmem:[%s11730_s0 + $0x4f0] sm:$0xff]  ;;  %v558_v27 = vadd.f32 %v302_v17, %v46_v15 }
  0x2c   :  { %5413 = vmatprep.subr.bf16.mxu0 %v7965_v0  ;;  %v683_v13 = vadd.f32 %v427_v5, %v171_v62  ;;  %v684_v14 = vadd.f32 %v428_v6, %v172_v4  ;;  %v174_v22 = vld [vmem:[%s11730_s0 + $0x4f8] sm:$0xff]  ;;  %v811_v25 = vmax.f32 %v555_v9, 0.0  ;;  %v47_v28 = vld [vmem:[%s11730_s0 + $0x100] sm:$0xff]  ;;  %v304_v39 = vld [vmem:[%s11731_s1 + $0x108] sm:$0xff]  ;;  %v1116_v40 = vpack.c.bf16 %v938_v20, %v937_v19 }
  0x2d   :  { %4258 = vmatpush1.bf16.msra.mxu1 %v1048_v12  ;;  %v556_v12 = vadd.f32 %v300_v61, %v44_v56  ;;  %v430_v24 = vld [vmem:[%s11731_s1 + $0x4f8] sm:$0xff]  ;;  %v303_v38 = vld [vmem:[%s11731_s1 + $0x100] sm:$0xff]  ;;  %v176_v44 = vld [vmem:[%s11730_s0 + $0x508] sm:$0xff]  ;;  %v814_v48 = vmax.f32 %v558_v27, 0.0 }
  0x2e   :  { %4259 = vmatprep.subr.bf16.mxu1 %v7965_v0  ;;  %v939_v32 = vmax.f32 %v683_v13, 0.0  ;;  %v940_v33 = vmax.f32 %v684_v14, 0.0  ;;  %v686_v42 = vadd.f32 %v430_v24, %v174_v22  ;;  %v175_v43 = vld [vmem:[%s11730_s0 + $0x500] sm:$0xff]  ;;  %v432_v46 = vld [vmem:[%s11731_s1 + $0x508] sm:$0xff]  ;;  %v559_v49 = vadd.f32 %v303_v38, %v47_v28  ;;  %v49_v51 = vld [vmem:[%s11730_s0 + $0x110] sm:$0xff] }
  0x2f   :  { %5414 = vmatpush1.bf16.msra.mxu0 %v1112_v23  ;;  %v429_v23 = vld [vmem:[%s11731_s1 + $0x4f0] sm:$0xff]  ;;  %v812_v31 = vmax.f32 %v556_v12, 0.0  ;;  %v431_v45 = vld [vmem:[%s11731_s1 + $0x500] sm:$0xff]  ;;  %v50_v52 = vld [vmem:[%s11730_s0 + $0x118] sm:$0xff]  ;;  %v688_v61 = vadd.f32 %v432_v46, %v176_v44  ;;  %v6628_v22 = vcombine.low %v8331_v35, %v8336_v36 }
  0x30   :  { %5415 = vmatprep.subr.bf16.mxu0 %v7965_v0  ;;  %v685_v41 = vadd.f32 %v429_v23, %v173_v21  ;;  %v1117_v54 = vpack.c.bf16 %v940_v33, %v939_v32  ;;  %v305_v55 = vld [vmem:[%s11731_s1 + $0x110] sm:$0xff]  ;;  %v306_v56 = vld [vmem:[%s11731_s1 + $0x118] sm:$0xff]  ;;  %v942_v59 = vmax.f32 %v686_v42, 0.0  ;;  %v687_v60 = vadd.f32 %v431_v45, %v175_v43  ;;  %v8475_v5 = vld [vmem:[%s11732_s2 + $0x80] sm:$0xff] }
  0x31   :  { %4260 = vmatpush1.bf16.msra.mxu1 %v1049_v26  ;;  %v557_v26 = vadd.f32 %v301_v16, %v45_v10  ;;  %v1053_v53 = vpack.c.bf16 %v812_v31, %v811_v25  ;;  %v178_v62 = vld [vmem:[%s11730_s0 + $0x518] sm:$0xff]  ;;  %v433_v63 = vld [vmem:[%s11731_s1 + $0x510] sm:$0xff]  ;;  %v815_v3 = vmax.f32 %v559_v49, 0.0  ;;  %v8480_v6 = vld [vmem:[%s11732_s2 + $0xc0] sm:$0xff]  ;;  %v562_v8 = vadd.f32 %v306_v56, %v50_v52 }
  0x32   :  { %4261 = vmatprep.subr.bf16.mxu1 %v7965_v0  ;;  %v434_v1 = vld [vmem:[%s11731_s1 + $0x518] sm:$0xff]  ;;  %v943_v12 = vmax.f32 %v687_v60, 0.0  ;;  %v944_v13 = vmax.f32 %v688_v61, 0.0  ;;  %v8486_v14 = vld [vmem:[%s11732_s2 + $0xa0] sm:$0xff]  ;;  %v52_v17 = vld [vmem:[%s11730_s0 + $0x128] sm:$0xff]  ;;  %v6620_v21 = vcombine.low %v8321_v29, %v8326_v34  ;;  %v6637_v24 = vcombine.high %v8475_v5, %v8480_v6 }
  0x33   :  { %5416 = vmatpush1.bf16.msra.mxu0 %v1113_v37  ;;  %v48_v37 = vld [vmem:[%s11730_s0 + $0x108] sm:$0xff]  ;;  %v813_v47 = vmax.f32 %v557_v26, 0.0  ;;  %v690_v10 = vadd.f32 %v434_v1, %v178_v62  ;;  %v8491_v15 = vld [vmem:[%s11732_s2 + $0xe0] sm:$0xff]  ;;  %v818_v34 = vmax.f32 %v562_v8, 0.0  ;;  %v53_v28 = vld [vmem:[%s11730_s0 + $0x130] sm:$0xff] }
  0x34   :  { %5417 = vmatprep.subr.bf16.mxu0 %v7965_v0  ;;  %v560_v50 = vadd.f32 %v304_v39, %v48_v37  ;;  %v51_v16 = vld [vmem:[%s11730_s0 + $0x120] sm:$0xff]  ;;  %v308_v19 = vld [vmem:[%s11731_s1 + $0x128] sm:$0xff]  ;;  %v54_v33 = vld [vmem:[%s11730_s0 + $0x138] sm:$0xff]  ;;  %v6645_v39 = vcombine.high %v8486_v14, %v8491_v15  ;;  %v6644_v8 = vcombine.low %v8486_v14, %v8491_v15 }
  0x35   :  { %4262 = vmatpush1.bf16.msra.mxu1 %v1050_v57  ;;  %v177_v57 = vld [vmem:[%s11730_s0 + $0x510] sm:$0xff]  ;;  %v1054_v2 = vpack.c.bf16 %v814_v48, %v813_v47  ;;  %v179_v20 = vld [vmem:[%s11730_s0 + $0x520] sm:$0xff]  ;;  %v180_v25 = vld [vmem:[%s11730_s0 + $0x528] sm:$0xff]  ;;  %v946_v36 = vmax.f32 %v690_v10, 0.0  ;;  %v564_v32 = vadd.f32 %v308_v19, %v52_v17 }
  0x36   :  { %4263 = vmatprep.subr.bf16.mxu1 %v7965_v0  ;;  %v816_v4 = vmax.f32 %v560_v50, 0.0  ;;  %v689_v9 = vadd.f32 %v433_v63, %v177_v57  ;;  %v435_v26 = vld [vmem:[%s11731_s1 + $0x520] sm:$0xff]  ;;  %v436_v27 = vld [vmem:[%s11731_s1 + $0x528] sm:$0xff]  ;;  %v309_v37 = vld [vmem:[%s11731_s1 + $0x130] sm:$0xff] }
  0x37   :  { %5418 = vmatpush1.bf16.msra.mxu0 %v1114_v58  ;;  %v941_v58 = vmax.f32 %v685_v41, 0.0  ;;  %v310_v38 = vld [vmem:[%s11731_s1 + $0x138] sm:$0xff]  ;;  %v8548_v41 = vld [vmem:[%s11732_s2 + $0x140] sm:$0xff]  ;;  %v691_v42 = vadd.f32 %v435_v26, %v179_v20  ;;  %v692_v43 = vadd.f32 %v436_v27, %v180_v25  ;;  %v181_v44 = vld [vmem:[%s11730_s0 + $0x530] sm:$0xff]  ;;  %v820_v56 = vmax.f32 %v564_v32, 0.0 }
  0x38   :  { %5419 = vmatprep.subr.bf16.mxu0 %v7965_v0  ;;  %v1055_v23 = vpack.c.bf16 %v816_v4, %v815_v3  ;;  %v945_v35 = vmax.f32 %v689_v9, 0.0  ;;  %v182_v45 = vld [vmem:[%s11730_s0 + $0x538] sm:$0xff]  ;;  %v437_v46 = vld [vmem:[%s11731_s1 + $0x530] sm:$0xff]  ;;  %v55_v48 = vld [vmem:[%s11730_s0 + $0x140] sm:$0xff]  ;;  %v565_v57 = vadd.f32 %v309_v37, %v53_v28 }
  0x39   :  { %4264 = vmatpush1.bf16.msra.mxu1 %v1051_v7  ;;  %v561_v7 = vadd.f32 %v305_v55, %v49_v51  ;;  %v1118_v11 = vpack.c.bf16 %v942_v59, %v941_v58  ;;  %v438_v47 = vld [vmem:[%s11731_s1 + $0x538] sm:$0xff]  ;;  %v56_v49 = vld [vmem:[%s11730_s0 + $0x148] sm:$0xff]  ;;  %v311_v52 = vld [vmem:[%s11731_s1 + $0x140] sm:$0xff]  ;;  %v566_v58 = vadd.f32 %v310_v38, %v54_v33  ;;  %v947_v1 = vmax.f32 %v691_v42, 0.0 }
  0x3a   :  { %4265 = vmatprep.subr.bf16.mxu1 %v7965_v0  ;;  %v1120_v51 = vpack.c.bf16 %v946_v36, %v945_v35  ;;  %v184_v59 = vld [vmem:[%s11730_s0 + $0x548] sm:$0xff]  ;;  %v439_v60 = vld [vmem:[%s11731_s1 + $0x540] sm:$0xff]  ;;  %v693_v3 = vadd.f32 %v437_v46, %v181_v44  ;;  %v694_v4 = vadd.f32 %v438_v47, %v182_v45  ;;  %v567_v10 = vadd.f32 %v311_v52, %v55_v48  ;;  %v57_v14 = vld [vmem:[%s11730_s0 + $0x150] sm:$0xff] }
  0x3b   :  { %5420 = vmatpush1.bf16.msra.mxu0 %v1115_v18  ;;  %v307_v18 = vld [vmem:[%s11731_s1 + $0x120] sm:$0xff]  ;;  %v817_v29 = vmax.f32 %v561_v7, 0.0  ;;  %v440_v61 = vld [vmem:[%s11731_s1 + $0x548] sm:$0xff]  ;;  %v6636_v7 = vcombine.low %v8475_v5, %v8480_v6  ;;  %v821_v6 = vmax.f32 %v565_v57, 0.0  ;;  %v822_v17 = vmax.f32 %v566_v58, 0.0  ;;  %v58_v15 = vld [vmem:[%s11730_s0 + $0x158] sm:$0xff] }
  0x3c   :  { %5421 = vmatprep.subr.bf16.mxu0 %v7965_v0  ;;  %v563_v31 = vadd.f32 %v307_v18, %v51_v16  ;;  %v8589_v62 = vld [vmem:[%s11732_s2 + $0x120] sm:$0xff]  ;;  %v949_v19 = vmax.f32 %v693_v3, 0.0  ;;  %v950_v20 = vmax.f32 %v694_v4, 0.0  ;;  %v186_v27 = vld [vmem:[%s11730_s0 + $0x558] sm:$0xff]  ;;  %v823_v36 = vmax.f32 %v567_v10, 0.0  ;;  %v188_v48 = vld [vmem:[%s11730_s0 + $0x568] sm:$0xff] }
  0x3d   :  { %4266 = vmatpush1.bf16.msra.mxu1 %v1052_v30  ;;  %v1119_v30 = vpack.c.bf16 %v944_v13, %v943_v12  ;;  %v1056_v50 = vpack.c.bf16 %v818_v34, %v817_v29  ;;  %v8594_v63 = vld [vmem:[%s11732_s2 + $0x160] sm:$0xff]  ;;  %v696_v13 = vadd.f32 %v440_v61, %v184_v59  ;;  %v441_v29 = vld [vmem:[%s11731_s1 + $0x550] sm:$0xff]  ;;  %v442_v34 = vld [vmem:[%s11731_s1 + $0x558] sm:$0xff]  ;;  %v1058_v33 = vpack.c.bf16 %v822_v17, %v821_v6 }
  0x3e   :  { %4267 = vmatprep.subr.bf16.mxu1 %v7965_v0  ;;  %v819_v55 = vmax.f32 %v563_v31, 0.0  ;;  %v6661_v16 = vcombine.high %v8589_v62, %v8594_v63  ;;  %v8631_v25 = vld [vmem:[%s11732_s2 + $0x1c0] sm:$0xff]  ;;  %v1122_v44 = vpack.c.bf16 %v950_v20, %v949_v19  ;;  %v698_v46 = vadd.f32 %v442_v34, %v186_v27  ;;  %v444_v52 = vld [vmem:[%s11731_s1 + $0x568] sm:$0xff]  ;;  %v317_v57 = vld [vmem:[%s11731_s1 + $0x170] sm:$0xff] }
  0x3f   :  { %5422 = vmatpush1.bf16.msra.mxu0 %v1116_v40  ;;  %v8543_v40 = vld [vmem:[%s11732_s2 + $0x100] sm:$0xff]  ;;  %v952_v31 = vmax.f32 %v696_v13, 0.0  ;;  %v318_v58 = vld [vmem:[%s11731_s1 + $0x178] sm:$0xff]  ;;  %v189_v59 = vld [vmem:[%s11730_s0 + $0x570] sm:$0xff] }
  0x40   :  { %5423 = vmatprep.subr.bf16.mxu0 %v7965_v0  ;;  %v6653_v9 = vcombine.high %v8543_v40, %v8548_v41  ;;  %v1057_v5 = vpack.c.bf16 %v820_v56, %v819_v55  ;;  %v8636_v26 = vld [vmem:[%s11732_s2 + $0x1a0] sm:$0xff]  ;;  %v446_v3 = vld [vmem:[%s11731_s1 + $0x578] sm:$0xff]  ;;  %v64_v20 = vld [vmem:[%s11730_s0 + $0x188] sm:$0xff] }
  0x41   :  { %4268 = vmatpush1.bf16.msra.mxu1 %v1053_v53  ;;  %v312_v53 = vld [vmem:[%s11731_s1 + $0x148] sm:$0xff]  ;;  %v8650_v35 = vld [vmem:[%s11732_s2 + $0x1e0] sm:$0xff] }
  0x42   :  { %4269 = vmatprep.subr.bf16.mxu1 %v7965_v0  ;;  %v59_v32 = vld [vmem:[%s11730_s0 + $0x160] sm:$0xff] }
  0x43   :  { %5424 = vmatpush1.bf16.msra.mxu0 %v1117_v54  ;;  %v183_v54 = vld [vmem:[%s11730_s0 + $0x540] sm:$0xff] }
  0x44   :  { %5425 = vmatprep.subr.bf16.mxu0 %v7965_v0  ;;  %v695_v12 = vadd.f32 %v439_v60, %v183_v54  ;;  %v315_v42 = vld [vmem:[%s11731_s1 + $0x160] sm:$0xff]  ;;  %v62_v54 = vld [vmem:[%s11730_s0 + $0x178] sm:$0xff] }
  0x45   :  { %4270 = vmatpush1.bf16.msra.mxu1 %v1054_v2  ;;  %v948_v2 = vmax.f32 %v692_v43, 0.0  ;;  %v316_v43 = vld [vmem:[%s11731_s1 + $0x168] sm:$0xff]  ;;  %v187_v47 = vld [vmem:[%s11730_s0 + $0x560] sm:$0xff] }
  0x46   :  { %4528 = vmatprep.subr.bf16.mxu1 %v7965_v0  ;;  %v8725_v13 = vld [vmem:[%s11732_s2 + $0x220] sm:$0xff] }
  0x47   :  { %5426 = vmatpush1.bf16.msra.mxu0 %v1118_v11  ;;  %v568_v11 = vadd.f32 %v312_v53, %v56_v49  ;;  %v1121_v18 = vpack.c.bf16 %v948_v2, %v947_v1  ;;  %v443_v49 = vld [vmem:[%s11731_s1 + $0x560] sm:$0xff]  ;;  %v61_v53 = vld [vmem:[%s11730_s0 + $0x170] sm:$0xff]  ;;  %v190_v1 = vld [vmem:[%s11730_s0 + $0x578] sm:$0xff] }
  0x48   :  { %5684 = vmatprep.subr.bf16.mxu0 %v7965_v0  ;;  %4272 = vmatmul.mubr.bf16.vlgmr.msra.gmra.mrb[0].mxu1 %v6620_v21  ;;  %v313_v21 = vld [vmem:[%s11731_s1 + $0x150] sm:$0xff]  ;;  %v573_v10 = vadd.f32 %v317_v57, %v61_v53  ;;  %v702_v6 = vadd.f32 %v446_v3, %v190_v1  ;;  %v8730_v17 = vld [vmem:[%s11732_s2 + $0x260] sm:$0xff]  ;;  %v450_v53 = vld [vmem:[%s11731_s1 + $0x598] sm:$0xff] }
  0x49   :  { %4529 = vmatpush1.bf16.msra.mxu1 %v1055_v23  ;;  %4279 = vmatprep.mubr.bf16.mxu1 %v6637_v24  ;;  %v185_v23 = vld [vmem:[%s11730_s0 + $0x550] sm:$0xff]  ;;  %v8626_v24 = vld [vmem:[%s11732_s2 + $0x180] sm:$0xff]  ;;  %v824_v28 = vmax.f32 %v568_v11, 0.0  ;;  %v569_v37 = vadd.f32 %v313_v21, %v57_v14 }
  0x4a   :  { %5428 = vmatmul.mubr.bf16.vlgmr.msra.gmra.mrb[0].mxu0 %v6628_v22  ;;  %4530 = vmatprep.subr.bf16.mxu1 %v7965_v0  ;;  %v314_v22 = vld [vmem:[%s11731_s1 + $0x158] sm:$0xff]  ;;  %v697_v45 = vadd.f32 %v441_v29, %v185_v23  ;;  %v445_v2 = vld [vmem:[%s11731_s1 + $0x570] sm:$0xff]  ;;  %v8715_v11 = vld [vmem:[%s11732_s2 + $0x200] sm:$0xff] }
  0x4b   :  { %5685 = vmatpush1.bf16.msra.mxu0 %v1119_v30  ;;  %5435 = vmatprep.mubr.bf16.mxu0 %v6645_v39  ;;  %v951_v30 = vmax.f32 %v695_v12, 0.0  ;;  %v570_v38 = vadd.f32 %v314_v22, %v58_v15  ;;  %v60_v39 = vld [vmem:[%s11730_s0 + $0x168] sm:$0xff]  ;;  %v1059_v55 = vpack.c.bf16 %v824_v28, %v823_v36  ;;  %v825_v60 = vmax.f32 %v569_v37, 0.0  ;;  %v8720_v12 = vld [vmem:[%s11732_s2 + $0x240] sm:$0xff] }
  0x4c   :  { %5686 = vmatprep.subr.bf16.mxu0 %v7965_v0  ;;  %v953_v4 = vmax.f32 %v697_v45, 0.0  ;;  %v63_v19 = vld [vmem:[%s11730_s0 + $0x180] sm:$0xff]  ;;  %v320_v29 = vld [vmem:[%s11731_s1 + $0x188] sm:$0xff]  ;;  %v6668_v36 = vcombine.low %v8626_v24, %v8631_v25  ;;  %v6676_v28 = vcombine.low %v8636_v26, %v8650_v35  ;;  %v6693_v37 = vcombine.high %v8725_v13, %v8730_v17 }
  0x4d   :  { %4531 = vmatpush1.bf16.msra.mxu1 %v1056_v50  ;;  %v6652_v50 = vcombine.low %v8543_v40, %v8548_v41  ;;  %v6669_v40 = vcombine.high %v8626_v24, %v8631_v25  ;;  %v6677_v41 = vcombine.high %v8636_v26, %v8650_v35  ;;  %v1123_v56 = vpack.c.bf16 %v952_v31, %v951_v30  ;;  %v319_v27 = vld [vmem:[%s11731_s1 + $0x180] sm:$0xff]  ;;  %v192_v31 = vld [vmem:[%s11730_s0 + $0x588] sm:$0xff] }
  0x4e   :  { %4532 = vmatprep.subr.bf16.mxu1 %v7965_v0  ;;  %v826_v61 = vmax.f32 %v570_v38, 0.0  ;;  %v191_v34 = vld [vmem:[%s11730_s0 + $0x580] sm:$0xff]  ;;  %v6685_v30 = vcombine.high %v8715_v11, %v8720_v12  ;;  %v448_v24 = vld [vmem:[%s11731_s1 + $0x588] sm:$0xff]  ;;  %v829_v25 = vmax.f32 %v573_v10, 0.0  ;;  %v958_v35 = vmax.f32 %v702_v6, 0.0 }
  0x4f   :  { %5687 = vmatpush1.bf16.msra.mxu0 %v1120_v51  ;;  %v6660_v51 = vcombine.low %v8589_v62, %v8594_v63  ;;  %v571_v62 = vadd.f32 %v315_v42, %v59_v32  ;;  %v572_v63 = vadd.f32 %v316_v43, %v60_v39  ;;  %v447_v32 = vld [vmem:[%s11731_s1 + $0x580] sm:$0xff]  ;;  %v575_v39 = vadd.f32 %v319_v27, %v63_v19  ;;  %v65_v43 = vld [vmem:[%s11730_s0 + $0x190] sm:$0xff] }
  0x50   :  { %5688 = vmatprep.subr.bf16.mxu0 %v7965_v0  ;;  %4280 = vmatmul.mubr.bf16.gmra.mrb[4].mxu1 %v6636_v7  ;;  %v954_v7 = vmax.f32 %v698_v46, 0.0  ;;  %v1060_v14 = vpack.c.bf16 %v826_v61, %v825_v60  ;;  %v576_v42 = vadd.f32 %v320_v29, %v64_v20  ;;  %v703_v46 = vadd.f32 %v447_v32, %v191_v34  ;;  %v8805_v60 = vld [vmem:[%s11732_s2 + $0x2a0] sm:$0xff]  ;;  %v324_v20 = vld [vmem:[%s11731_s1 + $0x1a8] sm:$0xff] }
  0x51   :  { %4287 = vmatprep.mubr.bf16.mxu1 %v6653_v9  ;;  %4533 = vmatpush1.bf16.msra.mxu1 %v1057_v5  ;;  %v700_v9 = vadd.f32 %v444_v52, %v188_v48  ;;  %v701_v5 = vadd.f32 %v445_v2, %v189_v59  ;;  %v827_v15 = vmax.f32 %v571_v62, 0.0  ;;  %v321_v48 = vld [vmem:[%s11731_s1 + $0x190] sm:$0xff]  ;;  %v8810_v61 = vld [vmem:[%s11732_s2 + $0x2e0] sm:$0xff]  ;;  %v6684_v3 = vcombine.low %v8715_v11, %v8720_v12 }
  0x52   :  { %5436 = vmatmul.mubr.bf16.gmra.mrb[4].mxu0 %v6644_v8  ;;  %4534 = vmatprep.subr.bf16.mxu1 %v7965_v0  ;;  %v699_v8 = vadd.f32 %v443_v49, %v187_v47  ;;  %v1124_v21 = vpack.c.bf16 %v954_v7, %v953_v4  ;;  %v704_v47 = vadd.f32 %v448_v24, %v192_v31  ;;  %v322_v49 = vld [vmem:[%s11731_s1 + $0x198] sm:$0xff]  ;;  %v449_v52 = vld [vmem:[%s11731_s1 + $0x590] sm:$0xff]  ;;  %v832_v57 = vmax.f32 %v576_v42, 0.0  ;;  %v1271_v6 = vld [vmem:[%s11732_s2 + $0x340] sm:$0xff] }
  0x53   :  { %5443 = vmatprep.mubr.bf16.mxu0 %v6661_v16  ;;  %5689 = vmatpush1.bf16.msra.mxu0 %v1121_v18  ;;  %v574_v16 = vadd.f32 %v318_v58, %v62_v54  ;;  %v828_v18 = vmax.f32 %v572_v63, 0.0  ;;  %v956_v23 = vmax.f32 %v700_v9, 0.0  ;;  %v957_v26 = vmax.f32 %v701_v5, 0.0  ;;  %v1275_v27 = vld [vmem:[%s11732_s2 + $0x360] sm:$0xff] }
  0x54   :  { %5690 = vmatprep.subr.bf16.mxu0 %v7965_v0  ;;  %v955_v22 = vmax.f32 %v699_v8, 0.0  ;;  %v577_v58 = vadd.f32 %v321_v48, %v65_v43  ;;  %v959_v62 = vmax.f32 %v703_v46, 0.0  ;;  %v960_v63 = vmax.f32 %v704_v47, 0.0  ;;  %v1279_v43 = vld [vmem:[%s11732_s2 + $0x380] sm:$0xff] }
  0x55   :  { %4535 = vmatpush1.bf16.msra.mxu1 %v1058_v33  ;;  %v830_v33 = vmax.f32 %v574_v16, 0.0  ;;  %v1061_v38 = vpack.c.bf16 %v828_v18, %v827_v15  ;;  %v6692_v4 = vcombine.low %v8725_v13, %v8730_v17  ;;  %v6709_v8 = vcombine.high %v8805_v60, %v8810_v61  ;;  %v1263_v13 = vld [vmem:[%s11732_s2 + $0x300] sm:$0xff]  ;;  %v68_v15 = vld [vmem:[%s11730_s0 + $0x1a8] sm:$0xff] }
  0x56   :  { %4536 = vmatprep.subr.bf16.mxu1 %v7965_v0  ;;  %v1125_v45 = vpack.c.bf16 %v956_v23, %v955_v22  ;;  %v833_v10 = vmax.f32 %v577_v58, 0.0  ;;  %v1127_v5 = vpack.c.bf16 %v960_v63, %v959_v62  ;;  %v1267_v17 = vld [vmem:[%s11732_s2 + $0x320] sm:$0xff]  ;;  %v196_v23 = vld [vmem:[%s11730_s0 + $0x5a8] sm:$0xff]  ;;  %v580_v34 = vadd.f32 %v324_v20, %v68_v15  ;;  %v198_v58 = vld [vmem:[%s11730_s0 + $0x5b8] sm:$0xff] }
  0x57   :  { %5691 = vmatpush1.bf16.msra.mxu0 %v1122_v44  ;;  %v66_v44 = vld [vmem:[%s11730_s0 + $0x198] sm:$0xff]  ;;  %v1062_v54 = vpack.c.bf16 %v830_v33, %v829_v25  ;;  %v323_v18 = vld [vmem:[%s11731_s1 + $0x1a0] sm:$0xff]  ;;  %v6708_v25 = vcombine.low %v8805_v60, %v8810_v61  ;;  %v6717_v33 = vcombine.high %v1263_v13, %v1271_v6  ;;  %v6716_v47 = vcombine.low %v1263_v13, %v1271_v6  ;;  %v453_v61 = vld [vmem:[%s11731_s1 + $0x5b0] sm:$0xff] }
  0x58   :  { %4288 = vmatmul.mubr.bf16.gmra.mrb[8].mxu1 %v6652_v50  ;;  %5692 = vmatprep.subr.bf16.mxu0 %v7965_v0  ;;  %v193_v50 = vld [vmem:[%s11730_s0 + $0x590] sm:$0xff]  ;;  %v578_v59 = vadd.f32 %v322_v49, %v66_v44  ;;  %v195_v22 = vld [vmem:[%s11730_s0 + $0x5a0] sm:$0xff]  ;;  %v6724_v48 = vcombine.low %v1267_v17, %v1275_v27  ;;  %v454_v62 = vld [vmem:[%s11731_s1 + $0x5b8] sm:$0xff] }
  0x59   :  { %4295 = vmatprep.mubr.bf16.mxu1 %v6669_v40  ;;  %4537 = vmatpush1.bf16.msra.mxu1 %v1059_v55  ;;  %v1126_v40 = vpack.c.bf16 %v958_v35, %v957_v26  ;;  %v8800_v55 = vld [vmem:[%s11732_s2 + $0x2c0] sm:$0xff]  ;;  %v705_v1 = vadd.f32 %v449_v52, %v193_v50  ;;  %v836_v26 = vmax.f32 %v580_v34, 0.0  ;;  %v6725_v35 = vcombine.high %v1267_v17, %v1275_v27  ;;  %v72_v27 = vld [vmem:[%s11730_s0 + $0x1c8] sm:$0xff] }
  0x5a   :  { %5444 = vmatmul.mubr.bf16.gmra.mrb[8].mxu0 %v6660_v51  ;;  %4538 = vmatprep.subr.bf16.mxu1 %v7965_v0  ;;  %v194_v51 = vld [vmem:[%s11730_s0 + $0x598] sm:$0xff]  ;;  %v834_v16 = vmax.f32 %v578_v59, 0.0  ;;  %v1287_v44 = vld [vmem:[%s11732_s2 + $0x3c0] sm:$0xff]  ;;  %v328_v34 = vld [vmem:[%s11731_s1 + $0x1c8] sm:$0xff] }
  0x5b   :  { %5451 = vmatprep.mubr.bf16.mxu0 %v6677_v41  ;;  %5693 = vmatpush1.bf16.msra.mxu0 %v1123_v56  ;;  %v8795_v41 = vld [vmem:[%s11732_s2 + $0x280] sm:$0xff]  ;;  %v831_v56 = vmax.f32 %v575_v39, 0.0  ;;  %v706_v2 = vadd.f32 %v450_v53, %v194_v51  ;;  %v961_v11 = vmax.f32 %v705_v1, 0.0  ;;  %v6733_v49 = vcombine.high %v1279_v43, %v1287_v44 }
  0x5c   :  { %5694 = vmatprep.subr.bf16.mxu0 %v7965_v0  ;;  %v6701_v7 = vcombine.high %v8795_v41, %v8800_v55  ;;  %v1064_v19 = vpack.c.bf16 %v834_v16, %v833_v10  ;;  %v1291_v46 = vld [vmem:[%s11732_s2 + $0x3e0] sm:$0xff]  ;;  %v6732_v63 = vcombine.low %v1279_v43, %v1287_v44 }
  0x5d   :  { %4539 = vmatpush1.bf16.msra.mxu1 %v1060_v14  ;;  %v1063_v9 = vpack.c.bf16 %v832_v57, %v831_v56  ;;  %v962_v12 = vmax.f32 %v706_v2, 0.0  ;;  %v67_v14 = vld [vmem:[%s11730_s0 + $0x1a0] sm:$0xff]  ;;  %v197_v57 = vld [vmem:[%s11730_s0 + $0x5b0] sm:$0xff] }
  0x5e   :  { %4540 = vmatprep.subr.bf16.mxu1 %v7965_v0  ;;  %v1295_v51 = vld [vmem:[%s11732_s2 + $0x400] sm:$0xff]  ;;  %v709_v2 = vadd.f32 %v453_v61, %v197_v57  ;;  %v73_v57 = vld [vmem:[%s11730_s0 + $0x1d0] sm:$0xff] }
  0x5f   :  { %5695 = vmatpush1.bf16.msra.mxu0 %v1124_v21  ;;  %v579_v21 = vadd.f32 %v323_v18, %v67_v14  ;;  %v1128_v29 = vpack.c.bf16 %v962_v12, %v961_v11  ;;  %v1303_v52 = vld [vmem:[%s11732_s2 + $0x440] sm:$0xff] }
  0x60   :  { %4296 = vmatmul.mubr.bf16.gmra.mrb[12].mxu1 %v6668_v36  ;;  %5696 = vmatprep.subr.bf16.mxu0 %v7965_v0  ;;  %v451_v36 = vld [vmem:[%s11731_s1 + $0x5a0] sm:$0xff]  ;;  %v965_v10 = vmax.f32 %v709_v2, 0.0  ;;  %v6748_v14 = vcombine.low %v1295_v51, %v1303_v52 }
  0x61   :  { %4303 = vmatprep.mubr.bf16.mxu1 %v6685_v30  ;;  %4541 = vmatpush1.bf16.msra.mxu1 %v1061_v38  ;;  %v6700_v30 = vcombine.low %v8795_v41, %v8800_v55  ;;  %v835_v31 = vmax.f32 %v579_v21, 0.0  ;;  %v707_v32 = vadd.f32 %v451_v36, %v195_v22  ;;  %v1299_v53 = vld [vmem:[%s11732_s2 + $0x420] sm:$0xff]  ;;  %v325_v41 = vld [vmem:[%s11731_s1 + $0x1b0] sm:$0xff]  ;;  %v326_v55 = vld [vmem:[%s11731_s1 + $0x1b8] sm:$0xff] }
  0x62   :  { %5452 = vmatmul.mubr.bf16.gmra.mrb[12].mxu0 %v6676_v28  ;;  %4542 = vmatprep.subr.bf16.mxu1 %v7965_v0  ;;  %v452_v28 = vld [vmem:[%s11731_s1 + $0x5a8] sm:$0xff]  ;;  %v1307_v59 = vld [vmem:[%s11732_s2 + $0x460] sm:$0xff] }
  0x63   :  { %5459 = vmatprep.mubr.bf16.mxu0 %v6693_v37  ;;  %5697 = vmatpush1.bf16.msra.mxu0 %v1125_v45  ;;  %v708_v24 = vadd.f32 %v452_v28, %v196_v23  ;;  %v963_v37 = vmax.f32 %v707_v32, 0.0  ;;  %v1065_v39 = vpack.c.bf16 %v836_v26, %v835_v31  ;;  %v1283_v45 = vld [vmem:[%s11732_s2 + $0x3a0] sm:$0xff]  ;;  %v6756_v15 = vcombine.low %v1299_v53, %v1307_v59 }
  0x64   :  { %5698 = vmatprep.subr.bf16.mxu0 %v7965_v0  ;;  %v6741_v50 = vcombine.high %v1283_v45, %v1291_v46  ;;  %v1311_v12 = vld [vmem:[%s11732_s2 + $0x480] sm:$0xff]  ;;  %v584_v32 = vadd.f32 %v328_v34, %v72_v27 }
  0x65   :  { %4543 = vmatpush1.bf16.msra.mxu1 %v1062_v54  ;;  %v964_v38 = vmax.f32 %v708_v24, 0.0  ;;  %v69_v54 = vld [vmem:[%s11730_s0 + $0x1b0] sm:$0xff]  ;;  %v1319_v13 = vld [vmem:[%s11732_s2 + $0x4c0] sm:$0xff] }
  0x66   :  { %4544 = vmatprep.subr.bf16.mxu1 %v7965_v0  ;;  %v581_v56 = vadd.f32 %v325_v41, %v69_v54  ;;  %v1315_v6 = vld [vmem:[%s11732_s2 + $0x4a0] sm:$0xff]  ;;  %v6765_v18 = vcombine.high %v1311_v12, %v1319_v13 }
  0x67   :  { %5699 = vmatpush1.bf16.msra.mxu0 %v1126_v40  ;;  %v1129_v42 = vpack.c.bf16 %v964_v38, %v963_v37  ;;  %v70_v40 = vld [vmem:[%s11730_s0 + $0x1b8] sm:$0xff]  ;;  %v1323_v17 = vld [vmem:[%s11732_s2 + $0x4e0] sm:$0xff] }
  0x68   :  { %4304 = vmatmul.mubr.bf16.gmra.mrb[16].mxu1 %v6684_v3  ;;  %5700 = vmatprep.subr.bf16.mxu0 %v7965_v0  ;;  %v582_v60 = vadd.f32 %v326_v55, %v70_v40  ;;  %v837_v1 = vmax.f32 %v581_v56, 0.0  ;;  %v710_v3 = vadd.f32 %v454_v62, %v198_v58  ;;  %v1327_v20 = vld [vmem:[%s11732_s2 + $0x500] sm:$0xff]  ;;  %v6772_v38 = vcombine.low %v1315_v6, %v1323_v17  ;;  %v74_v58 = vld [vmem:[%s11730_s0 + $0x1d8] sm:$0xff]  ;;  %v201_v62 = vld [vmem:[%s11730_s0 + $0x5d0] sm:$0xff] }
  0x69   :  { %4311 = vmatprep.mubr.bf16.mxu1 %v6701_v7  ;;  %4545 = vmatpush1.bf16.msra.mxu1 %v1063_v9  ;;  %v6749_v7 = vcombine.high %v1295_v51, %v1303_v52  ;;  %v6757_v9 = vcombine.high %v1299_v53, %v1307_v59  ;;  %v1335_v21 = vld [vmem:[%s11732_s2 + $0x540] sm:$0xff]  ;;  %v329_v59 = vld [vmem:[%s11731_s1 + $0x1d0] sm:$0xff] }
  0x6a   :  { %5460 = vmatmul.mubr.bf16.gmra.mrb[16].mxu0 %v6692_v4  ;;  %4546 = vmatprep.subr.bf16.mxu1 %v7965_v0  ;;  %v6740_v4 = vcombine.low %v1283_v45, %v1291_v46  ;;  %v966_v16 = vmax.f32 %v710_v3, 0.0  ;;  %v1331_v22 = vld [vmem:[%s11732_s2 + $0x520] sm:$0xff]  ;;  %v6780_v52 = vcombine.low %v1327_v20, %v1335_v21  ;;  %v585_v61 = vadd.f32 %v329_v59, %v73_v57  ;;  %v457_v3 = vld [vmem:[%s11731_s1 + $0x5d0] sm:$0xff] }
  0x6b   :  { %5467 = vmatprep.mubr.bf16.mxu0 %v6709_v8  ;;  %5701 = vmatpush1.bf16.msra.mxu0 %v1127_v5  ;;  %v838_v8 = vmax.f32 %v582_v60, 0.0  ;;  %v71_v23 = vld [vmem:[%s11730_s0 + $0x1c0] sm:$0xff]  ;;  %v330_v60 = vld [vmem:[%s11731_s1 + $0x1d8] sm:$0xff] }
  0x6c   :  { %5702 = vmatprep.subr.bf16.mxu0 %v7965_v0  ;;  %v1130_v11 = vpack.c.bf16 %v966_v16, %v965_v10  ;;  %v199_v28 = vld [vmem:[%s11730_s0 + $0x5c0] sm:$0xff]  ;;  %v586_v2 = vadd.f32 %v330_v60, %v74_v58 }
  0x6d   :  { %4547 = vmatpush1.bf16.msra.mxu1 %v1064_v19  ;;  %v1066_v5 = vpack.c.bf16 %v838_v8, %v837_v1  ;;  %v6773_v19 = vcombine.high %v1315_v6, %v1323_v17  ;;  %v1339_v31 = vld [vmem:[%s11732_s2 + $0x560] sm:$0xff]  ;;  %v841_v8 = vmax.f32 %v585_v61, 0.0 }
  0x6e   :  { %4548 = vmatprep.subr.bf16.mxu1 %v7965_v0  ;;  %v455_v24 = vld [vmem:[%s11731_s1 + $0x5c0] sm:$0xff]  ;;  %v6789_v43 = vcombine.high %v1331_v22, %v1339_v31  ;;  %v6788_v53 = vcombine.low %v1331_v22, %v1339_v31 }
  0x6f   :  { %5703 = vmatpush1.bf16.msra.mxu0 %v1128_v29  ;;  %v327_v29 = vld [vmem:[%s11731_s1 + $0x1c0] sm:$0xff] }
  0x70   :  { %4312 = vmatmul.mubr.bf16.gmra.mrb[20].mxu1 %v6700_v30  ;;  %5704 = vmatprep.subr.bf16.mxu0 %v7965_v0  ;;  %v583_v36 = vadd.f32 %v327_v29, %v71_v23  ;;  %v200_v30 = vld [vmem:[%s11730_s0 + $0x5c8] sm:$0xff]  ;;  %v1355_v51 = vld [vmem:[%s11732_s2 + $0x5e0] sm:$0xff] }
  0x71   :  { %4319 = vmatprep.mubr.bf16.mxu1 %v6717_v33  ;;  %4549 = vmatpush1.bf16.msra.mxu1 %v1065_v39  ;;  %v6764_v33 = vcombine.low %v1311_v12, %v1319_v13  ;;  %v6781_v39 = vcombine.high %v1327_v20, %v1335_v21  ;;  %v1359_v41 = vld [vmem:[%s11732_s2 + $0x600] sm:$0xff] }
  0x72   :  { %5468 = vmatmul.mubr.bf16.gmra.mrb[20].mxu0 %v6708_v25  ;;  %4550 = vmatprep.subr.bf16.mxu1 %v7965_v0  ;;  %v456_v25 = vld [vmem:[%s11731_s1 + $0x5c8] sm:$0xff]  ;;  %v839_v26 = vmax.f32 %v583_v36, 0.0  ;;  %v1367_v55 = vld [vmem:[%s11732_s2 + $0x640] sm:$0xff] }
  0x73   :  { %5475 = vmatprep.mubr.bf16.mxu0 %v6725_v35  ;;  %5705 = vmatpush1.bf16.msra.mxu0 %v1129_v42  ;;  %v711_v35 = vadd.f32 %v455_v24, %v199_v28  ;;  %v712_v37 = vadd.f32 %v456_v25, %v200_v30  ;;  %v840_v42 = vmax.f32 %v584_v32, 0.0  ;;  %v1363_v56 = vld [vmem:[%s11732_s2 + $0x620] sm:$0xff]  ;;  %v6812_v21 = vcombine.low %v1359_v41, %v1367_v55  ;;  %v76_v30 = vld [vmem:[%s11730_s0 + $0x1e8] sm:$0xff] }
  0x74   :  { %5706 = vmatprep.subr.bf16.mxu0 %v7965_v0  ;;  %v1371_v1 = vld [vmem:[%s11732_s2 + $0x660] sm:$0xff]  ;;  %v332_v32 = vld [vmem:[%s11731_s1 + $0x1e8] sm:$0xff] }
  0x75   :  { %4551 = vmatpush1.bf16.msra.mxu1 %v1066_v5  ;;  %v967_v44 = vmax.f32 %v711_v35, 0.0  ;;  %v968_v45 = vmax.f32 %v712_v37, 0.0  ;;  %v1067_v46 = vpack.c.bf16 %v840_v42, %v839_v26  ;;  %v6813_v5 = vcombine.high %v1359_v41, %v1367_v55  ;;  %v1387_v20 = vld [vmem:[%s11732_s2 + $0x6e0] sm:$0xff] }
  0x76   :  { %4552 = vmatprep.subr.bf16.mxu1 %v7965_v0  ;;  %v6821_v12 = vcombine.high %v1363_v56, %v1371_v1  ;;  %v6820_v22 = vcombine.low %v1363_v56, %v1371_v1  ;;  %v1391_v29 = vld [vmem:[%s11732_s2 + $0x700] sm:$0xff]  ;;  %v588_v35 = vadd.f32 %v332_v32, %v76_v30  ;;  %v333_v1 = vld [vmem:[%s11731_s1 + $0x1f0] sm:$0xff] }
  0x77   :  { %5707 = vmatpush1.bf16.msra.mxu0 %v1130_v11  ;;  %v842_v11 = vmax.f32 %v586_v2, 0.0  ;;  %v1399_v34 = vld [vmem:[%s11732_s2 + $0x740] sm:$0xff]  ;;  %v334_v2 = vld [vmem:[%s11731_s1 + $0x1f8] sm:$0xff] }
  0x78   :  { %4320 = vmatmul.mubr.bf16.gmra.mrb[24].mxu1 %v6716_v47  ;;  %5708 = vmatprep.subr.bf16.mxu0 %v7965_v0  ;;  %v1131_v47 = vpack.c.bf16 %v968_v45, %v967_v44  ;;  %v1395_v36 = vld [vmem:[%s11732_s2 + $0x720] sm:$0xff]  ;;  %v6844_v55 = vcombine.low %v1391_v29, %v1399_v34 }
  0x79   :  { %4327 = vmatprep.mubr.bf16.mxu1 %v6733_v49  ;;  %v1351_v49 = vld [vmem:[%s11732_s2 + $0x5c0] sm:$0xff]  ;;  %4553 = vmatpush1.bf16.msra.mxu1 %v1067_v46  ;;  %v1068_v17 = vpack.c.bf16 %v842_v11, %v841_v8  ;;  %v6845_v46 = vcombine.high %v1391_v29, %v1399_v34 }
  0x7a   :  { %5476 = vmatmul.mubr.bf16.gmra.mrb[24].mxu0 %v6724_v48  ;;  %v1343_v48 = vld [vmem:[%s11732_s2 + $0x580] sm:$0xff]  ;;  %4554 = vmatprep.subr.bf16.mxu1 %v7965_v0 }
  0x7b   :  { %5483 = vmatprep.mubr.bf16.mxu0 %v6741_v50  ;;  %v1347_v50 = vld [vmem:[%s11732_s2 + $0x5a0] sm:$0xff]  ;;  %5709 = vmatpush1.bf16.msra.mxu0 %v1131_v47  ;;  %v6797_v54 = vcombine.high %v1343_v48, %v1351_v49  ;;  %v844_v47 = vmax.f32 %v588_v35, 0.0 }
  0x7c   :  { %5710 = vmatprep.subr.bf16.mxu0 %v7965_v0  ;;  %v6805_v40 = vcombine.high %v1347_v50, %v1355_v51  ;;  %v6804_v16 = vcombine.low %v1347_v50, %v1355_v51  ;;  %v75_v28 = vld [vmem:[%s11730_s0 + $0x1e0] sm:$0xff] }
  0x7d   :  { %4555 = vmatpush1.bf16.msra.mxu1 %v1068_v17  ;;  %v331_v31 = vld [vmem:[%s11731_s1 + $0x1e0] sm:$0xff] }
  0x7e   :  { %4556 = vmatprep.subr.bf16.mxu1 %v7965_v0  ;;  %v587_v24 = vadd.f32 %v331_v31, %v75_v28  ;;  %v203_v25 = vld [vmem:[%s11730_s0 + $0x5e0] sm:$0xff] }
  0x7f   :  { %v1403_v26 = vld [vmem:[%s11732_s2 + $0x760] sm:$0xff] }
  0x80   :  { %4328 = vmatmul.mubr.bf16.gmra.mrb[28].mxu1 %v6732_v63  ;;  %v202_v63 = vld [vmem:[%s11730_s0 + $0x5d8] sm:$0xff]  ;;  %v459_v37 = vld [vmem:[%s11731_s1 + $0x5e0] sm:$0xff]  ;;  %v843_v42 = vmax.f32 %v587_v24, 0.0  ;;  %v6852_v56 = vcombine.low %v1395_v36, %v1403_v26 }
  0x81   :  { %4335 = vmatprep.mubr.bf16.mxu1 %v6749_v7  ;;  %v6796_v7 = vcombine.low %v1343_v48, %v1351_v49  ;;  %v6853_v48 = vcombine.high %v1395_v36, %v1403_v26  ;;  %v1419_v41 = vld [vmem:[%s11732_s2 + $0x7e0] sm:$0xff] }
  0x82   :  { %5484 = vmatmul.mubr.bf16.gmra.mrb[28].mxu0 %v6740_v4  ;;  %v458_v4 = vld [vmem:[%s11731_s1 + $0x5d8] sm:$0xff]  ;;  %v1069_v51 = vpack.c.bf16 %v844_v47, %v843_v42  ;;  %v1423_v59 = vld [vmem:[%s11732_s2 + $0x800] sm:$0xff] }
  0x83   :  { %5491 = vmatprep.mubr.bf16.mxu0 %v6757_v9  ;;  %v713_v9 = vadd.f32 %v457_v3, %v201_v62  ;;  %v714_v10 = vadd.f32 %v458_v4, %v202_v63  ;;  %v1431_v60 = vld [vmem:[%s11732_s2 + $0x840] sm:$0xff]  ;;  %v77_v62 = vld [vmem:[%s11730_s0 + $0x1f0] sm:$0xff]  ;;  %v78_v63 = vld [vmem:[%s11730_s0 + $0x1f8] sm:$0xff] }
  0x84   :  { %4557 = vmatpush1.bf16.msra.mxu1 %v1069_v51  ;;  %v1427_v61 = vld [vmem:[%s11732_s2 + $0x820] sm:$0xff]  ;;  %v589_v3 = vadd.f32 %v333_v1, %v77_v62  ;;  %v205_v4 = vld [vmem:[%s11730_s0 + $0x5f0] sm:$0xff]  ;;  %v6877_v17 = vcombine.high %v1423_v59, %v1431_v60  ;;  %v6876_v34 = vcombine.low %v1423_v59, %v1431_v60 }
  0x85   :  { %v969_v13 = vmax.f32 %v713_v9, 0.0  ;;  %v970_v6 = vmax.f32 %v714_v10, 0.0  ;;  %4558 = vmatprep.subr.bf16.mxu1 %v7965_v0  ;;  %v1435_v8 = vld [vmem:[%s11732_s2 + $0x860] sm:$0xff]  ;;  %v590_v9 = vadd.f32 %v334_v2, %v78_v63  ;;  %v461_v10 = vld [vmem:[%s11731_s1 + $0x5f0] sm:$0xff] }
  0x86   :  { %v845_v11 = vmax.f32 %v589_v3, 0.0  ;;  %v1451_v29 = vld [vmem:[%s11732_s2 + $0x8e0] sm:$0xff]  ;;  %v6884_v36 = vcombine.low %v1427_v61, %v1435_v8 }
  0x87   :  { %v1455_v31 = vld [vmem:[%s11732_s2 + $0x900] sm:$0xff] }
  0x88   :  { %4336 = vmatmul.mubr.bf16.gmra.mrb[32].mxu1 %v6748_v14  ;;  %v1132_v14 = vpack.c.bf16 %v970_v6, %v969_v13  ;;  %v1463_v32 = vld [vmem:[%s11732_s2 + $0x940] sm:$0xff] }
  0x89   :  { %4343 = vmatprep.mubr.bf16.mxu1 %v6765_v18  ;;  %v1383_v18 = vld [vmem:[%s11732_s2 + $0x6c0] sm:$0xff]  ;;  %v6909_v35 = vcombine.high %v1455_v31, %v1463_v32 }
  0x8a   :  { %5492 = vmatmul.mubr.bf16.gmra.mrb[32].mxu0 %v6756_v15  ;;  %v1375_v15 = vld [vmem:[%s11732_s2 + $0x680] sm:$0xff] }
  0x8b   :  { %5499 = vmatprep.mubr.bf16.mxu0 %v6773_v19  ;;  %v1379_v19 = vld [vmem:[%s11732_s2 + $0x6a0] sm:$0xff]  ;;  %5711 = vmatpush1.bf16.msra.mxu0 %v1132_v14  ;;  %v6829_v23 = vcombine.high %v1375_v15, %v1383_v18  ;;  %v846_v14 = vmax.f32 %v590_v9, 0.0 }
  0x8c   :  { %5712 = vmatprep.subr.bf16.mxu0 %v7965_v0  ;;  %v6837_v27 = vcombine.high %v1379_v19, %v1387_v20  ;;  %v6836_v45 = vcombine.low %v1379_v19, %v1387_v20  ;;  %v1459_v24 = vld [vmem:[%s11732_s2 + $0x920] sm:$0xff] }
  0x8d   :  { %v1070_v20 = vpack.c.bf16 %v846_v14, %v845_v11  ;;  %v1475_v42 = vld [vmem:[%s11732_s2 + $0x9a0] sm:$0xff] }
  0x8e   :  { %v1499_v51 = vld [vmem:[%s11732_s2 + $0xa60] sm:$0xff] }
  0x8f   :  { %4559 = vmatpush1.bf16.msra.mxu1 %v1070_v20  ;;  %v1519_v62 = vld [vmem:[%s11732_s2 + $0xb00] sm:$0xff] }
  0x90   :  { %4344 = vmatmul.mubr.bf16.gmra.mrb[36].mxu1 %v6764_v33  ;;  %v204_v33 = vld [vmem:[%s11730_s0 + $0x5e8] sm:$0xff]  ;;  %4817 = vmatprep.subr.bf16.mxu1 %v7965_v0  ;;  %v1527_v63 = vld [vmem:[%s11732_s2 + $0xb40] sm:$0xff] }
  0x91   :  { %4351 = vmatprep.mubr.bf16.mxu1 %v6781_v39  ;;  %v6828_v39 = vcombine.low %v1375_v15, %v1383_v18  ;;  %v6885_v15 = vcombine.high %v1427_v61, %v1435_v8  ;;  %v1523_v1 = vld [vmem:[%s11732_s2 + $0xb20] sm:$0xff]  ;;  %v6972_v11 = vcombine.low %v1519_v62, %v1527_v63 }
  0x92   :  { %5500 = vmatmul.mubr.bf16.gmra.mrb[36].mxu0 %v6772_v38  ;;  %v460_v38 = vld [vmem:[%s11731_s1 + $0x5e8] sm:$0xff]  ;;  %v1531_v2 = vld [vmem:[%s11732_s2 + $0xb60] sm:$0xff] }
  0x93   :  { %5507 = vmatprep.mubr.bf16.mxu0 %v6789_v43  ;;  %v715_v43 = vadd.f32 %v459_v37, %v203_v25  ;;  %v716_v44 = vadd.f32 %v460_v38, %v204_v33  ;;  %v1467_v25 = vld [vmem:[%s11732_s2 + $0x960] sm:$0xff]  ;;  %v6981_v8 = vcombine.high %v1523_v1, %v1531_v2 }
  0x94   :  { %v6917_v37 = vcombine.high %v1459_v24, %v1467_v25  ;;  %v1471_v38 = vld [vmem:[%s11732_s2 + $0x980] sm:$0xff] }
  0x95   :  { %v971_v49 = vmax.f32 %v715_v43, 0.0  ;;  %v972_v50 = vmax.f32 %v716_v44, 0.0  ;;  %v1483_v43 = vld [vmem:[%s11732_s2 + $0x9e0] sm:$0xff]  ;;  %v6908_v44 = vcombine.low %v1455_v31, %v1463_v32 }
  0x96   :  { %v6933_v47 = vcombine.high %v1475_v42, %v1483_v43  ;;  %v1535_v9 = vld [vmem:[%s11732_s2 + $0xb80] sm:$0xff] }
  0x97   :  { %v1559_v14 = vld [vmem:[%s11732_s2 + $0xc40] sm:$0xff] }
  0x98   :  { %4352 = vmatmul.mubr.bf16.gmra.mrb[40].mxu1 %v6780_v52  ;;  %v1133_v52 = vpack.c.bf16 %v972_v50, %v971_v49  ;;  %v1495_v49 = vld [vmem:[%s11732_s2 + $0xa40] sm:$0xff] }
  0x99   :  { %4359 = vmatprep.mubr.bf16.mxu1 %v6797_v54  ;;  %v1415_v54 = vld [vmem:[%s11732_s2 + $0x7c0] sm:$0xff] }
  0x9a   :  { %5508 = vmatmul.mubr.bf16.gmra.mrb[40].mxu0 %v6788_v53  ;;  %v1407_v53 = vld [vmem:[%s11732_s2 + $0x780] sm:$0xff] }
  0x9b   :  { %5515 = vmatprep.mubr.bf16.mxu0 %v6805_v40  ;;  %v1411_v40 = vld [vmem:[%s11732_s2 + $0x7a0] sm:$0xff]  ;;  %5713 = vmatpush1.bf16.msra.mxu0 %v1133_v52  ;;  %v6861_v57 = vcombine.high %v1407_v53, %v1415_v54 }
  0x9c   :  { %5714 = vmatprep.subr.bf16.mxu0 %v7965_v0  ;;  %v6869_v58 = vcombine.high %v1411_v40, %v1419_v41  ;;  %v6868_v6 = vcombine.low %v1411_v40, %v1419_v41  ;;  %v1491_v50 = vld [vmem:[%s11732_s2 + $0xa20] sm:$0xff] }
  0x9d   :  { %v6949_v40 = vcombine.high %v1491_v50, %v1499_v51  ;;  %v1503_v41 = vld [vmem:[%s11732_s2 + $0xa80] sm:$0xff]  ;;  %v6948_v59 = vcombine.low %v1491_v50, %v1499_v51 }
  0x9e   :  { %v1583_v32 = vld [vmem:[%s11732_s2 + $0xd00] sm:$0xff] }
  0x9f   :  { %v1623_v50 = vld [vmem:[%s11732_s2 + $0xe40] sm:$0xff] }
  0xa0   :  { %4360 = vmatmul.mubr.bf16.gmra.mrb[44].mxu1 %v6796_v7  ;;  %v206_v7 = vld [vmem:[%s11730_s0 + $0x5f8] sm:$0xff]  ;;  %v1619_v51 = vld [vmem:[%s11732_s2 + $0xe20] sm:$0xff] }
  0xa1   :  { %4367 = vmatprep.mubr.bf16.mxu1 %v6813_v5  ;;  %v6860_v5 = vcombine.low %v1407_v53, %v1415_v54  ;;  %v6932_v53 = vcombine.low %v1475_v42, %v1483_v43  ;;  %v1607_v42 = vld [vmem:[%s11732_s2 + $0xdc0] sm:$0xff] }
  0xa2   :  { %5516 = vmatmul.mubr.bf16.gmra.mrb[44].mxu0 %v6804_v16  ;;  %v462_v16 = vld [vmem:[%s11731_s1 + $0x5f8] sm:$0xff]  ;;  %v1603_v43 = vld [vmem:[%s11732_s2 + $0xda0] sm:$0xff] }
  0xa3   :  { %5523 = vmatprep.mubr.bf16.mxu0 %v6821_v12  ;;  %v717_v12 = vadd.f32 %v461_v10, %v205_v4  ;;  %v718_v13 = vadd.f32 %v462_v16, %v206_v7  ;;  %v6973_v7 = vcombine.high %v1519_v62, %v1527_v63  ;;  %v1543_v10 = vld [vmem:[%s11732_s2 + $0xbc0] sm:$0xff] }
  0xa4   :  { %v1539_v16 = vld [vmem:[%s11732_s2 + $0xba0] sm:$0xff] }
  0xa5   :  { %v973_v18 = vmax.f32 %v717_v12, 0.0  ;;  %v974_v19 = vmax.f32 %v718_v13, 0.0  ;;  %v6980_v12 = vcombine.low %v1523_v1, %v1531_v2  ;;  %v6989_v13 = vcombine.high %v1535_v9, %v1543_v10  ;;  %v1647_v63 = vld [vmem:[%s11732_s2 + $0xf00] sm:$0xff] }
  0xa6   :  { %v1655_v1 = vld [vmem:[%s11732_s2 + $0xf40] sm:$0xff] }
  0xa7   :  { %v1651_v2 = vld [vmem:[%s11732_s2 + $0xf20] sm:$0xff] }
  0xa8   :  { %4368 = vmatmul.mubr.bf16.gmra.mrb[48].mxu1 %v6812_v21  ;;  %v1134_v21 = vpack.c.bf16 %v974_v19, %v973_v18  ;;  %v1563_v18 = vld [vmem:[%s11732_s2 + $0xc60] sm:$0xff]  ;;  %v6988_v19 = vcombine.low %v1535_v9, %v1543_v10 }
  0xa9   :  { %4375 = vmatprep.mubr.bf16.mxu1 %v6829_v23  ;;  %v1447_v23 = vld [vmem:[%s11732_s2 + $0x8c0] sm:$0xff] }
  0xaa   :  { %5524 = vmatmul.mubr.bf16.gmra.mrb[48].mxu0 %v6820_v22  ;;  %v1439_v22 = vld [vmem:[%s11732_s2 + $0x880] sm:$0xff] }
  0xab   :  { %5531 = vmatprep.mubr.bf16.mxu0 %v6837_v27  ;;  %v1443_v27 = vld [vmem:[%s11732_s2 + $0x8a0] sm:$0xff]  ;;  %5715 = vmatpush1.bf16.msra.mxu0 %v1134_v21  ;;  %v6893_v28 = vcombine.high %v1439_v22, %v1447_v23  ;;  %v6892_v33 = vcombine.low %v1439_v22, %v1447_v23 }
  0xac   :  { %5973 = vmatprep.subr.bf16.mxu0 %v7965_v0  ;;  %v6901_v30 = vcombine.high %v1443_v27, %v1451_v29  ;;  %v6900_v26 = vcombine.low %v1443_v27, %v1451_v29  ;;  %v1567_v23 = vld [vmem:[%s11732_s2 + $0xc80] sm:$0xff] }
  0xad   :  { %v1575_v27 = vld [vmem:[%s11732_s2 + $0xcc0] sm:$0xff] }
  0xae   :  { %v1571_v29 = vld [vmem:[%s11732_s2 + $0xca0] sm:$0xff] }
  0xaf   :  { %v1663_v10 = vld [vmem:[%s11732_s2 + $0xf80] sm:$0xff] }
  0xb0   :  { %4376 = vmatmul.mubr.bf16.gmra.mrb[52].mxu1 %v6828_v39  ;;  %v1479_v39 = vld [vmem:[%s11732_s2 + $0x9c0] sm:$0xff] }
  0xb1   :  { %4383 = vmatprep.mubr.bf16.mxu1 %v6845_v46  ;;  %v6925_v46 = vcombine.high %v1471_v38, %v1479_v39  ;;  %v6924_v52 = vcombine.low %v1471_v38, %v1479_v39  ;;  %v1599_v39 = vld [vmem:[%s11732_s2 + $0xd80] sm:$0xff] }
  0xb2   :  { %5532 = vmatmul.mubr.bf16.gmra.mrb[52].mxu0 %v6836_v45  ;;  %v6916_v45 = vcombine.low %v1459_v24, %v1467_v25  ;;  %v1591_v24 = vld [vmem:[%s11732_s2 + $0xd40] sm:$0xff] }
  0xb3   :  { %5539 = vmatprep.mubr.bf16.mxu0 %v6853_v48  ;;  %v1487_v48 = vld [vmem:[%s11732_s2 + $0xa00] sm:$0xff] }
  0xb4   :  { %v6941_v54 = vcombine.high %v1487_v48, %v1495_v49  ;;  %v1587_v25 = vld [vmem:[%s11732_s2 + $0xd20] sm:$0xff] }
  0xb8   :  { %4384 = vmatmul.mubr.bf16.gmra.mrb[56].mxu1 %v6844_v55  ;;  %v1511_v55 = vld [vmem:[%s11732_s2 + $0xac0] sm:$0xff] }
  0xb9   :  { %4391 = vmatprep.mubr.bf16.mxu1 %v6861_v57  ;;  %v1515_v57 = vld [vmem:[%s11732_s2 + $0xae0] sm:$0xff]  ;;  %v6957_v60 = vcombine.high %v1503_v41, %v1511_v55  ;;  %v6956_v3 = vcombine.low %v1503_v41, %v1511_v55 }
  0xba   :  { %5540 = vmatmul.mubr.bf16.gmra.mrb[56].mxu0 %v6852_v56  ;;  %v1507_v56 = vld [vmem:[%s11732_s2 + $0xaa0] sm:$0xff] }
  0xbb   :  { %5547 = vmatprep.mubr.bf16.mxu0 %v6869_v58  ;;  %v6940_v58 = vcombine.low %v1487_v48, %v1495_v49  ;;  %v6965_v61 = vcombine.high %v1507_v56, %v1515_v57  ;;  %v6964_v4 = vcombine.low %v1507_v56, %v1515_v57  ;;  %v1615_v49 = vld [vmem:[%s11732_s2 + $0xe00] sm:$0xff] }
  0xbc   :  { %v1631_v55 = vld [vmem:[%s11732_s2 + $0xe80] sm:$0xff] }
  0xbd   :  { %v1639_v56 = vld [vmem:[%s11732_s2 + $0xec0] sm:$0xff] }
  0xbe   :  { %v1635_v57 = vld [vmem:[%s11732_s2 + $0xea0] sm:$0xff] }
  0xc0   :  { %4392 = vmatmul.mubr.bf16.gmra.mrb[60].mxu1 %v6860_v5  ;;  %v1547_v5 = vld [vmem:[%s11732_s2 + $0xbe0] sm:$0xff] }
  0xc1   :  { %4399 = vmatprep.mubr.bf16.mxu1 %v6877_v17  ;;  %v1551_v17 = vld [vmem:[%s11732_s2 + $0xc00] sm:$0xff]  ;;  %v6996_v20 = vcombine.low %v1539_v16, %v1547_v5 }
  0xc2   :  { %5548 = vmatmul.mubr.bf16.gmra.mrb[60].mxu0 %v6868_v6  ;;  %v6997_v6 = vcombine.high %v1539_v16, %v1547_v5  ;;  %v7005_v21 = vcombine.high %v1551_v17, %v1559_v14  ;;  %v1671_v16 = vld [vmem:[%s11732_s2 + $0xfc0] sm:$0xff] }
  0xc3   :  { %5555 = vmatprep.mubr.bf16.mxu0 %v6885_v15  ;;  %v1555_v15 = vld [vmem:[%s11732_s2 + $0xc20] sm:$0xff] }
  0xc4   :  { %v7013_v22 = vcombine.high %v1555_v15, %v1563_v18  ;;  %v1667_v5 = vld [vmem:[%s11732_s2 + $0xfa0] sm:$0xff] }
  0xc8   :  { %4400 = vmatmul.mubr.bf16.gmra.mrb[64].mxu1 %v6876_v34  ;;  %v1579_v34 = vld [vmem:[%s11732_s2 + $0xce0] sm:$0xff] }
  0xc9   :  { %4407 = vmatprep.mubr.bf16.mxu1 %v6893_v28  ;;  %v7012_v28 = vcombine.low %v1555_v15, %v1563_v18  ;;  %v7029_v31 = vcombine.high %v1571_v29, %v1579_v34  ;;  %v9308_v15 = vld [vmem:[%s11732_s2 + $0x48] sm:$0xff]  ;;  %v79_v18 = vld [vmem:[%s11730_s0 + $0x200] sm:$0xff] }
  0xca   :  { %5556 = vmatmul.mubr.bf16.gmra.mrb[64].mxu0 %v6884_v36  ;;  %v7004_v36 = vcombine.low %v1551_v17, %v1559_v14  ;;  %v9303_v14 = vld [vmem:[%s11732_s2 + $0x8] sm:$0xff] }
  0xcb   :  { %5563 = vmatprep.mubr.bf16.mxu0 %v6901_v30  ;;  %v7021_v30 = vcombine.high %v1567_v23, %v1575_v27 }
  0xd0   :  { %4408 = vmatmul.mubr.bf16.gmra.mrb[68].mxu1 %v6892_v33  ;;  %v1595_v33 = vld [vmem:[%s11732_s2 + $0xd60] sm:$0xff] }
  0xd1   :  { %4415 = vmatprep.mubr.bf16.mxu1 %v6909_v35  ;;  %v7028_v35 = vcombine.low %v1571_v29, %v1579_v34  ;;  %v7045_v38 = vcombine.high %v1587_v25, %v1595_v33  ;;  %v208_v29 = vld [vmem:[%s11730_s0 + $0x608] sm:$0xff]  ;;  %v463_v34 = vld [vmem:[%s11731_s1 + $0x600] sm:$0xff] }
  0xd2   :  { %5564 = vmatmul.mubr.bf16.gmra.mrb[68].mxu0 %v6900_v26  ;;  %v7020_v26 = vcombine.low %v1567_v23, %v1575_v27  ;;  %v9330_v23 = vld [vmem:[%s11732_s2 + $0x68] sm:$0xff]  ;;  %v207_v27 = vld [vmem:[%s11730_s0 + $0x600] sm:$0xff] }
  0xd3   :  { %5571 = vmatprep.mubr.bf16.mxu0 %v6917_v37  ;;  %v7037_v37 = vcombine.high %v1583_v32, %v1591_v24 }
  0xd8   :  { %4416 = vmatmul.mubr.bf16.gmra.mrb[72].mxu1 %v6908_v44  ;;  %v1611_v44 = vld [vmem:[%s11732_s2 + $0xde0] sm:$0xff] }
  0xd9   :  { %4423 = vmatprep.mubr.bf16.mxu1 %v6925_v46  ;;  %v7044_v46 = vcombine.low %v1587_v25, %v1595_v33  ;;  %v7061_v48 = vcombine.high %v1603_v43, %v1611_v44  ;;  %v6623_v33 = vcombine.high %v9303_v14, %v9308_v15 }
  0xda   :  { %5572 = vmatmul.mubr.bf16.gmra.mrb[72].mxu0 %v6916_v45  ;;  %v7036_v45 = vcombine.low %v1583_v32, %v1591_v24  ;;  %v81_v32 = vld [vmem:[%s11730_s0 + $0x210] sm:$0xff]  ;;  %v82_v24 = vld [vmem:[%s11730_s0 + $0x218] sm:$0xff] }
  0xdb   :  { %5579 = vmatprep.mubr.bf16.mxu0 %v6933_v47  ;;  %v7053_v47 = vcombine.high %v1599_v39, %v1607_v42 }
  0xe0   :  { %4424 = vmatmul.mubr.bf16.gmra.mrb[76].mxu1 %v6924_v52  ;;  %v1627_v52 = vld [vmem:[%s11732_s2 + $0xe60] sm:$0xff] }
  0xe1   :  { %4431 = vmatprep.mubr.bf16.mxu1 %v6941_v54  ;;  %v7060_v54 = vcombine.low %v1603_v43, %v1611_v44  ;;  %v7077_v41 = vcombine.high %v1619_v51, %v1627_v52  ;;  %v210_v43 = vld [vmem:[%s11730_s0 + $0x618] sm:$0xff]  ;;  %v465_v44 = vld [vmem:[%s11731_s1 + $0x610] sm:$0xff] }
  0xe2   :  { %5580 = vmatmul.mubr.bf16.gmra.mrb[76].mxu0 %v6932_v53  ;;  %v7052_v53 = vcombine.low %v1599_v39, %v1607_v42  ;;  %v719_v39 = vadd.f32 %v463_v34, %v207_v27  ;;  %v470_v27 = vld [vmem:[%s11731_s1 + $0x638] sm:$0xff]  ;;  %v88_v34 = vld [vmem:[%s11730_s0 + $0x248] sm:$0xff] }
  0xe3   :  { %5587 = vmatprep.mubr.bf16.mxu0 %v6949_v40  ;;  %v7069_v40 = vcombine.high %v1615_v49, %v1623_v50 }
  0xe8   :  { %4432 = vmatmul.mubr.bf16.gmra.mrb[80].mxu1 %v6940_v58  ;;  %v1643_v58 = vld [vmem:[%s11732_s2 + $0xee0] sm:$0xff] }
  0xe9   :  { %4439 = vmatprep.mubr.bf16.mxu1 %v6957_v60  ;;  %v7076_v60 = vcombine.low %v1619_v51, %v1627_v52  ;;  %v7093_v62 = vcombine.high %v1635_v57, %v1643_v58 }
  0xea   :  { %5588 = vmatmul.mubr.bf16.gmra.mrb[80].mxu0 %v6948_v59  ;;  %v7068_v59 = vcombine.low %v1615_v49, %v1623_v50  ;;  %v9375_v49 = vld [vmem:[%s11732_s2 + $0x88] sm:$0xff] }
  0xeb   :  { %5595 = vmatprep.mubr.bf16.mxu0 %v6965_v61  ;;  %v7085_v61 = vcombine.high %v1631_v55, %v1639_v56  ;;  %v9380_v50 = vld [vmem:[%s11732_s2 + $0xc8] sm:$0xff] }
  0xf0   :  { %4440 = vmatmul.mubr.bf16.gmra.mrb[84].mxu1 %v6956_v3  ;;  %v1659_v3 = vld [vmem:[%s11732_s2 + $0xf60] sm:$0xff] }
  0xf1   :  { %4447 = vmatprep.mubr.bf16.mxu1 %v6973_v7  ;;  %v7092_v7 = vcombine.low %v1635_v57, %v1643_v58  ;;  %v7109_v9 = vcombine.high %v1651_v2, %v1659_v3  ;;  %v84_v57 = vld [vmem:[%s11730_s0 + $0x228] sm:$0xff]  ;;  %v339_v58 = vld [vmem:[%s11731_s1 + $0x220] sm:$0xff] }
  0xf2   :  { %5596 = vmatmul.mubr.bf16.gmra.mrb[84].mxu0 %v6964_v4  ;;  %v7084_v4 = vcombine.low %v1631_v55, %v1639_v56  ;;  %v9390_v55 = vld [vmem:[%s11732_s2 + $0xe8] sm:$0xff]  ;;  %v83_v56 = vld [vmem:[%s11730_s0 + $0x220] sm:$0xff] }
  0xf3   :  { %5603 = vmatprep.mubr.bf16.mxu0 %v6981_v8  ;;  %v7101_v8 = vcombine.high %v1647_v63, %v1655_v1 }
  0xf8   :  { %4448 = vmatmul.mubr.bf16.gmra.mrb[88].mxu1 %v6972_v11  ;;  %v1675_v11 = vld [vmem:[%s11732_s2 + $0xfe0] sm:$0xff] }
  0xf9   :  { %4455 = vmatprep.mubr.bf16.mxu1 %v6989_v13  ;;  %v7108_v13 = vcombine.low %v1651_v2, %v1659_v3  ;;  %v7125_v17 = vcombine.high %v1667_v5, %v1675_v11  ;;  %v7124_v25 = vcombine.low %v1667_v5, %v1675_v11  ;;  %v467_v2 = vld [vmem:[%s11731_s1 + $0x620] sm:$0xff]  ;;  %v468_v3 = vld [vmem:[%s11731_s1 + $0x628] sm:$0xff]  ;;  %v6639_v5 = vcombine.high %v9375_v49, %v9380_v50 }
  0xfa   :  { %5604 = vmatmul.mubr.bf16.gmra.mrb[88].mxu0 %v6980_v12  ;;  %v7100_v12 = vcombine.low %v1647_v63, %v1655_v1  ;;  %v212_v1 = vld [vmem:[%s11730_s0 + $0x628] sm:$0xff]  ;;  %v595_v11 = vadd.f32 %v339_v58, %v83_v56 }
  0xfb   :  { %5611 = vmatprep.mubr.bf16.mxu0 %v6997_v6  ;;  %v7117_v6 = vcombine.high %v1663_v10, %v1671_v16 }
 0x100   :  { %4456 = vmatmul.mubr.bf16.gmra.mrb[92].mxu1 %v6988_v19  ;;  %v80_v19 = vld [vmem:[%s11730_s0 + $0x208] sm:$0xff] }
 0x101   :  { %4463 = vmatprep.mubr.bf16.mxu1 %v7005_v21  ;;  %v336_v21 = vld [vmem:[%s11731_s1 + $0x208] sm:$0xff] }
 0x102   :  { %5612 = vmatmul.mubr.bf16.gmra.mrb[92].mxu0 %v6996_v20  ;;  %v335_v20 = vld [vmem:[%s11731_s1 + $0x200] sm:$0xff] }
 0x103   :  { %5619 = vmatprep.mubr.bf16.mxu0 %v7013_v22  ;;  %v9325_v22 = vld [vmem:[%s11732_s2 + $0x28] sm:$0xff] }
 0x108   :  { %4464 = vmatmul.mubr.bf16.gmra.mrb[96].mxu1 %v7004_v36  ;;  %v464_v36 = vld [vmem:[%s11731_s1 + $0x608] sm:$0xff] }
 0x109   :  { %4471 = vmatprep.mubr.bf16.mxu1 %v7021_v30  ;;  %v591_v30 = vadd.f32 %v335_v20, %v79_v18  ;;  %v720_v42 = vadd.f32 %v464_v36, %v208_v29  ;;  %v9444_v18 = vld [vmem:[%s11732_s2 + $0x148] sm:$0xff]  ;;  %v724_v20 = vadd.f32 %v468_v3, %v212_v1  ;;  %v87_v29 = vld [vmem:[%s11730_s0 + $0x240] sm:$0xff] }
 0x10a   :  { %5620 = vmatmul.mubr.bf16.gmra.mrb[96].mxu0 %v7012_v28  ;;  %v7116_v28 = vcombine.low %v1663_v10, %v1671_v16  ;;  %v85_v10 = vld [vmem:[%s11730_s0 + $0x230] sm:$0xff]  ;;  %v9522_v1 = vld [vmem:[%s11732_s2 + $0x188] sm:$0xff] }
 0x10b   :  { %5627 = vmatprep.mubr.bf16.mxu0 %v7029_v31  ;;  %v592_v31 = vadd.f32 %v336_v21, %v80_v19  ;;  %v213_v21 = vld [vmem:[%s11730_s0 + $0x630] sm:$0xff]  ;;  %v9532_v3 = vld [vmem:[%s11732_s2 + $0x1a8] sm:$0xff] }
 0x110   :  { %4472 = vmatmul.mubr.bf16.gmra.mrb[100].mxu1 %v7020_v26  ;;  %v337_v26 = vld [vmem:[%s11731_s1 + $0x210] sm:$0xff] }
 0x111   :  { %4479 = vmatprep.mubr.bf16.mxu1 %v7037_v37  ;;  %v209_v37 = vld [vmem:[%s11730_s0 + $0x610] sm:$0xff] }
 0x112   :  { %5628 = vmatmul.mubr.bf16.gmra.mrb[100].mxu0 %v7028_v35  ;;  %v338_v35 = vld [vmem:[%s11731_s1 + $0x218] sm:$0xff]  ;;  %v721_v52 = vadd.f32 %v465_v44, %v209_v37  ;;  %v471_v37 = vld [vmem:[%s11731_s1 + $0x640] sm:$0xff]  ;;  %v980_v44 = vmax.f32 %v724_v20, 0.0  ;;  %v348_v20 = vld [vmem:[%s11731_s1 + $0x268] sm:$0xff] }
 0x113   :  { %5635 = vmatprep.mubr.bf16.mxu0 %v7045_v38  ;;  %v6631_v38 = vcombine.high %v9325_v22, %v9330_v23  ;;  %v594_v51 = vadd.f32 %v338_v35, %v82_v24  ;;  %v851_v24 = vmax.f32 %v595_v11, 0.0  ;;  %v216_v35 = vld [vmem:[%s11730_s0 + $0x648] sm:$0xff] }
 0x118   :  { %4480 = vmatmul.mubr.bf16.gmra.mrb[104].mxu1 %v7036_v45  ;;  %v466_v45 = vld [vmem:[%s11731_s1 + $0x618] sm:$0xff] }
 0x119   :  { %4487 = vmatprep.mubr.bf16.mxu1 %v7053_v47  ;;  %v848_v47 = vmax.f32 %v592_v31, 0.0  ;;  %v344_v31 = vld [vmem:[%s11731_s1 + $0x248] sm:$0xff] }
 0x11a   :  { %5636 = vmatmul.mubr.bf16.gmra.mrb[104].mxu0 %v7044_v46  ;;  %v847_v46 = vmax.f32 %v591_v30, 0.0  ;;  %v343_v30 = vld [vmem:[%s11731_s1 + $0x240] sm:$0xff] }
 0x11b   :  { %5643 = vmatprep.mubr.bf16.mxu0 %v7061_v48  ;;  %v593_v48 = vadd.f32 %v337_v26, %v81_v32  ;;  %v215_v32 = vld [vmem:[%s11730_s0 + $0x640] sm:$0xff] }
 0x11c   :  { %v1071_v63 = vpack.c.bf16 %v848_v47, %v847_v46  ;;  %v6638_v47 = vcombine.low %v9375_v49, %v9380_v50 }
 0x120   :  { %4488 = vmatmul.mubr.bf16.gmra.mrb[108].mxu1 %v7052_v53  ;;  %v722_v53 = vadd.f32 %v466_v45, %v210_v43 }
 0x121   :  { %4495 = vmatprep.mubr.bf16.mxu1 %v7069_v40  ;;  %v976_v40 = vmax.f32 %v720_v42, 0.0  ;;  %v9490_v42 = vld [vmem:[%s11732_s2 + $0x168] sm:$0xff] }
 0x122   :  { %5644 = vmatmul.mubr.bf16.gmra.mrb[108].mxu0 %v7060_v54  ;;  %v975_v54 = vmax.f32 %v719_v39, 0.0  ;;  %v9485_v39 = vld [vmem:[%s11732_s2 + $0x128] sm:$0xff] }
 0x123   :  { %5651 = vmatprep.mubr.bf16.mxu0 %v7077_v41  ;;  %v9385_v41 = vld [vmem:[%s11732_s2 + $0xa8] sm:$0xff]  ;;  %v6663_v56 = vcombine.high %v9485_v39, %v9490_v42 }
 0x124   :  { %v1135_v16 = vpack.c.bf16 %v976_v40, %v975_v54  ;;  %v727_v54 = vadd.f32 %v471_v37, %v215_v32  ;;  %v94_v32 = vld [vmem:[%s11730_s0 + $0x278] sm:$0xff] }
 0x128   :  { %4496 = vmatmul.mubr.bf16.gmra.mrb[112].mxu1 %v7068_v59  ;;  %v340_v59 = vld [vmem:[%s11731_s1 + $0x228] sm:$0xff] }
 0x129   :  { %4503 = vmatprep.mubr.bf16.mxu1 %v7085_v61  ;;  %v6622_v61 = vcombine.low %v9303_v14, %v9308_v15  ;;  %v6647_v14 = vcombine.high %v9385_v41, %v9390_v55  ;;  %v9439_v15 = vld [vmem:[%s11732_s2 + $0x108] sm:$0xff] }
 0x12a   :  { %5652 = vmatmul.mubr.bf16.gmra.mrb[112].mxu0 %v7076_v60  ;;  %v211_v60 = vld [vmem:[%s11730_s0 + $0x620] sm:$0xff] }
 0x12b   :  { %5659 = vmatprep.mubr.bf16.mxu0 %v7093_v62  ;;  %v6630_v62 = vcombine.low %v9325_v22, %v9330_v23  ;;  %v723_v19 = vadd.f32 %v467_v2, %v211_v60  ;;  %v214_v22 = vld [vmem:[%s11730_s0 + $0x638] sm:$0xff]  ;;  %v469_v23 = vld [vmem:[%s11731_s1 + $0x630] sm:$0xff]  ;;  %v9527_v2 = vld [vmem:[%s11732_s2 + $0x1c8] sm:$0xff] }
 0x12c   :  { %v725_v45 = vadd.f32 %v469_v23, %v213_v21  ;;  %v726_v46 = vadd.f32 %v470_v27, %v214_v22  ;;  %v219_v27 = vld [vmem:[%s11730_s0 + $0x660] sm:$0xff] }
 0x12d   :  { %v979_v43 = vmax.f32 %v723_v19, 0.0  ;;  %v347_v19 = vld [vmem:[%s11731_s1 + $0x260] sm:$0xff] }
 0x12e   :  { %v982_v60 = vmax.f32 %v726_v46, 0.0 }
 0x12f   :  { %v1137_v58 = vpack.c.bf16 %v980_v44, %v979_v43  ;;  %v222_v43 = vld [vmem:[%s11730_s0 + $0x678] sm:$0xff]  ;;  %v477_v44 = vld [vmem:[%s11731_s1 + $0x670] sm:$0xff] }
 0x130   :  { %4504 = vmatmul.mubr.bf16.gmra.mrb[116].mxu1 %v7084_v4  ;;  %v849_v4 = vmax.f32 %v593_v48, 0.0  ;;  %v6646_v48 = vcombine.low %v9385_v41, %v9390_v55  ;;  %v89_v41 = vld [vmem:[%s11730_s0 + $0x250] sm:$0xff]  ;;  %v90_v55 = vld [vmem:[%s11730_s0 + $0x258] sm:$0xff] }
 0x131   :  { %4511 = vmatprep.mubr.bf16.mxu1 %v7101_v8  ;;  %v977_v8 = vmax.f32 %v721_v52, 0.0  ;;  %v599_v52 = vadd.f32 %v343_v30, %v87_v29  ;;  %v220_v29 = vld [vmem:[%s11730_s0 + $0x668] sm:$0xff] }
 0x132   :  { %5660 = vmatmul.mubr.bf16.gmra.mrb[116].mxu0 %v7092_v7  ;;  %v850_v7 = vmax.f32 %v594_v51, 0.0  ;;  %v6655_v51 = vcombine.high %v9439_v15, %v9444_v18  ;;  %v476_v30 = vld [vmem:[%s11731_s1 + $0x668] sm:$0xff] }
 0x133   :  { %5667 = vmatprep.mubr.bf16.mxu0 %v7109_v9  ;;  %v978_v9 = vmax.f32 %v722_v53, 0.0  ;;  %v600_v53 = vadd.f32 %v344_v31, %v88_v34  ;;  %v475_v34 = vld [vmem:[%s11731_s1 + $0x660] sm:$0xff]  ;;  %v93_v31 = vld [vmem:[%s11730_s0 + $0x270] sm:$0xff] }
 0x134   :  { %v1072_v36 = vpack.c.bf16 %v850_v7, %v849_v4  ;;  %v218_v4 = vld [vmem:[%s11730_s0 + $0x658] sm:$0xff]  ;;  %v473_v7 = vld [vmem:[%s11731_s1 + $0x650] sm:$0xff] }
 0x138   :  { %4512 = vmatmul.mubr.bf16.gmra.mrb[120].mxu1 %v7100_v12  ;;  %v596_v12 = vadd.f32 %v340_v59, %v84_v57  ;;  %v981_v59 = vmax.f32 %v725_v45, 0.0  ;;  %v478_v45 = vld [vmem:[%s11731_s1 + $0x678] sm:$0xff] }
 0x139   :  { %4519 = vmatprep.mubr.bf16.mxu1 %v7117_v6  ;;  %v341_v6 = vld [vmem:[%s11731_s1 + $0x230] sm:$0xff] }
 0x13a   :  { %5668 = vmatmul.mubr.bf16.gmra.mrb[120].mxu0 %v7108_v13  ;;  %v86_v13 = vld [vmem:[%s11730_s0 + $0x238] sm:$0xff]  ;;  %v1138_v21 = vpack.c.bf16 %v982_v60, %v981_v59  ;;  %v95_v59 = vld [vmem:[%s11730_s0 + $0x280] sm:$0xff]  ;;  %v96_v60 = vld [vmem:[%s11730_s0 + $0x288] sm:$0xff] }
 0x13b   :  { %5675 = vmatprep.mubr.bf16.mxu0 %v7125_v17  ;;  %v342_v17 = vld [vmem:[%s11731_s1 + $0x238] sm:$0xff] }
 0x13c   :  { %v598_v26 = vadd.f32 %v342_v17, %v86_v13 }
 0x13e   :  { %v854_v57 = vmax.f32 %v598_v26, 0.0  ;;  %v350_v26 = vld [vmem:[%s11731_s1 + $0x278] sm:$0xff] }
 0x140   :  { %4520 = vmatmul.mubr.bf16.gmra.mrb[124].mxu1 %v7116_v28  ;;  %v1136_v28 = vpack.c.bf16 %v978_v9, %v977_v8  ;;  %v474_v8 = vld [vmem:[%s11731_s1 + $0x658] sm:$0xff]  ;;  %v9546_v9 = vld [vmem:[%s11732_s2 + $0x1e8] sm:$0xff] }
 0x141   :  { %4560 = vmatprep.mubr.bf16.mxu1 %v6623_v33  ;;  %v597_v33 = vadd.f32 %v341_v6, %v85_v10  ;;  %v855_v10 = vmax.f32 %v599_v52, 0.0  ;;  %v730_v23 = vadd.f32 %v474_v8, %v218_v4  ;;  %v351_v4 = vld [vmem:[%s11731_s1 + $0x280] sm:$0xff] }
 0x142   :  { %5676 = vmatmul.mubr.bf16.gmra.mrb[124].mxu0 %v7124_v25  ;;  %v852_v25 = vmax.f32 %v596_v12, 0.0  ;;  %v91_v12 = vld [vmem:[%s11730_s0 + $0x260] sm:$0xff] }
 0x143   :  { %5716 = vmatprep.mubr.bf16.mxu0 %v6631_v38  ;;  %v472_v38 = vld [vmem:[%s11731_s1 + $0x648] sm:$0xff]  ;;  %v853_v50 = vmax.f32 %v597_v33, 0.0  ;;  %v349_v33 = vld [vmem:[%s11731_s1 + $0x270] sm:$0xff]  ;;  %v223_v8 = vld [vmem:[%s11730_s0 + $0x680] sm:$0xff] }
 0x144   :  { %v728_v40 = vadd.f32 %v472_v38, %v216_v35  ;;  %v1073_v49 = vpack.c.bf16 %v852_v25, %v851_v24  ;;  %v221_v35 = vld [vmem:[%s11730_s0 + $0x670] sm:$0xff]  ;;  %v605_v52 = vadd.f32 %v349_v33, %v93_v31  ;;  %v482_v31 = vld [vmem:[%s11731_s1 + $0x698] sm:$0xff] }
 0x145   :  { %v1074_v13 = vpack.c.bf16 %v854_v57, %v853_v50  ;;  %v734_v50 = vadd.f32 %v478_v45, %v222_v43  ;;  %v9626_v57 = vld [vmem:[%s11732_s2 + $0x268] sm:$0xff] }
 0x146   :  { %v984_v11 = vmax.f32 %v728_v40, 0.0  ;;  %v9621_v40 = vld [vmem:[%s11732_s2 + $0x228] sm:$0xff] }
 0x148   :  { %4561 = vmatmul.mubr.bf16.vlgmr.msra.gmra.mrb[0].mxu1 %v6622_v61  ;;  %v345_v61 = vld [vmem:[%s11731_s1 + $0x250] sm:$0xff] }
 0x149   :  { %4818 = vmatpush1.bf16.msra.mxu1 %v1071_v63  ;;  %4568 = vmatprep.mubr.bf16.mxu1 %v6639_v5  ;;  %v217_v63 = vld [vmem:[%s11730_s0 + $0x650] sm:$0xff]  ;;  %v983_v5 = vmax.f32 %v727_v54, 0.0  ;;  %v601_v6 = vadd.f32 %v345_v61, %v89_v41  ;;  %v9616_v54 = vld [vmem:[%s11732_s2 + $0x248] sm:$0xff] }
 0x14a   :  { %5717 = vmatmul.mubr.bf16.vlgmr.msra.gmra.mrb[0].mxu0 %v6630_v62  ;;  %4819 = vmatprep.subr.bf16.mxu1 %v7965_v0  ;;  %v346_v62 = vld [vmem:[%s11731_s1 + $0x258] sm:$0xff]  ;;  %v729_v22 = vadd.f32 %v473_v7, %v217_v63  ;;  %v352_v7 = vld [vmem:[%s11731_s1 + $0x288] sm:$0xff] }
 0x14b   :  { %5974 = vmatpush1.bf16.msra.mxu0 %v1135_v16  ;;  %5724 = vmatprep.mubr.bf16.mxu0 %v6647_v14  ;;  %v856_v16 = vmax.f32 %v600_v53, 0.0  ;;  %v602_v17 = vadd.f32 %v346_v62, %v90_v55  ;;  %v92_v14 = vld [vmem:[%s11730_s0 + $0x268] sm:$0xff]  ;;  %v1139_v25 = vpack.c.bf16 %v984_v11, %v983_v5  ;;  %v857_v37 = vmax.f32 %v601_v6, 0.0 }
 0x14c   :  { %5975 = vmatprep.subr.bf16.mxu0 %v7965_v0  ;;  %v985_v46 = vmax.f32 %v729_v22, 0.0  ;;  %v9611_v53 = vld [vmem:[%s11732_s2 + $0x208] sm:$0xff]  ;;  %v6695_v6 = vcombine.high %v9621_v40, %v9626_v57 }
 0x14d   :  { %4820 = vmatpush1.bf16.msra.mxu1 %v1072_v36  ;;  %v6654_v36 = vcombine.low %v9439_v15, %v9444_v18  ;;  %v6671_v15 = vcombine.high %v9522_v1, %v9527_v2  ;;  %v6679_v18 = vcombine.high %v9532_v3, %v9546_v9  ;;  %v1075_v24 = vpack.c.bf16 %v856_v16, %v855_v10  ;;  %v224_v11 = vld [vmem:[%s11730_s0 + $0x688] sm:$0xff] }
 0x14e   :  { %4821 = vmatprep.subr.bf16.mxu1 %v7965_v0  ;;  %v858_v38 = vmax.f32 %v602_v17, 0.0  ;;  %v6670_v10 = vcombine.low %v9522_v1, %v9527_v2  ;;  %v6678_v16 = vcombine.low %v9532_v3, %v9546_v9  ;;  %v6687_v5 = vcombine.high %v9611_v53, %v9616_v54  ;;  %v480_v1 = vld [vmem:[%s11731_s1 + $0x688] sm:$0xff] }
 0x14f   :  { %5976 = vmatpush1.bf16.msra.mxu0 %v1136_v28  ;;  %v6662_v28 = vcombine.low %v9485_v39, %v9490_v42  ;;  %v603_v39 = vadd.f32 %v347_v19, %v91_v12  ;;  %v604_v42 = vadd.f32 %v348_v20, %v92_v14  ;;  %v479_v12 = vld [vmem:[%s11731_s1 + $0x680] sm:$0xff]  ;;  %v861_v2 = vmax.f32 %v605_v52, 0.0  ;;  %v97_v20 = vld [vmem:[%s11730_s0 + $0x290] sm:$0xff] }
 0x150   :  { %5977 = vmatprep.subr.bf16.mxu0 %v7965_v0  ;;  %4569 = vmatmul.mubr.bf16.gmra.mrb[4].mxu1 %v6638_v47  ;;  %v986_v47 = vmax.f32 %v730_v23, 0.0  ;;  %v1076_v41 = vpack.c.bf16 %v858_v38, %v857_v37  ;;  %v990_v9 = vmax.f32 %v734_v50, 0.0  ;;  %v607_v14 = vadd.f32 %v351_v4, %v95_v59  ;;  %v9701_v37 = vld [vmem:[%s11732_s2 + $0x2a8] sm:$0xff] }
 0x151   :  { %4576 = vmatprep.mubr.bf16.mxu1 %v6655_v51  ;;  %4822 = vmatpush1.bf16.msra.mxu1 %v1073_v49  ;;  %v732_v51 = vadd.f32 %v476_v30, %v220_v29  ;;  %v733_v49 = vadd.f32 %v477_v44, %v221_v35  ;;  %v859_v55 = vmax.f32 %v603_v39, 0.0  ;;  %v608_v19 = vadd.f32 %v352_v7, %v96_v60  ;;  %v353_v29 = vld [vmem:[%s11731_s1 + $0x290] sm:$0xff]  ;;  %v9706_v38 = vld [vmem:[%s11732_s2 + $0x2e8] sm:$0xff] }
 0x152   :  { %5725 = vmatmul.mubr.bf16.gmra.mrb[4].mxu0 %v6646_v48  ;;  %4823 = vmatprep.subr.bf16.mxu1 %v7965_v0  ;;  %v731_v48 = vadd.f32 %v475_v34, %v219_v27  ;;  %v1140_v61 = vpack.c.bf16 %v986_v47, %v985_v46  ;;  %v735_v23 = vadd.f32 %v479_v12, %v223_v8  ;;  %v354_v34 = vld [vmem:[%s11731_s1 + $0x298] sm:$0xff]  ;;  %v481_v30 = vld [vmem:[%s11731_s1 + $0x690] sm:$0xff]  ;;  %v1272_v50 = vld [vmem:[%s11732_s2 + $0x348] sm:$0xff] }
 0x153   :  { %5732 = vmatprep.mubr.bf16.mxu0 %v6663_v56  ;;  %5978 = vmatpush1.bf16.msra.mxu0 %v1137_v58  ;;  %v606_v56 = vadd.f32 %v350_v26, %v94_v32  ;;  %v860_v58 = vmax.f32 %v604_v42, 0.0  ;;  %v988_v63 = vmax.f32 %v732_v51, 0.0  ;;  %v989_v3 = vmax.f32 %v733_v49, 0.0  ;;  %v356_v60 = vld [vmem:[%s11731_s1 + $0x2a8] sm:$0xff] }
 0x154   :  { %5979 = vmatprep.subr.bf16.mxu0 %v7965_v0  ;;  %v987_v62 = vmax.f32 %v731_v48, 0.0  ;;  %v736_v27 = vadd.f32 %v480_v1, %v224_v11  ;;  %v864_v33 = vmax.f32 %v608_v19, 0.0  ;;  %v609_v26 = vadd.f32 %v353_v29, %v97_v20  ;;  %v1276_v4 = vld [vmem:[%s11732_s2 + $0x368] sm:$0xff] }
 0x155   :  { %4824 = vmatpush1.bf16.msra.mxu1 %v1074_v13  ;;  %v862_v13 = vmax.f32 %v606_v56, 0.0  ;;  %v1077_v17 = vpack.c.bf16 %v860_v58, %v859_v55  ;;  %v991_v39 = vmax.f32 %v735_v23, 0.0  ;;  %v6686_v45 = vcombine.low %v9611_v53, %v9616_v54  ;;  %v100_v55 = vld [vmem:[%s11730_s0 + $0x2a8] sm:$0xff]  ;;  %v355_v58 = vld [vmem:[%s11731_s1 + $0x2a0] sm:$0xff] }
 0x156   :  { %4825 = vmatprep.subr.bf16.mxu1 %v7965_v0  ;;  %v1141_v22 = vpack.c.bf16 %v988_v63, %v987_v62  ;;  %v992_v42 = vmax.f32 %v736_v27, 0.0  ;;  %v6694_v46 = vcombine.low %v9621_v40, %v9626_v57  ;;  %v6711_v48 = vcombine.high %v9701_v37, %v9706_v38  ;;  %v1264_v40 = vld [vmem:[%s11732_s2 + $0x308] sm:$0xff]  ;;  %v227_v62 = vld [vmem:[%s11730_s0 + $0x6a0] sm:$0xff] }
 0x157   :  { %5980 = vmatpush1.bf16.msra.mxu0 %v1138_v21  ;;  %v98_v21 = vld [vmem:[%s11730_s0 + $0x298] sm:$0xff]  ;;  %v1078_v32 = vpack.c.bf16 %v862_v13, %v861_v2  ;;  %v865_v52 = vmax.f32 %v609_v26, 0.0  ;;  %v1268_v57 = vld [vmem:[%s11732_s2 + $0x328] sm:$0xff]  ;;  %v612_v8 = vadd.f32 %v356_v60, %v100_v55  ;;  %v6710_v2 = vcombine.low %v9701_v37, %v9706_v38  ;;  %v485_v38 = vld [vmem:[%s11731_s1 + $0x6b0] sm:$0xff] }
 0x158   :  { %4577 = vmatmul.mubr.bf16.gmra.mrb[8].mxu1 %v6654_v36  ;;  %5981 = vmatprep.subr.bf16.mxu0 %v7965_v0  ;;  %v225_v36 = vld [vmem:[%s11730_s0 + $0x690] sm:$0xff]  ;;  %v610_v35 = vadd.f32 %v354_v34, %v98_v21  ;;  %v1143_v49 = vpack.c.bf16 %v992_v42, %v991_v39  ;;  %v228_v63 = vld [vmem:[%s11730_s0 + $0x6a8] sm:$0xff]  ;;  %v6719_v13 = vcombine.high %v1264_v40, %v1272_v50  ;;  %v230_v26 = vld [vmem:[%s11730_s0 + $0x6b8] sm:$0xff] }
 0x159   :  { %4584 = vmatprep.mubr.bf16.mxu1 %v6671_v15  ;;  %4826 = vmatpush1.bf16.msra.mxu1 %v1075_v24  ;;  %v1142_v15 = vpack.c.bf16 %v990_v9, %v989_v3  ;;  %v9696_v24 = vld [vmem:[%s11732_s2 + $0x2c8] sm:$0xff]  ;;  %v737_v43 = vadd.f32 %v481_v30, %v225_v36  ;;  %v868_v3 = vmax.f32 %v612_v8, 0.0  ;;  %v6727_v9 = vcombine.high %v1268_v57, %v1276_v4  ;;  %v486_v39 = vld [vmem:[%s11731_s1 + $0x6b8] sm:$0xff] }
 0x15a   :  { %5733 = vmatmul.mubr.bf16.gmra.mrb[8].mxu0 %v6662_v28  ;;  %4827 = vmatprep.subr.bf16.mxu1 %v7965_v0  ;;  %v226_v28 = vld [vmem:[%s11730_s0 + $0x698] sm:$0xff]  ;;  %v866_v56 = vmax.f32 %v610_v35, 0.0  ;;  %v1280_v20 = vld [vmem:[%s11732_s2 + $0x388] sm:$0xff]  ;;  %v6718_v27 = vcombine.low %v1264_v40, %v1272_v50  ;;  %v6726_v29 = vcombine.low %v1268_v57, %v1276_v4 }
 0x15b   :  { %5740 = vmatprep.mubr.bf16.mxu0 %v6679_v18  ;;  %5982 = vmatpush1.bf16.msra.mxu0 %v1139_v25  ;;  %v9691_v18 = vld [vmem:[%s11732_s2 + $0x288] sm:$0xff]  ;;  %v863_v25 = vmax.f32 %v607_v14, 0.0  ;;  %v738_v44 = vadd.f32 %v482_v31, %v226_v28  ;;  %v993_v53 = vmax.f32 %v737_v43, 0.0 }
 0x15c   :  { %5983 = vmatprep.subr.bf16.mxu0 %v7965_v0  ;;  %v6703_v47 = vcombine.high %v9691_v18, %v9696_v24  ;;  %v1080_v59 = vpack.c.bf16 %v866_v56, %v865_v52  ;;  %v1288_v21 = vld [vmem:[%s11732_s2 + $0x3c8] sm:$0xff] }
 0x15d   :  { %4828 = vmatpush1.bf16.msra.mxu1 %v1076_v41  ;;  %v1079_v51 = vpack.c.bf16 %v864_v33, %v863_v25  ;;  %v994_v54 = vmax.f32 %v738_v44, 0.0  ;;  %v99_v41 = vld [vmem:[%s11730_s0 + $0x2a0] sm:$0xff]  ;;  %v1292_v23 = vld [vmem:[%s11732_s2 + $0x3e8] sm:$0xff]  ;;  %v6735_v34 = vcombine.high %v1280_v20, %v1288_v21  ;;  %v229_v33 = vld [vmem:[%s11730_s0 + $0x6b0] sm:$0xff]  ;;  %v6734_v42 = vcombine.low %v1280_v20, %v1288_v21 }
 0x15e   :  { %4829 = vmatprep.subr.bf16.mxu1 %v7965_v0  ;;  %v1296_v28 = vld [vmem:[%s11732_s2 + $0x408] sm:$0xff]  ;;  %v741_v44 = vadd.f32 %v485_v38, %v229_v33  ;;  %v105_v33 = vld [vmem:[%s11730_s0 + $0x2d0] sm:$0xff] }
 0x15f   :  { %5984 = vmatpush1.bf16.msra.mxu0 %v1140_v61  ;;  %v611_v61 = vadd.f32 %v355_v58, %v99_v41  ;;  %v1144_v7 = vpack.c.bf16 %v994_v54, %v993_v53  ;;  %v1304_v30 = vld [vmem:[%s11732_s2 + $0x448] sm:$0xff] }
 0x160   :  { %4585 = vmatmul.mubr.bf16.gmra.mrb[12].mxu1 %v6670_v10  ;;  %5985 = vmatprep.subr.bf16.mxu0 %v7965_v0  ;;  %v483_v10 = vld [vmem:[%s11731_s1 + $0x6a0] sm:$0xff]  ;;  %v1300_v31 = vld [vmem:[%s11732_s2 + $0x428] sm:$0xff]  ;;  %v997_v52 = vmax.f32 %v741_v44, 0.0  ;;  %v6750_v41 = vcombine.low %v1296_v28, %v1304_v30 }
 0x161   :  { %4592 = vmatprep.mubr.bf16.mxu1 %v6687_v5  ;;  %4830 = vmatpush1.bf16.msra.mxu1 %v1077_v17  ;;  %v6702_v5 = vcombine.low %v9691_v18, %v9696_v24  ;;  %v867_v11 = vmax.f32 %v611_v61, 0.0  ;;  %v739_v12 = vadd.f32 %v483_v10, %v227_v62  ;;  %v357_v18 = vld [vmem:[%s11731_s1 + $0x2b0] sm:$0xff]  ;;  %v358_v24 = vld [vmem:[%s11731_s1 + $0x2b8] sm:$0xff]  ;;  %v1308_v35 = vld [vmem:[%s11732_s2 + $0x468] sm:$0xff] }
 0x162   :  { %5741 = vmatmul.mubr.bf16.gmra.mrb[12].mxu0 %v6678_v16  ;;  %4831 = vmatprep.subr.bf16.mxu1 %v7965_v0  ;;  %v484_v16 = vld [vmem:[%s11731_s1 + $0x6a8] sm:$0xff]  ;;  %v6758_v55 = vcombine.low %v1300_v31, %v1308_v35 }
 0x163   :  { %5748 = vmatprep.mubr.bf16.mxu0 %v6695_v6  ;;  %5986 = vmatpush1.bf16.msra.mxu0 %v1141_v22  ;;  %v740_v1 = vadd.f32 %v484_v16, %v228_v63  ;;  %v995_v6 = vmax.f32 %v739_v12, 0.0  ;;  %v1081_v14 = vpack.c.bf16 %v868_v3, %v867_v11  ;;  %v1284_v22 = vld [vmem:[%s11732_s2 + $0x3a8] sm:$0xff]  ;;  %v103_v63 = vld [vmem:[%s11730_s0 + $0x2c0] sm:$0xff] }
 0x164   :  { %5987 = vmatprep.subr.bf16.mxu0 %v7965_v0  ;;  %v6743_v36 = vcombine.high %v1284_v22, %v1292_v23  ;;  %v1312_v54 = vld [vmem:[%s11732_s2 + $0x488] sm:$0xff]  ;;  %v231_v16 = vld [vmem:[%s11730_s0 + $0x6c0] sm:$0xff] }
 0x165   :  { %4832 = vmatpush1.bf16.msra.mxu1 %v1078_v32  ;;  %v996_v17 = vmax.f32 %v740_v1, 0.0  ;;  %v101_v32 = vld [vmem:[%s11730_s0 + $0x2b0] sm:$0xff]  ;;  %v1320_v40 = vld [vmem:[%s11732_s2 + $0x4c8] sm:$0xff]  ;;  %v487_v1 = vld [vmem:[%s11731_s1 + $0x6c0] sm:$0xff] }
 0x166   :  { %4833 = vmatprep.subr.bf16.mxu1 %v7965_v0  ;;  %v613_v25 = vadd.f32 %v357_v18, %v101_v32  ;;  %v1316_v50 = vld [vmem:[%s11732_s2 + $0x4a8] sm:$0xff]  ;;  %v6767_v58 = vcombine.high %v1312_v54, %v1320_v40 }
 0x167   :  { %5988 = vmatpush1.bf16.msra.mxu0 %v1142_v15  ;;  %v1145_v19 = vpack.c.bf16 %v996_v17, %v995_v6  ;;  %v102_v15 = vld [vmem:[%s11730_s0 + $0x2b8] sm:$0xff]  ;;  %v1324_v57 = vld [vmem:[%s11732_s2 + $0x4e8] sm:$0xff] }
 0x168   :  { %4593 = vmatmul.mubr.bf16.gmra.mrb[16].mxu1 %v6686_v45  ;;  %5989 = vmatprep.subr.bf16.mxu0 %v7965_v0  ;;  %v614_v37 = vadd.f32 %v358_v24, %v102_v15  ;;  %v869_v43 = vmax.f32 %v613_v25, 0.0  ;;  %v742_v45 = vadd.f32 %v486_v39, %v230_v26  ;;  %v1328_v60 = vld [vmem:[%s11732_s2 + $0x508] sm:$0xff]  ;;  %v6774_v17 = vcombine.low %v1316_v50, %v1324_v57  ;;  %v106_v26 = vld [vmem:[%s11730_s0 + $0x2d8] sm:$0xff]  ;;  %v233_v39 = vld [vmem:[%s11730_s0 + $0x6d0] sm:$0xff] }
 0x169   :  { %4600 = vmatprep.mubr.bf16.mxu1 %v6703_v47  ;;  %4834 = vmatpush1.bf16.msra.mxu1 %v1079_v51  ;;  %v6751_v47 = vcombine.high %v1296_v28, %v1304_v30  ;;  %v6759_v51 = vcombine.high %v1300_v31, %v1308_v35  ;;  %v1336_v61 = vld [vmem:[%s11732_s2 + $0x548] sm:$0xff]  ;;  %v361_v35 = vld [vmem:[%s11731_s1 + $0x2d0] sm:$0xff] }
 0x16a   :  { %5749 = vmatmul.mubr.bf16.gmra.mrb[16].mxu0 %v6694_v46  ;;  %4835 = vmatprep.subr.bf16.mxu1 %v7965_v0  ;;  %v6742_v46 = vcombine.low %v1284_v22, %v1292_v23  ;;  %v998_v56 = vmax.f32 %v742_v45, 0.0  ;;  %v1332_v62 = vld [vmem:[%s11732_s2 + $0x528] sm:$0xff]  ;;  %v6782_v30 = vcombine.low %v1328_v60, %v1336_v61  ;;  %v617_v38 = vadd.f32 %v361_v35, %v105_v33  ;;  %v489_v45 = vld [vmem:[%s11731_s1 + $0x6d0] sm:$0xff] }
 0x16b   :  { %5756 = vmatprep.mubr.bf16.mxu0 %v6711_v48  ;;  %5990 = vmatpush1.bf16.msra.mxu0 %v1143_v49  ;;  %v870_v48 = vmax.f32 %v614_v37, 0.0  ;;  %v104_v4 = vld [vmem:[%s11730_s0 + $0x2c8] sm:$0xff]  ;;  %v362_v37 = vld [vmem:[%s11731_s1 + $0x2d8] sm:$0xff] }
 0x16c   :  { %5991 = vmatprep.subr.bf16.mxu0 %v7965_v0  ;;  %v1146_v53 = vpack.c.bf16 %v998_v56, %v997_v52  ;;  %v360_v8 = vld [vmem:[%s11731_s1 + $0x2c8] sm:$0xff]  ;;  %v618_v44 = vadd.f32 %v362_v37, %v106_v26 }
 0x16d   :  { %4836 = vmatpush1.bf16.msra.mxu1 %v1080_v59  ;;  %v1082_v49 = vpack.c.bf16 %v870_v48, %v869_v43  ;;  %v6775_v59 = vcombine.high %v1316_v50, %v1324_v57  ;;  %v1340_v11 = vld [vmem:[%s11732_s2 + $0x568] sm:$0xff]  ;;  %v616_v12 = vadd.f32 %v360_v8, %v104_v4  ;;  %v873_v48 = vmax.f32 %v617_v38, 0.0 }
 0x16e   :  { %4837 = vmatprep.subr.bf16.mxu1 %v7965_v0  ;;  %v6791_v20 = vcombine.high %v1332_v62, %v1340_v11  ;;  %v1356_v28 = vld [vmem:[%s11732_s2 + $0x5e8] sm:$0xff]  ;;  %v6790_v31 = vcombine.low %v1332_v62, %v1340_v11  ;;  %v363_v11 = vld [vmem:[%s11731_s1 + $0x2e0] sm:$0xff] }
 0x16f   :  { %5992 = vmatpush1.bf16.msra.mxu0 %v1144_v7  ;;  %v359_v7 = vld [vmem:[%s11731_s1 + $0x2c0] sm:$0xff]  ;;  %v1360_v18 = vld [vmem:[%s11732_s2 + $0x608] sm:$0xff] }
 0x170   :  { %4601 = vmatmul.mubr.bf16.gmra.mrb[20].mxu1 %v6702_v5  ;;  %5993 = vmatprep.subr.bf16.mxu0 %v7965_v0  ;;  %v615_v10 = vadd.f32 %v359_v7, %v103_v63  ;;  %v232_v5 = vld [vmem:[%s11730_s0 + $0x6c8] sm:$0xff] }
 0x171   :  { %4608 = vmatprep.mubr.bf16.mxu1 %v6719_v13  ;;  %4838 = vmatpush1.bf16.msra.mxu1 %v1081_v14  ;;  %v6766_v13 = vcombine.low %v1312_v54, %v1320_v40  ;;  %v6783_v14 = vcombine.high %v1328_v60, %v1336_v61  ;;  %v1368_v24 = vld [vmem:[%s11732_s2 + $0x648] sm:$0xff] }
 0x172   :  { %5757 = vmatmul.mubr.bf16.gmra.mrb[20].mxu0 %v6710_v2  ;;  %4839 = vmatprep.subr.bf16.mxu1 %v7965_v0  ;;  %v488_v2 = vld [vmem:[%s11731_s1 + $0x6c8] sm:$0xff]  ;;  %v871_v3 = vmax.f32 %v615_v10, 0.0  ;;  %v6814_v61 = vcombine.low %v1360_v18, %v1368_v24 }
 0x173   :  { %5764 = vmatprep.mubr.bf16.mxu0 %v6727_v9  ;;  %5994 = vmatpush1.bf16.msra.mxu0 %v1145_v19  ;;  %v743_v9 = vadd.f32 %v487_v1, %v231_v16  ;;  %v744_v6 = vadd.f32 %v488_v2, %v232_v5  ;;  %v872_v19 = vmax.f32 %v616_v12, 0.0  ;;  %v1364_v25 = vld [vmem:[%s11732_s2 + $0x628] sm:$0xff]  ;;  %v107_v16 = vld [vmem:[%s11730_s0 + $0x2e0] sm:$0xff] }
 0x174   :  { %5995 = vmatprep.subr.bf16.mxu0 %v7965_v0  ;;  %v1372_v43 = vld [vmem:[%s11732_s2 + $0x668] sm:$0xff]  ;;  %v619_v1 = vadd.f32 %v363_v11, %v107_v16  ;;  %v235_v2 = vld [vmem:[%s11730_s0 + $0x6e0] sm:$0xff] }
 0x175   :  { %4840 = vmatpush1.bf16.msra.mxu1 %v1082_v49  ;;  %v999_v21 = vmax.f32 %v743_v9, 0.0  ;;  %v1000_v22 = vmax.f32 %v744_v6, 0.0  ;;  %v1083_v23 = vpack.c.bf16 %v872_v19, %v871_v3  ;;  %v6815_v49 = vcombine.high %v1360_v18, %v1368_v24  ;;  %v1388_v60 = vld [vmem:[%s11732_s2 + $0x6e8] sm:$0xff]  ;;  %v491_v6 = vld [vmem:[%s11731_s1 + $0x6e0] sm:$0xff] }
 0x176   :  { %4841 = vmatprep.subr.bf16.mxu1 %v7965_v0  ;;  %v6823_v54 = vcombine.high %v1364_v25, %v1372_v43  ;;  %v6822_v62 = vcombine.low %v1364_v25, %v1372_v43  ;;  %v1392_v7 = vld [vmem:[%s11732_s2 + $0x708] sm:$0xff]  ;;  %v875_v19 = vmax.f32 %v619_v1, 0.0  ;;  %v365_v43 = vld [vmem:[%s11731_s1 + $0x2f0] sm:$0xff] }
 0x177   :  { %5996 = vmatpush1.bf16.msra.mxu0 %v1146_v53  ;;  %v874_v53 = vmax.f32 %v618_v44, 0.0  ;;  %v1400_v8 = vld [vmem:[%s11732_s2 + $0x748] sm:$0xff]  ;;  %v366_v44 = vld [vmem:[%s11731_s1 + $0x2f8] sm:$0xff] }
 0x178   :  { %4609 = vmatmul.mubr.bf16.gmra.mrb[24].mxu1 %v6718_v27  ;;  %5997 = vmatprep.subr.bf16.mxu0 %v7965_v0  ;;  %v1147_v27 = vpack.c.bf16 %v1000_v22, %v999_v21  ;;  %v1396_v10 = vld [vmem:[%s11732_s2 + $0x728] sm:$0xff]  ;;  %v6846_v24 = vcombine.low %v1392_v7, %v1400_v8 }
 0x179   :  { %4616 = vmatprep.mubr.bf16.mxu1 %v6735_v34  ;;  %v1352_v34 = vld [vmem:[%s11732_s2 + $0x5c8] sm:$0xff]  ;;  %4842 = vmatpush1.bf16.msra.mxu1 %v1083_v23  ;;  %v1084_v57 = vpack.c.bf16 %v874_v53, %v873_v48  ;;  %v6847_v23 = vcombine.high %v1392_v7, %v1400_v8 }
 0x17a   :  { %5765 = vmatmul.mubr.bf16.gmra.mrb[24].mxu0 %v6726_v29  ;;  %v1344_v29 = vld [vmem:[%s11732_s2 + $0x588] sm:$0xff]  ;;  %4843 = vmatprep.subr.bf16.mxu1 %v7965_v0 }
 0x17b   :  { %5772 = vmatprep.mubr.bf16.mxu0 %v6743_v36  ;;  %v1348_v36 = vld [vmem:[%s11732_s2 + $0x5a8] sm:$0xff]  ;;  %5998 = vmatpush1.bf16.msra.mxu0 %v1147_v27  ;;  %v6799_v32 = vcombine.high %v1344_v29, %v1352_v34 }
 0x17c   :  { %5999 = vmatprep.subr.bf16.mxu0 %v7965_v0  ;;  %v6807_v15 = vcombine.high %v1348_v36, %v1356_v28  ;;  %v6806_v56 = vcombine.low %v1348_v36, %v1356_v28  ;;  %v108_v5 = vld [vmem:[%s11730_s0 + $0x2e8] sm:$0xff] }
 0x17d   :  { %4844 = vmatpush1.bf16.msra.mxu1 %v1084_v57  ;;  %v364_v12 = vld [vmem:[%s11731_s1 + $0x2e8] sm:$0xff] }
 0x17e   :  { %4845 = vmatprep.subr.bf16.mxu1 %v7965_v0  ;;  %v1404_v3 = vld [vmem:[%s11732_s2 + $0x768] sm:$0xff]  ;;  %v620_v9 = vadd.f32 %v364_v12, %v108_v5 }
 0x17f   :  { %v1420_v18 = vld [vmem:[%s11732_s2 + $0x7e8] sm:$0xff]  ;;  %v6854_v25 = vcombine.low %v1396_v10, %v1404_v3 }
 0x180   :  { %4617 = vmatmul.mubr.bf16.gmra.mrb[28].mxu1 %v6734_v42  ;;  %v234_v42 = vld [vmem:[%s11730_s0 + $0x6d8] sm:$0xff]  ;;  %v876_v27 = vmax.f32 %v620_v9, 0.0  ;;  %v1424_v35 = vld [vmem:[%s11732_s2 + $0x808] sm:$0xff] }
 0x181   :  { %4624 = vmatprep.mubr.bf16.mxu1 %v6751_v47  ;;  %v6798_v47 = vcombine.low %v1344_v29, %v1352_v34  ;;  %v6855_v29 = vcombine.high %v1396_v10, %v1404_v3  ;;  %v1432_v37 = vld [vmem:[%s11732_s2 + $0x848] sm:$0xff] }
 0x182   :  { %5773 = vmatmul.mubr.bf16.gmra.mrb[28].mxu0 %v6742_v46  ;;  %v490_v46 = vld [vmem:[%s11731_s1 + $0x6d8] sm:$0xff]  ;;  %v1085_v28 = vpack.c.bf16 %v876_v27, %v875_v19  ;;  %v1428_v38 = vld [vmem:[%s11732_s2 + $0x828] sm:$0xff]  ;;  %v6879_v57 = vcombine.high %v1424_v35, %v1432_v37  ;;  %v6878_v8 = vcombine.low %v1424_v35, %v1432_v37 }
 0x183   :  { %5780 = vmatprep.mubr.bf16.mxu0 %v6759_v51  ;;  %v745_v51 = vadd.f32 %v489_v45, %v233_v39  ;;  %v746_v52 = vadd.f32 %v490_v46, %v234_v42  ;;  %v109_v39 = vld [vmem:[%s11730_s0 + $0x2f0] sm:$0xff]  ;;  %v110_v42 = vld [vmem:[%s11730_s0 + $0x2f8] sm:$0xff]  ;;  %v1436_v48 = vld [vmem:[%s11732_s2 + $0x868] sm:$0xff] }
 0x184   :  { %4846 = vmatpush1.bf16.msra.mxu1 %v1085_v28  ;;  %v621_v45 = vadd.f32 %v365_v43, %v109_v39  ;;  %v237_v46 = vld [vmem:[%s11730_s0 + $0x6f0] sm:$0xff]  ;;  %v1452_v7 = vld [vmem:[%s11732_s2 + $0x8e8] sm:$0xff]  ;;  %v6886_v10 = vcombine.low %v1428_v38, %v1436_v48 }
 0x185   :  { %v1001_v40 = vmax.f32 %v745_v51, 0.0  ;;  %v1002_v50 = vmax.f32 %v746_v52, 0.0  ;;  %4847 = vmatprep.subr.bf16.mxu1 %v7965_v0  ;;  %v622_v51 = vadd.f32 %v366_v44, %v110_v42  ;;  %v493_v52 = vld [vmem:[%s11731_s1 + $0x6f0] sm:$0xff]  ;;  %v1456_v11 = vld [vmem:[%s11732_s2 + $0x908] sm:$0xff] }
 0x186   :  { %v877_v53 = vmax.f32 %v621_v45, 0.0  ;;  %v1464_v12 = vld [vmem:[%s11732_s2 + $0x948] sm:$0xff] }
 0x187   :  { %v1460_v1 = vld [vmem:[%s11732_s2 + $0x928] sm:$0xff]  ;;  %v6911_v9 = vcombine.high %v1456_v11, %v1464_v12 }
 0x188   :  { %4625 = vmatmul.mubr.bf16.gmra.mrb[32].mxu1 %v6750_v41  ;;  %v1148_v41 = vpack.c.bf16 %v1002_v50, %v1001_v40  ;;  %v1476_v19 = vld [vmem:[%s11732_s2 + $0x9a8] sm:$0xff] }
 0x189   :  { %4632 = vmatprep.mubr.bf16.mxu1 %v6767_v58  ;;  %v1384_v58 = vld [vmem:[%s11732_s2 + $0x6c8] sm:$0xff] }
 0x18a   :  { %5781 = vmatmul.mubr.bf16.gmra.mrb[32].mxu0 %v6758_v55  ;;  %v1376_v55 = vld [vmem:[%s11732_s2 + $0x688] sm:$0xff] }
 0x18b   :  { %5788 = vmatprep.mubr.bf16.mxu0 %v6775_v59  ;;  %v1380_v59 = vld [vmem:[%s11732_s2 + $0x6a8] sm:$0xff]  ;;  %6000 = vmatpush1.bf16.msra.mxu0 %v1148_v41  ;;  %v6831_v63 = vcombine.high %v1376_v55, %v1384_v58  ;;  %v878_v41 = vmax.f32 %v622_v51, 0.0 }
 0x18c   :  { %6001 = vmatprep.subr.bf16.mxu0 %v7965_v0  ;;  %v6839_v4 = vcombine.high %v1380_v59, %v1388_v60  ;;  %v6838_v22 = vcombine.low %v1380_v59, %v1388_v60  ;;  %v1500_v28 = vld [vmem:[%s11732_s2 + $0xa68] sm:$0xff] }
 0x18d   :  { %v1086_v60 = vpack.c.bf16 %v878_v41, %v877_v53  ;;  %v1520_v39 = vld [vmem:[%s11732_s2 + $0xb08] sm:$0xff] }
 0x18e   :  { %v1528_v42 = vld [vmem:[%s11732_s2 + $0xb48] sm:$0xff] }
 0x18f   :  { %4848 = vmatpush1.bf16.msra.mxu1 %v1086_v60  ;;  %v1524_v43 = vld [vmem:[%s11732_s2 + $0xb28] sm:$0xff]  ;;  %v6974_v53 = vcombine.low %v1520_v39, %v1528_v42 }
 0x190   :  { %4633 = vmatmul.mubr.bf16.gmra.mrb[36].mxu1 %v6766_v13  ;;  %v236_v13 = vld [vmem:[%s11730_s0 + $0x6e8] sm:$0xff]  ;;  %5106 = vmatprep.subr.bf16.mxu1 %v7965_v0 }
 0x191   :  { %4640 = vmatprep.mubr.bf16.mxu1 %v6783_v14  ;;  %v6830_v14 = vcombine.low %v1376_v55, %v1384_v58  ;;  %v6887_v55 = vcombine.high %v1428_v38, %v1436_v48  ;;  %v1532_v44 = vld [vmem:[%s11732_s2 + $0xb68] sm:$0xff] }
 0x192   :  { %5789 = vmatmul.mubr.bf16.gmra.mrb[36].mxu0 %v6774_v17  ;;  %v492_v17 = vld [vmem:[%s11731_s1 + $0x6e8] sm:$0xff]  ;;  %v6983_v48 = vcombine.high %v1524_v43, %v1532_v44 }
 0x193   :  { %5796 = vmatprep.mubr.bf16.mxu0 %v6791_v20  ;;  %v747_v20 = vadd.f32 %v491_v6, %v235_v2  ;;  %v748_v21 = vadd.f32 %v492_v17, %v236_v13  ;;  %v1468_v2 = vld [vmem:[%s11732_s2 + $0x968] sm:$0xff] }
 0x194   :  { %v6919_v6 = vcombine.high %v1460_v1, %v1468_v2  ;;  %v1472_v17 = vld [vmem:[%s11732_s2 + $0x988] sm:$0xff] }
 0x195   :  { %v1003_v34 = vmax.f32 %v747_v20, 0.0  ;;  %v1004_v36 = vmax.f32 %v748_v21, 0.0  ;;  %v1484_v20 = vld [vmem:[%s11732_s2 + $0x9e8] sm:$0xff]  ;;  %v6910_v21 = vcombine.low %v1456_v11, %v1464_v12 }
 0x196   :  { %v6935_v27 = vcombine.high %v1476_v19, %v1484_v20  ;;  %v1536_v51 = vld [vmem:[%s11732_s2 + $0xb88] sm:$0xff] }
 0x197   :  { %v1560_v41 = vld [vmem:[%s11732_s2 + $0xc48] sm:$0xff] }
 0x198   :  { %4641 = vmatmul.mubr.bf16.gmra.mrb[40].mxu1 %v6782_v30  ;;  %v1149_v30 = vpack.c.bf16 %v1004_v36, %v1003_v34  ;;  %v1496_v34 = vld [vmem:[%s11732_s2 + $0xa48] sm:$0xff] }
 0x199   :  { %4648 = vmatprep.mubr.bf16.mxu1 %v6799_v32  ;;  %v1416_v32 = vld [vmem:[%s11732_s2 + $0x7c8] sm:$0xff] }
 0x19a   :  { %5797 = vmatmul.mubr.bf16.gmra.mrb[40].mxu0 %v6790_v31  ;;  %v1408_v31 = vld [vmem:[%s11732_s2 + $0x788] sm:$0xff] }
 0x19b   :  { %5804 = vmatprep.mubr.bf16.mxu0 %v6807_v15  ;;  %v1412_v15 = vld [vmem:[%s11732_s2 + $0x7a8] sm:$0xff]  ;;  %6002 = vmatpush1.bf16.msra.mxu0 %v1149_v30  ;;  %v6863_v33 = vcombine.high %v1408_v31, %v1416_v32 }
 0x19c   :  { %6003 = vmatprep.subr.bf16.mxu0 %v7965_v0  ;;  %v6871_v26 = vcombine.high %v1412_v15, %v1420_v18  ;;  %v6870_v50 = vcombine.low %v1412_v15, %v1420_v18  ;;  %v1492_v36 = vld [vmem:[%s11732_s2 + $0xa28] sm:$0xff] }
 0x19d   :  { %v6951_v15 = vcombine.high %v1492_v36, %v1500_v28  ;;  %v1504_v18 = vld [vmem:[%s11732_s2 + $0xa88] sm:$0xff]  ;;  %v6950_v35 = vcombine.low %v1492_v36, %v1500_v28 }
 0x19e   :  { %v1584_v12 = vld [vmem:[%s11732_s2 + $0xd08] sm:$0xff] }
 0x19f   :  { %v1624_v36 = vld [vmem:[%s11732_s2 + $0xe48] sm:$0xff] }
 0x1a0   :  { %4649 = vmatmul.mubr.bf16.gmra.mrb[44].mxu1 %v6798_v47  ;;  %v238_v47 = vld [vmem:[%s11730_s0 + $0x6f8] sm:$0xff]  ;;  %v1620_v28 = vld [vmem:[%s11732_s2 + $0xe28] sm:$0xff] }
 0x1a1   :  { %4656 = vmatprep.mubr.bf16.mxu1 %v6815_v49  ;;  %v6862_v49 = vcombine.low %v1408_v31, %v1416_v32  ;;  %v6934_v31 = vcombine.low %v1476_v19, %v1484_v20  ;;  %v1608_v19 = vld [vmem:[%s11732_s2 + $0xdc8] sm:$0xff] }
 0x1a2   :  { %5805 = vmatmul.mubr.bf16.gmra.mrb[44].mxu0 %v6806_v56  ;;  %v494_v56 = vld [vmem:[%s11731_s1 + $0x6f8] sm:$0xff]  ;;  %v1604_v20 = vld [vmem:[%s11732_s2 + $0xda8] sm:$0xff] }
 0x1a3   :  { %5812 = vmatprep.mubr.bf16.mxu0 %v6823_v54  ;;  %v749_v54 = vadd.f32 %v493_v52, %v237_v46  ;;  %v750_v40 = vadd.f32 %v494_v56, %v238_v47  ;;  %v6975_v47 = vcombine.high %v1520_v39, %v1528_v42  ;;  %v1544_v52 = vld [vmem:[%s11732_s2 + $0xbc8] sm:$0xff] }
 0x1a4   :  { %v1540_v56 = vld [vmem:[%s11732_s2 + $0xba8] sm:$0xff] }
 0x1a5   :  { %v1005_v58 = vmax.f32 %v749_v54, 0.0  ;;  %v1006_v59 = vmax.f32 %v750_v40, 0.0  ;;  %v6982_v54 = vcombine.low %v1524_v43, %v1532_v44  ;;  %v6991_v40 = vcombine.high %v1536_v51, %v1544_v52  ;;  %v1648_v42 = vld [vmem:[%s11732_s2 + $0xf08] sm:$0xff] }
 0x1a6   :  { %v1656_v43 = vld [vmem:[%s11732_s2 + $0xf48] sm:$0xff] }
 0x1a7   :  { %v1652_v44 = vld [vmem:[%s11732_s2 + $0xf28] sm:$0xff] }
 0x1a8   :  { %4657 = vmatmul.mubr.bf16.gmra.mrb[48].mxu1 %v6814_v61  ;;  %v1150_v61 = vpack.c.bf16 %v1006_v59, %v1005_v58  ;;  %v1564_v58 = vld [vmem:[%s11732_s2 + $0xc68] sm:$0xff]  ;;  %v6990_v59 = vcombine.low %v1536_v51, %v1544_v52 }
 0x1a9   :  { %4664 = vmatprep.mubr.bf16.mxu1 %v6831_v63  ;;  %v1448_v63 = vld [vmem:[%s11732_s2 + $0x8c8] sm:$0xff] }
 0x1aa   :  { %5813 = vmatmul.mubr.bf16.gmra.mrb[48].mxu0 %v6822_v62  ;;  %v1440_v62 = vld [vmem:[%s11732_s2 + $0x888] sm:$0xff] }
 0x1ab   :  { %5820 = vmatprep.mubr.bf16.mxu0 %v6839_v4  ;;  %v1444_v4 = vld [vmem:[%s11732_s2 + $0x8a8] sm:$0xff]  ;;  %6004 = vmatpush1.bf16.msra.mxu0 %v1150_v61  ;;  %v6895_v16 = vcombine.high %v1440_v62, %v1448_v63  ;;  %v6894_v13 = vcombine.low %v1440_v62, %v1448_v63 }
 0x1ac   :  { %6262 = vmatprep.subr.bf16.mxu0 %v7965_v0  ;;  %v6903_v5 = vcombine.high %v1444_v4, %v1452_v7  ;;  %v6902_v3 = vcombine.low %v1444_v4, %v1452_v7  ;;  %v1568_v63 = vld [vmem:[%s11732_s2 + $0xc88] sm:$0xff] }
 0x1ad   :  { %v1576_v4 = vld [vmem:[%s11732_s2 + $0xcc8] sm:$0xff] }
 0x1ae   :  { %v1572_v7 = vld [vmem:[%s11732_s2 + $0xca8] sm:$0xff] }
 0x1af   :  { %v1664_v52 = vld [vmem:[%s11732_s2 + $0xf88] sm:$0xff] }
 0x1b0   :  { %4665 = vmatmul.mubr.bf16.gmra.mrb[52].mxu1 %v6830_v14  ;;  %v1480_v14 = vld [vmem:[%s11732_s2 + $0x9c8] sm:$0xff] }
 0x1b1   :  { %4672 = vmatprep.mubr.bf16.mxu1 %v6847_v23  ;;  %v6927_v23 = vcombine.high %v1472_v17, %v1480_v14  ;;  %v6926_v30 = vcombine.low %v1472_v17, %v1480_v14  ;;  %v1600_v14 = vld [vmem:[%s11732_s2 + $0xd88] sm:$0xff] }
 0x1b2   :  { %5821 = vmatmul.mubr.bf16.gmra.mrb[52].mxu0 %v6838_v22  ;;  %v6918_v22 = vcombine.low %v1460_v1, %v1468_v2  ;;  %v1592_v1 = vld [vmem:[%s11732_s2 + $0xd48] sm:$0xff] }
 0x1b3   :  { %5828 = vmatprep.mubr.bf16.mxu0 %v6855_v29  ;;  %v1488_v29 = vld [vmem:[%s11732_s2 + $0xa08] sm:$0xff] }
 0x1b4   :  { %v6943_v32 = vcombine.high %v1488_v29, %v1496_v34  ;;  %v1588_v2 = vld [vmem:[%s11732_s2 + $0xd28] sm:$0xff] }
 0x1b8   :  { %4673 = vmatmul.mubr.bf16.gmra.mrb[56].mxu1 %v6846_v24  ;;  %v1512_v24 = vld [vmem:[%s11732_s2 + $0xac8] sm:$0xff] }
 0x1b9   :  { %4680 = vmatprep.mubr.bf16.mxu1 %v6863_v33  ;;  %v1516_v33 = vld [vmem:[%s11732_s2 + $0xae8] sm:$0xff]  ;;  %v6959_v37 = vcombine.high %v1504_v18, %v1512_v24  ;;  %v6958_v45 = vcombine.low %v1504_v18, %v1512_v24 }
 0x1ba   :  { %5829 = vmatmul.mubr.bf16.gmra.mrb[56].mxu0 %v6854_v25  ;;  %v1508_v25 = vld [vmem:[%s11732_s2 + $0xaa8] sm:$0xff] }
 0x1bb   :  { %5836 = vmatprep.mubr.bf16.mxu0 %v6871_v26  ;;  %v6942_v26 = vcombine.low %v1488_v29, %v1496_v34  ;;  %v6967_v38 = vcombine.high %v1508_v25, %v1516_v33  ;;  %v6966_v46 = vcombine.low %v1508_v25, %v1516_v33  ;;  %v1616_v34 = vld [vmem:[%s11732_s2 + $0xe08] sm:$0xff] }
 0x1bc   :  { %v1632_v24 = vld [vmem:[%s11732_s2 + $0xe88] sm:$0xff] }
 0x1bd   :  { %v1640_v25 = vld [vmem:[%s11732_s2 + $0xec8] sm:$0xff] }
 0x1be   :  { %v1636_v33 = vld [vmem:[%s11732_s2 + $0xea8] sm:$0xff] }
 0x1c0   :  { %4681 = vmatmul.mubr.bf16.gmra.mrb[60].mxu1 %v6862_v49  ;;  %v1548_v49 = vld [vmem:[%s11732_s2 + $0xbe8] sm:$0xff] }
 0x1c1   :  { %4688 = vmatprep.mubr.bf16.mxu1 %v6879_v57  ;;  %v1552_v57 = vld [vmem:[%s11732_s2 + $0xc08] sm:$0xff]  ;;  %v6998_v60 = vcombine.low %v1540_v56, %v1548_v49 }
 0x1c2   :  { %5837 = vmatmul.mubr.bf16.gmra.mrb[60].mxu0 %v6870_v50  ;;  %v6999_v50 = vcombine.high %v1540_v56, %v1548_v49  ;;  %v7007_v61 = vcombine.high %v1552_v57, %v1560_v41  ;;  %v1672_v56 = vld [vmem:[%s11732_s2 + $0xfc8] sm:$0xff] }
 0x1c3   :  { %5844 = vmatprep.mubr.bf16.mxu0 %v6887_v55  ;;  %v1556_v55 = vld [vmem:[%s11732_s2 + $0xc28] sm:$0xff] }
 0x1c4   :  { %v7015_v62 = vcombine.high %v1556_v55, %v1564_v58  ;;  %v1668_v49 = vld [vmem:[%s11732_s2 + $0xfa8] sm:$0xff] }
 0x1c8   :  { %4689 = vmatmul.mubr.bf16.gmra.mrb[64].mxu1 %v6878_v8  ;;  %v1580_v8 = vld [vmem:[%s11732_s2 + $0xce8] sm:$0xff] }
 0x1c9   :  { %4696 = vmatprep.mubr.bf16.mxu1 %v6895_v16  ;;  %v7014_v16 = vcombine.low %v1556_v55, %v1564_v58  ;;  %v7031_v11 = vcombine.high %v1572_v7, %v1580_v8  ;;  %v10204_v55 = vld [vmem:[%s11732_s2 + $0x50] sm:$0xff]  ;;  %v111_v58 = vld [vmem:[%s11730_s0 + $0x300] sm:$0xff] }
 0x1ca   :  { %5845 = vmatmul.mubr.bf16.gmra.mrb[64].mxu0 %v6886_v10  ;;  %v7006_v10 = vcombine.low %v1552_v57, %v1560_v41  ;;  %v10199_v41 = vld [vmem:[%s11732_s2 + $0x10] sm:$0xff] }
 0x1cb   :  { %5852 = vmatprep.mubr.bf16.mxu0 %v6903_v5  ;;  %v7023_v5 = vcombine.high %v1568_v63, %v1576_v4 }
 0x1d0   :  { %4697 = vmatmul.mubr.bf16.gmra.mrb[68].mxu1 %v6894_v13  ;;  %v1596_v13 = vld [vmem:[%s11732_s2 + $0xd68] sm:$0xff] }
 0x1d1   :  { %4704 = vmatprep.mubr.bf16.mxu1 %v6911_v9  ;;  %v7030_v9 = vcombine.low %v1572_v7, %v1580_v8  ;;  %v7047_v17 = vcombine.high %v1588_v2, %v1596_v13  ;;  %v240_v7 = vld [vmem:[%s11730_s0 + $0x708] sm:$0xff]  ;;  %v495_v8 = vld [vmem:[%s11731_s1 + $0x700] sm:$0xff] }
 0x1d2   :  { %5853 = vmatmul.mubr.bf16.gmra.mrb[68].mxu0 %v6902_v3  ;;  %v7022_v3 = vcombine.low %v1568_v63, %v1576_v4  ;;  %v10226_v63 = vld [vmem:[%s11732_s2 + $0x70] sm:$0xff]  ;;  %v239_v4 = vld [vmem:[%s11730_s0 + $0x700] sm:$0xff] }
 0x1d3   :  { %5860 = vmatprep.mubr.bf16.mxu0 %v6919_v6  ;;  %v7039_v6 = vcombine.high %v1584_v12, %v1592_v1 }
 0x1d8   :  { %4705 = vmatmul.mubr.bf16.gmra.mrb[72].mxu1 %v6910_v21  ;;  %v1612_v21 = vld [vmem:[%s11732_s2 + $0xde8] sm:$0xff] }
 0x1d9   :  { %4712 = vmatprep.mubr.bf16.mxu1 %v6927_v23  ;;  %v7046_v23 = vcombine.low %v1588_v2, %v1596_v13  ;;  %v7063_v29 = vcombine.high %v1604_v20, %v1612_v21  ;;  %v6625_v13 = vcombine.high %v10199_v41, %v10204_v55 }
 0x1da   :  { %5861 = vmatmul.mubr.bf16.gmra.mrb[72].mxu0 %v6918_v22  ;;  %v7038_v22 = vcombine.low %v1584_v12, %v1592_v1  ;;  %v113_v12 = vld [vmem:[%s11730_s0 + $0x310] sm:$0xff]  ;;  %v114_v1 = vld [vmem:[%s11730_s0 + $0x318] sm:$0xff] }
 0x1db   :  { %5868 = vmatprep.mubr.bf16.mxu0 %v6935_v27  ;;  %v7055_v27 = vcombine.high %v1600_v14, %v1608_v19 }
 0x1e0   :  { %4713 = vmatmul.mubr.bf16.gmra.mrb[76].mxu1 %v6926_v30  ;;  %v1628_v30 = vld [vmem:[%s11732_s2 + $0xe68] sm:$0xff] }
 0x1e1   :  { %4720 = vmatprep.mubr.bf16.mxu1 %v6943_v32  ;;  %v7062_v32 = vcombine.low %v1604_v20, %v1612_v21  ;;  %v7079_v18 = vcombine.high %v1620_v28, %v1628_v30  ;;  %v242_v20 = vld [vmem:[%s11730_s0 + $0x718] sm:$0xff]  ;;  %v497_v21 = vld [vmem:[%s11731_s1 + $0x710] sm:$0xff] }
 0x1e2   :  { %5869 = vmatmul.mubr.bf16.gmra.mrb[76].mxu0 %v6934_v31  ;;  %v7054_v31 = vcombine.low %v1600_v14, %v1608_v19  ;;  %v751_v14 = vadd.f32 %v495_v8, %v239_v4  ;;  %v502_v4 = vld [vmem:[%s11731_s1 + $0x738] sm:$0xff]  ;;  %v120_v8 = vld [vmem:[%s11730_s0 + $0x348] sm:$0xff] }
 0x1e3   :  { %5876 = vmatprep.mubr.bf16.mxu0 %v6951_v15  ;;  %v7071_v15 = vcombine.high %v1616_v34, %v1624_v36 }
 0x1e8   :  { %4721 = vmatmul.mubr.bf16.gmra.mrb[80].mxu1 %v6942_v26  ;;  %v1644_v26 = vld [vmem:[%s11732_s2 + $0xee8] sm:$0xff] }
 0x1e9   :  { %4728 = vmatprep.mubr.bf16.mxu1 %v6959_v37  ;;  %v7078_v37 = vcombine.low %v1620_v28, %v1628_v30  ;;  %v7095_v39 = vcombine.high %v1636_v33, %v1644_v26 }
 0x1ea   :  { %5877 = vmatmul.mubr.bf16.gmra.mrb[80].mxu0 %v6950_v35  ;;  %v7070_v35 = vcombine.low %v1616_v34, %v1624_v36  ;;  %v10271_v34 = vld [vmem:[%s11732_s2 + $0x90] sm:$0xff] }
 0x1eb   :  { %5884 = vmatprep.mubr.bf16.mxu0 %v6967_v38  ;;  %v7087_v38 = vcombine.high %v1632_v24, %v1640_v25  ;;  %v10276_v36 = vld [vmem:[%s11732_s2 + $0xd0] sm:$0xff] }
 0x1f0   :  { %4729 = vmatmul.mubr.bf16.gmra.mrb[84].mxu1 %v6958_v45  ;;  %v1660_v45 = vld [vmem:[%s11732_s2 + $0xf68] sm:$0xff] }
 0x1f1   :  { %4736 = vmatprep.mubr.bf16.mxu1 %v6975_v47  ;;  %v7094_v47 = vcombine.low %v1636_v33, %v1644_v26  ;;  %v7111_v51 = vcombine.high %v1652_v44, %v1660_v45  ;;  %v116_v33 = vld [vmem:[%s11730_s0 + $0x328] sm:$0xff]  ;;  %v371_v26 = vld [vmem:[%s11731_s1 + $0x320] sm:$0xff] }
 0x1f2   :  { %5885 = vmatmul.mubr.bf16.gmra.mrb[84].mxu0 %v6966_v46  ;;  %v7086_v46 = vcombine.low %v1632_v24, %v1640_v25  ;;  %v10286_v24 = vld [vmem:[%s11732_s2 + $0xf0] sm:$0xff]  ;;  %v115_v25 = vld [vmem:[%s11730_s0 + $0x320] sm:$0xff] }
 0x1f3   :  { %5892 = vmatprep.mubr.bf16.mxu0 %v6983_v48  ;;  %v7103_v48 = vcombine.high %v1648_v42, %v1656_v43 }
 0x1f8   :  { %4737 = vmatmul.mubr.bf16.gmra.mrb[88].mxu1 %v6974_v53  ;;  %v1676_v53 = vld [vmem:[%s11732_s2 + $0xfe8] sm:$0xff] }
 0x1f9   :  { %4744 = vmatprep.mubr.bf16.mxu1 %v6991_v40  ;;  %v7110_v40 = vcombine.low %v1652_v44, %v1660_v45  ;;  %v7127_v57 = vcombine.high %v1668_v49, %v1676_v53  ;;  %v7126_v2 = vcombine.low %v1668_v49, %v1676_v53  ;;  %v499_v44 = vld [vmem:[%s11731_s1 + $0x720] sm:$0xff]  ;;  %v500_v45 = vld [vmem:[%s11731_s1 + $0x728] sm:$0xff]  ;;  %v6641_v49 = vcombine.high %v10271_v34, %v10276_v36 }
 0x1fa   :  { %5893 = vmatmul.mubr.bf16.gmra.mrb[88].mxu0 %v6982_v54  ;;  %v7102_v54 = vcombine.low %v1648_v42, %v1656_v43  ;;  %v244_v43 = vld [vmem:[%s11730_s0 + $0x728] sm:$0xff]  ;;  %v627_v53 = vadd.f32 %v371_v26, %v115_v25 }
 0x1fb   :  { %5900 = vmatprep.mubr.bf16.mxu0 %v6999_v50  ;;  %v7119_v50 = vcombine.high %v1664_v52, %v1672_v56 }
 0x200   :  { %4745 = vmatmul.mubr.bf16.gmra.mrb[92].mxu1 %v6990_v59  ;;  %v112_v59 = vld [vmem:[%s11730_s0 + $0x308] sm:$0xff] }
 0x201   :  { %4752 = vmatprep.mubr.bf16.mxu1 %v7007_v61  ;;  %v368_v61 = vld [vmem:[%s11731_s1 + $0x308] sm:$0xff] }
 0x202   :  { %5901 = vmatmul.mubr.bf16.gmra.mrb[92].mxu0 %v6998_v60  ;;  %v367_v60 = vld [vmem:[%s11731_s1 + $0x300] sm:$0xff] }
 0x203   :  { %5908 = vmatprep.mubr.bf16.mxu0 %v7015_v62  ;;  %v10221_v62 = vld [vmem:[%s11732_s2 + $0x30] sm:$0xff] }
 0x208   :  { %4753 = vmatmul.mubr.bf16.gmra.mrb[96].mxu1 %v7006_v10  ;;  %v496_v10 = vld [vmem:[%s11731_s1 + $0x708] sm:$0xff] }
 0x209   :  { %4760 = vmatprep.mubr.bf16.mxu1 %v7023_v5  ;;  %v623_v5 = vadd.f32 %v367_v60, %v111_v58  ;;  %v752_v19 = vadd.f32 %v496_v10, %v240_v7  ;;  %v10340_v58 = vld [vmem:[%s11732_s2 + $0x150] sm:$0xff]  ;;  %v756_v60 = vadd.f32 %v500_v45, %v244_v43  ;;  %v119_v7 = vld [vmem:[%s11730_s0 + $0x340] sm:$0xff] }
 0x20a   :  { %5909 = vmatmul.mubr.bf16.gmra.mrb[96].mxu0 %v7014_v16  ;;  %v7118_v16 = vcombine.low %v1664_v52, %v1672_v56  ;;  %v117_v52 = vld [vmem:[%s11730_s0 + $0x330] sm:$0xff] }
 0x20b   :  { %5916 = vmatprep.mubr.bf16.mxu0 %v7031_v11  ;;  %v624_v11 = vadd.f32 %v368_v61, %v112_v59  ;;  %v245_v61 = vld [vmem:[%s11730_s0 + $0x730] sm:$0xff] }
 0x20c   :  { %v10418_v43 = vld [vmem:[%s11732_s2 + $0x190] sm:$0xff] }
 0x20d   :  { %v10428_v45 = vld [vmem:[%s11732_s2 + $0x1b0] sm:$0xff] }
 0x210   :  { %4761 = vmatmul.mubr.bf16.gmra.mrb[100].mxu1 %v7022_v3  ;;  %v369_v3 = vld [vmem:[%s11731_s1 + $0x310] sm:$0xff] }
 0x211   :  { %4768 = vmatprep.mubr.bf16.mxu1 %v7039_v6  ;;  %v241_v6 = vld [vmem:[%s11730_s0 + $0x710] sm:$0xff] }
 0x212   :  { %5917 = vmatmul.mubr.bf16.gmra.mrb[100].mxu0 %v7030_v9  ;;  %v370_v9 = vld [vmem:[%s11731_s1 + $0x318] sm:$0xff]  ;;  %v753_v30 = vadd.f32 %v497_v21, %v241_v6  ;;  %v503_v6 = vld [vmem:[%s11731_s1 + $0x740] sm:$0xff]  ;;  %v1012_v21 = vmax.f32 %v756_v60, 0.0  ;;  %v380_v60 = vld [vmem:[%s11731_s1 + $0x368] sm:$0xff] }
 0x213   :  { %5924 = vmatprep.mubr.bf16.mxu0 %v7047_v17  ;;  %v6633_v17 = vcombine.high %v10221_v62, %v10226_v63  ;;  %v626_v28 = vadd.f32 %v370_v9, %v114_v1  ;;  %v883_v1 = vmax.f32 %v627_v53, 0.0  ;;  %v248_v9 = vld [vmem:[%s11730_s0 + $0x748] sm:$0xff] }
 0x218   :  { %4769 = vmatmul.mubr.bf16.gmra.mrb[104].mxu1 %v7038_v22  ;;  %v498_v22 = vld [vmem:[%s11731_s1 + $0x718] sm:$0xff] }
 0x219   :  { %4776 = vmatprep.mubr.bf16.mxu1 %v7055_v27  ;;  %v880_v27 = vmax.f32 %v624_v11, 0.0  ;;  %v376_v11 = vld [vmem:[%s11731_s1 + $0x348] sm:$0xff] }
 0x21a   :  { %5925 = vmatmul.mubr.bf16.gmra.mrb[104].mxu0 %v7046_v23  ;;  %v879_v23 = vmax.f32 %v623_v5, 0.0  ;;  %v375_v5 = vld [vmem:[%s11731_s1 + $0x340] sm:$0xff] }
 0x21b   :  { %5932 = vmatprep.mubr.bf16.mxu0 %v7063_v29  ;;  %v625_v29 = vadd.f32 %v369_v3, %v113_v12  ;;  %v247_v12 = vld [vmem:[%s11730_s0 + $0x740] sm:$0xff] }
 0x21c   :  { %v1087_v42 = vpack.c.bf16 %v880_v27, %v879_v23  ;;  %v6640_v27 = vcombine.low %v10271_v34, %v10276_v36 }
 0x220   :  { %4777 = vmatmul.mubr.bf16.gmra.mrb[108].mxu1 %v7054_v31  ;;  %v754_v31 = vadd.f32 %v498_v22, %v242_v20 }
 0x221   :  { %4784 = vmatprep.mubr.bf16.mxu1 %v7071_v15  ;;  %v1008_v15 = vmax.f32 %v752_v19, 0.0  ;;  %v10386_v19 = vld [vmem:[%s11732_s2 + $0x170] sm:$0xff] }
 0x222   :  { %5933 = vmatmul.mubr.bf16.gmra.mrb[108].mxu0 %v7062_v32  ;;  %v1007_v32 = vmax.f32 %v751_v14, 0.0  ;;  %v10381_v14 = vld [vmem:[%s11732_s2 + $0x130] sm:$0xff] }
 0x223   :  { %5940 = vmatprep.mubr.bf16.mxu0 %v7079_v18  ;;  %v10281_v18 = vld [vmem:[%s11732_s2 + $0xb0] sm:$0xff]  ;;  %v6665_v25 = vcombine.high %v10381_v14, %v10386_v19 }
 0x224   :  { %v1151_v56 = vpack.c.bf16 %v1008_v15, %v1007_v32  ;;  %v759_v32 = vadd.f32 %v503_v6, %v247_v12  ;;  %v126_v12 = vld [vmem:[%s11730_s0 + $0x378] sm:$0xff] }
 0x228   :  { %4785 = vmatmul.mubr.bf16.gmra.mrb[112].mxu1 %v7070_v35  ;;  %v372_v35 = vld [vmem:[%s11731_s1 + $0x328] sm:$0xff] }
 0x229   :  { %4792 = vmatprep.mubr.bf16.mxu1 %v7087_v38  ;;  %v6624_v38 = vcombine.low %v10199_v41, %v10204_v55  ;;  %v6649_v41 = vcombine.high %v10281_v18, %v10286_v24  ;;  %v10335_v55 = vld [vmem:[%s11732_s2 + $0x110] sm:$0xff] }
 0x22a   :  { %5941 = vmatmul.mubr.bf16.gmra.mrb[112].mxu0 %v7078_v37  ;;  %v243_v37 = vld [vmem:[%s11730_s0 + $0x720] sm:$0xff] }
 0x22b   :  { %5948 = vmatprep.mubr.bf16.mxu0 %v7095_v39  ;;  %v6632_v39 = vcombine.low %v10221_v62, %v10226_v63  ;;  %v755_v59 = vadd.f32 %v499_v44, %v243_v37  ;;  %v246_v62 = vld [vmem:[%s11730_s0 + $0x738] sm:$0xff]  ;;  %v501_v63 = vld [vmem:[%s11731_s1 + $0x730] sm:$0xff] }
 0x22c   :  { %v757_v22 = vadd.f32 %v501_v63, %v245_v61  ;;  %v758_v23 = vadd.f32 %v502_v4, %v246_v62  ;;  %v10423_v44 = vld [vmem:[%s11732_s2 + $0x1d0] sm:$0xff]  ;;  %v251_v4 = vld [vmem:[%s11730_s0 + $0x760] sm:$0xff] }
 0x22d   :  { %v1011_v20 = vmax.f32 %v755_v59, 0.0  ;;  %v379_v59 = vld [vmem:[%s11731_s1 + $0x360] sm:$0xff] }
 0x22e   :  { %v1014_v37 = vmax.f32 %v758_v23, 0.0 }
 0x22f   :  { %v1153_v26 = vpack.c.bf16 %v1012_v21, %v1011_v20  ;;  %v254_v20 = vld [vmem:[%s11730_s0 + $0x778] sm:$0xff]  ;;  %v509_v21 = vld [vmem:[%s11731_s1 + $0x770] sm:$0xff] }
 0x230   :  { %4793 = vmatmul.mubr.bf16.gmra.mrb[116].mxu1 %v7086_v46  ;;  %v881_v46 = vmax.f32 %v625_v29, 0.0  ;;  %v6648_v29 = vcombine.low %v10281_v18, %v10286_v24  ;;  %v121_v18 = vld [vmem:[%s11730_s0 + $0x350] sm:$0xff]  ;;  %v122_v24 = vld [vmem:[%s11730_s0 + $0x358] sm:$0xff] }
 0x231   :  { %4800 = vmatprep.mubr.bf16.mxu1 %v7103_v48  ;;  %v1009_v48 = vmax.f32 %v753_v30, 0.0  ;;  %v631_v30 = vadd.f32 %v375_v5, %v119_v7  ;;  %v252_v7 = vld [vmem:[%s11730_s0 + $0x768] sm:$0xff] }
 0x232   :  { %5949 = vmatmul.mubr.bf16.gmra.mrb[116].mxu0 %v7094_v47  ;;  %v882_v47 = vmax.f32 %v626_v28, 0.0  ;;  %v6657_v28 = vcombine.high %v10335_v55, %v10340_v58  ;;  %v508_v5 = vld [vmem:[%s11731_s1 + $0x768] sm:$0xff] }
 0x233   :  { %5956 = vmatprep.mubr.bf16.mxu0 %v7111_v51  ;;  %v1010_v51 = vmax.f32 %v754_v31, 0.0  ;;  %v632_v31 = vadd.f32 %v376_v11, %v120_v8  ;;  %v507_v8 = vld [vmem:[%s11731_s1 + $0x760] sm:$0xff]  ;;  %v125_v11 = vld [vmem:[%s11730_s0 + $0x370] sm:$0xff] }
 0x234   :  { %v1088_v10 = vpack.c.bf16 %v882_v47, %v881_v46  ;;  %v250_v46 = vld [vmem:[%s11730_s0 + $0x758] sm:$0xff]  ;;  %v505_v47 = vld [vmem:[%s11731_s1 + $0x750] sm:$0xff] }
 0x238   :  { %4801 = vmatmul.mubr.bf16.gmra.mrb[120].mxu1 %v7102_v54  ;;  %v628_v54 = vadd.f32 %v372_v35, %v116_v33  ;;  %v1013_v35 = vmax.f32 %v757_v22, 0.0  ;;  %v510_v22 = vld [vmem:[%s11731_s1 + $0x778] sm:$0xff] }
 0x239   :  { %4808 = vmatprep.mubr.bf16.mxu1 %v7119_v50  ;;  %v373_v50 = vld [vmem:[%s11731_s1 + $0x330] sm:$0xff] }
 0x23a   :  { %5957 = vmatmul.mubr.bf16.gmra.mrb[120].mxu0 %v7110_v40  ;;  %v118_v40 = vld [vmem:[%s11730_s0 + $0x338] sm:$0xff]  ;;  %v1154_v61 = vpack.c.bf16 %v1014_v37, %v1013_v35  ;;  %v127_v35 = vld [vmem:[%s11730_s0 + $0x380] sm:$0xff]  ;;  %v128_v37 = vld [vmem:[%s11730_s0 + $0x388] sm:$0xff] }
 0x23b   :  { %5964 = vmatprep.mubr.bf16.mxu0 %v7127_v57  ;;  %v374_v57 = vld [vmem:[%s11731_s1 + $0x338] sm:$0xff] }
 0x23c   :  { %v630_v3 = vadd.f32 %v374_v57, %v118_v40 }
 0x23e   :  { %v886_v33 = vmax.f32 %v630_v3, 0.0  ;;  %v382_v3 = vld [vmem:[%s11731_s1 + $0x378] sm:$0xff] }
 0x240   :  { %4809 = vmatmul.mubr.bf16.gmra.mrb[124].mxu1 %v7118_v16  ;;  %v1152_v16 = vpack.c.bf16 %v1010_v51, %v1009_v48  ;;  %v506_v48 = vld [vmem:[%s11731_s1 + $0x758] sm:$0xff]  ;;  %v10442_v51 = vld [vmem:[%s11732_s2 + $0x1f0] sm:$0xff] }
 0x241   :  { %4849 = vmatprep.mubr.bf16.mxu1 %v6625_v13  ;;  %v629_v13 = vadd.f32 %v373_v50, %v117_v52  ;;  %v887_v52 = vmax.f32 %v631_v30, 0.0  ;;  %v762_v63 = vadd.f32 %v506_v48, %v250_v46  ;;  %v383_v46 = vld [vmem:[%s11731_s1 + $0x380] sm:$0xff] }
 0x242   :  { %5965 = vmatmul.mubr.bf16.gmra.mrb[124].mxu0 %v7126_v2  ;;  %v884_v2 = vmax.f32 %v628_v54, 0.0  ;;  %v123_v54 = vld [vmem:[%s11730_s0 + $0x360] sm:$0xff] }
 0x243   :  { %6005 = vmatprep.mubr.bf16.mxu0 %v6633_v17  ;;  %v504_v17 = vld [vmem:[%s11731_s1 + $0x748] sm:$0xff]  ;;  %v885_v36 = vmax.f32 %v629_v13, 0.0  ;;  %v381_v13 = vld [vmem:[%s11731_s1 + $0x370] sm:$0xff]  ;;  %v255_v48 = vld [vmem:[%s11730_s0 + $0x780] sm:$0xff] }
 0x244   :  { %v760_v15 = vadd.f32 %v504_v17, %v248_v9  ;;  %v1089_v34 = vpack.c.bf16 %v884_v2, %v883_v1  ;;  %v253_v9 = vld [vmem:[%s11730_s0 + $0x770] sm:$0xff]  ;;  %v637_v30 = vadd.f32 %v381_v13, %v125_v11  ;;  %v514_v11 = vld [vmem:[%s11731_s1 + $0x798] sm:$0xff] }
 0x245   :  { %v1090_v40 = vpack.c.bf16 %v886_v33, %v885_v36  ;;  %v766_v36 = vadd.f32 %v510_v22, %v254_v20  ;;  %v10522_v33 = vld [vmem:[%s11732_s2 + $0x270] sm:$0xff] }
 0x246   :  { %v1016_v53 = vmax.f32 %v760_v15, 0.0  ;;  %v10517_v15 = vld [vmem:[%s11732_s2 + $0x230] sm:$0xff] }
 0x248   :  { %4850 = vmatmul.mubr.bf16.vlgmr.msra.gmra.mrb[0].mxu1 %v6624_v38  ;;  %v377_v38 = vld [vmem:[%s11731_s1 + $0x350] sm:$0xff] }
 0x249   :  { %5107 = vmatpush1.bf16.msra.mxu1 %v1087_v42  ;;  %4857 = vmatprep.mubr.bf16.mxu1 %v6641_v49  ;;  %v249_v42 = vld [vmem:[%s11730_s0 + $0x750] sm:$0xff]  ;;  %v1015_v49 = vmax.f32 %v759_v32, 0.0  ;;  %v633_v50 = vadd.f32 %v377_v38, %v121_v18 }
 0x24a   :  { %6006 = vmatmul.mubr.bf16.vlgmr.msra.gmra.mrb[0].mxu0 %v6632_v39  ;;  %5108 = vmatprep.subr.bf16.mxu1 %v7965_v0  ;;  %v378_v39 = vld [vmem:[%s11731_s1 + $0x358] sm:$0xff]  ;;  %v761_v62 = vadd.f32 %v505_v47, %v249_v42  ;;  %v10512_v32 = vld [vmem:[%s11732_s2 + $0x250] sm:$0xff]  ;;  %v384_v47 = vld [vmem:[%s11731_s1 + $0x388] sm:$0xff] }
 0x24b   :  { %6263 = vmatpush1.bf16.msra.mxu0 %v1151_v56  ;;  %6013 = vmatprep.mubr.bf16.mxu0 %v6649_v41  ;;  %v888_v56 = vmax.f32 %v632_v31, 0.0  ;;  %v634_v57 = vadd.f32 %v378_v39, %v122_v24  ;;  %v124_v41 = vld [vmem:[%s11730_s0 + $0x368] sm:$0xff]  ;;  %v1155_v2 = vpack.c.bf16 %v1016_v53, %v1015_v49  ;;  %v889_v6 = vmax.f32 %v633_v50, 0.0  ;;  %v10507_v31 = vld [vmem:[%s11732_s2 + $0x210] sm:$0xff] }
 0x24c   :  { %6264 = vmatprep.subr.bf16.mxu0 %v7965_v0  ;;  %v1017_v23 = vmax.f32 %v761_v62, 0.0  ;;  %v6689_v49 = vcombine.high %v10507_v31, %v10512_v32  ;;  %v256_v53 = vld [vmem:[%s11730_s0 + $0x788] sm:$0xff]  ;;  %v6697_v50 = vcombine.high %v10517_v15, %v10522_v33  ;;  %v6688_v22 = vcombine.low %v10507_v31, %v10512_v32 }
 0x24d   :  { %5109 = vmatpush1.bf16.msra.mxu1 %v1088_v10  ;;  %v6656_v10 = vcombine.low %v10335_v55, %v10340_v58  ;;  %v6673_v55 = vcombine.high %v10418_v43, %v10423_v44  ;;  %v6681_v58 = vcombine.high %v10428_v45, %v10442_v51  ;;  %v1091_v1 = vpack.c.bf16 %v888_v56, %v887_v52 }
 0x24e   :  { %5110 = vmatprep.subr.bf16.mxu1 %v7965_v0  ;;  %v890_v17 = vmax.f32 %v634_v57, 0.0  ;;  %v6672_v52 = vcombine.low %v10418_v43, %v10423_v44  ;;  %v6680_v56 = vcombine.low %v10428_v45, %v10442_v51  ;;  %v512_v43 = vld [vmem:[%s11731_s1 + $0x788] sm:$0xff]  ;;  %v893_v44 = vmax.f32 %v637_v30, 0.0 }
 0x24f   :  { %6265 = vmatpush1.bf16.msra.mxu0 %v1152_v16  ;;  %v6664_v16 = vcombine.low %v10381_v14, %v10386_v19  ;;  %v635_v14 = vadd.f32 %v379_v59, %v123_v54  ;;  %v636_v19 = vadd.f32 %v380_v60, %v124_v41  ;;  %v511_v54 = vld [vmem:[%s11731_s1 + $0x780] sm:$0xff]  ;;  %v1022_v51 = vmax.f32 %v766_v36, 0.0  ;;  %v129_v60 = vld [vmem:[%s11730_s0 + $0x390] sm:$0xff] }
 0x250   :  { %6266 = vmatprep.subr.bf16.mxu0 %v7965_v0  ;;  %4858 = vmatmul.mubr.bf16.gmra.mrb[4].mxu1 %v6640_v27  ;;  %v1018_v27 = vmax.f32 %v762_v63, 0.0  ;;  %v1092_v18 = vpack.c.bf16 %v890_v17, %v889_v6  ;;  %v639_v41 = vadd.f32 %v383_v46, %v127_v35  ;;  %v640_v59 = vadd.f32 %v384_v47, %v128_v37  ;;  %v10597_v6 = vld [vmem:[%s11732_s2 + $0x2b0] sm:$0xff]  ;;  %v388_v37 = vld [vmem:[%s11731_s1 + $0x3a8] sm:$0xff] }
 0x251   :  { %4865 = vmatprep.mubr.bf16.mxu1 %v6657_v28  ;;  %5111 = vmatpush1.bf16.msra.mxu1 %v1089_v34  ;;  %v764_v28 = vadd.f32 %v508_v5, %v252_v7  ;;  %v765_v34 = vadd.f32 %v509_v21, %v253_v9  ;;  %v891_v24 = vmax.f32 %v635_v14, 0.0  ;;  %v767_v63 = vadd.f32 %v511_v54, %v255_v48  ;;  %v385_v7 = vld [vmem:[%s11731_s1 + $0x390] sm:$0xff] }
 0x252   :  { %6014 = vmatmul.mubr.bf16.gmra.mrb[4].mxu0 %v6648_v29  ;;  %5112 = vmatprep.subr.bf16.mxu1 %v7965_v0  ;;  %v763_v29 = vadd.f32 %v507_v8, %v251_v4  ;;  %v1156_v38 = vpack.c.bf16 %v1018_v27, %v1017_v23  ;;  %v768_v4 = vadd.f32 %v512_v43, %v256_v53  ;;  %v386_v8 = vld [vmem:[%s11731_s1 + $0x398] sm:$0xff]  ;;  %v513_v5 = vld [vmem:[%s11731_s1 + $0x790] sm:$0xff]  ;;  %v896_v13 = vmax.f32 %v640_v59, 0.0 }
 0x253   :  { %6021 = vmatprep.mubr.bf16.mxu0 %v6665_v25  ;;  %6267 = vmatpush1.bf16.msra.mxu0 %v1153_v26  ;;  %v638_v25 = vadd.f32 %v382_v3, %v126_v12  ;;  %v892_v26 = vmax.f32 %v636_v19, 0.0  ;;  %v1020_v42 = vmax.f32 %v764_v28, 0.0  ;;  %v1021_v45 = vmax.f32 %v765_v34, 0.0  ;;  %v10602_v17 = vld [vmem:[%s11732_s2 + $0x2f0] sm:$0xff] }
 0x254   :  { %6268 = vmatprep.subr.bf16.mxu0 %v7965_v0  ;;  %v1019_v39 = vmax.f32 %v763_v29, 0.0  ;;  %v641_v3 = vadd.f32 %v385_v7, %v129_v60  ;;  %v1023_v14 = vmax.f32 %v767_v63, 0.0  ;;  %v1024_v19 = vmax.f32 %v768_v4, 0.0  ;;  %v1273_v36 = vld [vmem:[%s11732_s2 + $0x350] sm:$0xff] }
 0x255   :  { %5113 = vmatpush1.bf16.msra.mxu1 %v1090_v40  ;;  %v894_v40 = vmax.f32 %v638_v25, 0.0  ;;  %v1093_v57 = vpack.c.bf16 %v892_v26, %v891_v24  ;;  %v6696_v23 = vcombine.low %v10517_v15, %v10522_v33  ;;  %v6713_v29 = vcombine.high %v10597_v6, %v10602_v17  ;;  %v1265_v15 = vld [vmem:[%s11732_s2 + $0x310] sm:$0xff]  ;;  %v132_v24 = vld [vmem:[%s11730_s0 + $0x3a8] sm:$0xff]  ;;  %v387_v26 = vld [vmem:[%s11731_s1 + $0x3a0] sm:$0xff] }
 0x256   :  { %5114 = vmatprep.subr.bf16.mxu1 %v7965_v0  ;;  %v1157_v62 = vpack.c.bf16 %v1020_v42, %v1019_v39  ;;  %v897_v30 = vmax.f32 %v641_v3, 0.0  ;;  %v1159_v34 = vpack.c.bf16 %v1024_v19, %v1023_v14  ;;  %v1269_v33 = vld [vmem:[%s11732_s2 + $0x330] sm:$0xff]  ;;  %v259_v39 = vld [vmem:[%s11730_s0 + $0x7a0] sm:$0xff]  ;;  %v260_v42 = vld [vmem:[%s11730_s0 + $0x7a8] sm:$0xff]  ;;  %v644_v48 = vadd.f32 %v388_v37, %v132_v24 }
 0x257   :  { %6269 = vmatpush1.bf16.msra.mxu0 %v1154_v61  ;;  %v130_v61 = vld [vmem:[%s11730_s0 + $0x398] sm:$0xff]  ;;  %v1094_v12 = vpack.c.bf16 %v894_v40, %v893_v44  ;;  %v1277_v46 = vld [vmem:[%s11732_s2 + $0x370] sm:$0xff]  ;;  %v6712_v44 = vcombine.low %v10597_v6, %v10602_v17  ;;  %v6721_v40 = vcombine.high %v1265_v15, %v1273_v36  ;;  %v6720_v4 = vcombine.low %v1265_v15, %v1273_v36 }
 0x258   :  { %4866 = vmatmul.mubr.bf16.gmra.mrb[8].mxu1 %v6656_v10  ;;  %6270 = vmatprep.subr.bf16.mxu0 %v7965_v0  ;;  %v257_v10 = vld [vmem:[%s11730_s0 + $0x790] sm:$0xff]  ;;  %v642_v9 = vadd.f32 %v386_v8, %v130_v61  ;;  %v6728_v7 = vcombine.low %v1269_v33, %v1277_v46  ;;  %v262_v3 = vld [vmem:[%s11730_s0 + $0x7b8] sm:$0xff] }
 0x259   :  { %4873 = vmatprep.mubr.bf16.mxu1 %v6673_v55  ;;  %5115 = vmatpush1.bf16.msra.mxu1 %v1091_v1  ;;  %v1158_v55 = vpack.c.bf16 %v1022_v51, %v1021_v45  ;;  %v10592_v1 = vld [vmem:[%s11732_s2 + $0x2d0] sm:$0xff]  ;;  %v769_v20 = vadd.f32 %v513_v5, %v257_v10  ;;  %v900_v45 = vmax.f32 %v644_v48, 0.0  ;;  %v6729_v51 = vcombine.high %v1269_v33, %v1277_v46  ;;  %v518_v14 = vld [vmem:[%s11731_s1 + $0x7b8] sm:$0xff]  ;;  %v136_v46 = vld [vmem:[%s11730_s0 + $0x3c8] sm:$0xff] }
 0x25a   :  { %6022 = vmatmul.mubr.bf16.gmra.mrb[8].mxu0 %v6664_v16  ;;  %5116 = vmatprep.subr.bf16.mxu1 %v7965_v0  ;;  %v258_v16 = vld [vmem:[%s11730_s0 + $0x798] sm:$0xff]  ;;  %v898_v25 = vmax.f32 %v642_v9, 0.0  ;;  %v1281_v60 = vld [vmem:[%s11732_s2 + $0x390] sm:$0xff]  ;;  %v392_v48 = vld [vmem:[%s11731_s1 + $0x3c8] sm:$0xff] }
 0x25b   :  { %6029 = vmatprep.mubr.bf16.mxu0 %v6681_v58  ;;  %6271 = vmatpush1.bf16.msra.mxu0 %v1155_v2  ;;  %v10587_v58 = vld [vmem:[%s11732_s2 + $0x290] sm:$0xff]  ;;  %v895_v2 = vmax.f32 %v639_v41, 0.0  ;;  %v770_v21 = vadd.f32 %v514_v11, %v258_v16  ;;  %v1025_v31 = vmax.f32 %v769_v20, 0.0 }
 0x25c   :  { %6272 = vmatprep.subr.bf16.mxu0 %v7965_v0  ;;  %v6705_v27 = vcombine.high %v10587_v58, %v10592_v1  ;;  %v1096_v35 = vpack.c.bf16 %v898_v25, %v897_v30  ;;  %v1289_v61 = vld [vmem:[%s11732_s2 + $0x3d0] sm:$0xff] }
 0x25d   :  { %5117 = vmatpush1.bf16.msra.mxu1 %v1092_v18  ;;  %v1095_v28 = vpack.c.bf16 %v896_v13, %v895_v2  ;;  %v1026_v32 = vmax.f32 %v770_v21, 0.0  ;;  %v131_v18 = vld [vmem:[%s11730_s0 + $0x3a0] sm:$0xff]  ;;  %v1293_v63 = vld [vmem:[%s11732_s2 + $0x3f0] sm:$0xff]  ;;  %v6737_v8 = vcombine.high %v1281_v60, %v1289_v61  ;;  %v6736_v19 = vcombine.low %v1281_v60, %v1289_v61 }
 0x25e   :  { %5118 = vmatprep.subr.bf16.mxu1 %v7965_v0  ;;  %v1297_v16 = vld [vmem:[%s11732_s2 + $0x410] sm:$0xff] }
 0x25f   :  { %6273 = vmatpush1.bf16.msra.mxu0 %v1156_v38  ;;  %v643_v38 = vadd.f32 %v387_v26, %v131_v18  ;;  %v1160_v47 = vpack.c.bf16 %v1026_v32, %v1025_v31  ;;  %v1305_v5 = vld [vmem:[%s11732_s2 + $0x450] sm:$0xff] }
 0x260   :  { %4874 = vmatmul.mubr.bf16.gmra.mrb[12].mxu1 %v6672_v52  ;;  %6274 = vmatprep.subr.bf16.mxu0 %v7965_v0  ;;  %v515_v52 = vld [vmem:[%s11731_s1 + $0x7a0] sm:$0xff]  ;;  %v1301_v11 = vld [vmem:[%s11732_s2 + $0x430] sm:$0xff]  ;;  %v6752_v18 = vcombine.low %v1297_v16, %v1305_v5 }
 0x261   :  { %4881 = vmatprep.mubr.bf16.mxu1 %v6689_v49  ;;  %5119 = vmatpush1.bf16.msra.mxu1 %v1093_v57  ;;  %v6704_v49 = vcombine.low %v10587_v58, %v10592_v1  ;;  %v899_v53 = vmax.f32 %v643_v38, 0.0  ;;  %v771_v54 = vadd.f32 %v515_v52, %v259_v39  ;;  %v389_v58 = vld [vmem:[%s11731_s1 + $0x3b0] sm:$0xff]  ;;  %v390_v1 = vld [vmem:[%s11731_s1 + $0x3b8] sm:$0xff] }
 0x262   :  { %6030 = vmatmul.mubr.bf16.gmra.mrb[12].mxu0 %v6680_v56  ;;  %5120 = vmatprep.subr.bf16.mxu1 %v7965_v0  ;;  %v516_v56 = vld [vmem:[%s11731_s1 + $0x7a8] sm:$0xff]  ;;  %v261_v13 = vld [vmem:[%s11730_s0 + $0x7b0] sm:$0xff] }
 0x263   :  { %6037 = vmatprep.mubr.bf16.mxu0 %v6697_v50  ;;  %6275 = vmatpush1.bf16.msra.mxu0 %v1157_v62  ;;  %v772_v43 = vadd.f32 %v516_v56, %v260_v42  ;;  %v1027_v50 = vmax.f32 %v771_v54, 0.0  ;;  %v1097_v41 = vpack.c.bf16 %v900_v45, %v899_v53  ;;  %v1285_v62 = vld [vmem:[%s11732_s2 + $0x3b0] sm:$0xff]  ;;  %v135_v42 = vld [vmem:[%s11730_s0 + $0x3c0] sm:$0xff]  ;;  %v648_v54 = vadd.f32 %v392_v48, %v136_v46 }
 0x264   :  { %6276 = vmatprep.subr.bf16.mxu0 %v7965_v0  ;;  %v6745_v10 = vcombine.high %v1285_v62, %v1293_v63  ;;  %v1309_v9 = vld [vmem:[%s11732_s2 + $0x470] sm:$0xff]  ;;  %v263_v56 = vld [vmem:[%s11730_s0 + $0x7c0] sm:$0xff] }
 0x265   :  { %5121 = vmatpush1.bf16.msra.mxu1 %v1094_v12  ;;  %v1028_v57 = vmax.f32 %v772_v43, 0.0  ;;  %v133_v12 = vld [vmem:[%s11730_s0 + $0x3b0] sm:$0xff]  ;;  %v6760_v24 = vcombine.low %v1301_v11, %v1309_v9  ;;  %v519_v43 = vld [vmem:[%s11731_s1 + $0x7c0] sm:$0xff] }
 0x266   :  { %5122 = vmatprep.subr.bf16.mxu1 %v7965_v0  ;;  %v645_v2 = vadd.f32 %v389_v58, %v133_v12  ;;  %v517_v17 = vld [vmem:[%s11731_s1 + $0x7b0] sm:$0xff] }
 0x267   :  { %6277 = vmatpush1.bf16.msra.mxu0 %v1158_v55  ;;  %v1161_v59 = vpack.c.bf16 %v1028_v57, %v1027_v50  ;;  %v134_v55 = vld [vmem:[%s11730_s0 + $0x3b8] sm:$0xff]  ;;  %v773_v21 = vadd.f32 %v517_v17, %v261_v13  ;;  %v1313_v32 = vld [vmem:[%s11732_s2 + $0x490] sm:$0xff] }
 0x268   :  { %4882 = vmatmul.mubr.bf16.gmra.mrb[16].mxu1 %v6688_v22  ;;  %6278 = vmatprep.subr.bf16.mxu0 %v7965_v0  ;;  %v646_v6 = vadd.f32 %v390_v1, %v134_v55  ;;  %v901_v20 = vmax.f32 %v645_v2, 0.0  ;;  %v774_v22 = vadd.f32 %v518_v14, %v262_v3  ;;  %v1321_v15 = vld [vmem:[%s11732_s2 + $0x4d0] sm:$0xff]  ;;  %v138_v3 = vld [vmem:[%s11730_s0 + $0x3d8] sm:$0xff] }
 0x269   :  { %4889 = vmatprep.mubr.bf16.mxu1 %v6705_v27  ;;  %5123 = vmatpush1.bf16.msra.mxu1 %v1095_v28  ;;  %v6753_v27 = vcombine.high %v1297_v16, %v1305_v5  ;;  %v6761_v28 = vcombine.high %v1301_v11, %v1309_v9  ;;  %v1029_v30 = vmax.f32 %v773_v21, 0.0  ;;  %v1317_v36 = vld [vmem:[%s11732_s2 + $0x4b0] sm:$0xff]  ;;  %v6769_v26 = vcombine.high %v1313_v32, %v1321_v15 }
 0x26a   :  { %6038 = vmatmul.mubr.bf16.gmra.mrb[16].mxu0 %v6696_v23  ;;  %5124 = vmatprep.subr.bf16.mxu1 %v7965_v0  ;;  %v6744_v23 = vcombine.low %v1285_v62, %v1293_v63  ;;  %v1030_v25 = vmax.f32 %v774_v22, 0.0  ;;  %v1325_v33 = vld [vmem:[%s11732_s2 + $0x4f0] sm:$0xff] }
 0x26b   :  { %6045 = vmatprep.mubr.bf16.mxu0 %v6713_v29  ;;  %6279 = vmatpush1.bf16.msra.mxu0 %v1159_v34  ;;  %v902_v29 = vmax.f32 %v646_v6, 0.0  ;;  %v1329_v37 = vld [vmem:[%s11732_s2 + $0x510] sm:$0xff]  ;;  %v6776_v57 = vcombine.low %v1317_v36, %v1325_v33  ;;  %v394_v6 = vld [vmem:[%s11731_s1 + $0x3d8] sm:$0xff] }
 0x26c   :  { %6280 = vmatprep.subr.bf16.mxu0 %v7965_v0  ;;  %v1162_v31 = vpack.c.bf16 %v1030_v25, %v1029_v30  ;;  %v1337_v38 = vld [vmem:[%s11732_s2 + $0x550] sm:$0xff]  ;;  %v650_v21 = vadd.f32 %v394_v6, %v138_v3 }
 0x26d   :  { %5125 = vmatpush1.bf16.msra.mxu1 %v1096_v35  ;;  %v1098_v34 = vpack.c.bf16 %v902_v29, %v901_v20  ;;  %v6777_v35 = vcombine.high %v1317_v36, %v1325_v33  ;;  %v1333_v39 = vld [vmem:[%s11732_s2 + $0x530] sm:$0xff]  ;;  %v6784_v5 = vcombine.low %v1329_v37, %v1337_v38 }
 0x26e   :  { %5126 = vmatprep.subr.bf16.mxu1 %v7965_v0  ;;  %v1341_v53 = vld [vmem:[%s11732_s2 + $0x570] sm:$0xff] }
 0x26f   :  { %6281 = vmatpush1.bf16.msra.mxu0 %v1160_v47  ;;  %v391_v47 = vld [vmem:[%s11731_s1 + $0x3c0] sm:$0xff]  ;;  %v6793_v60 = vcombine.high %v1333_v39, %v1341_v53  ;;  %v1357_v16 = vld [vmem:[%s11732_s2 + $0x5f0] sm:$0xff]  ;;  %v6792_v11 = vcombine.low %v1333_v39, %v1341_v53 }
 0x270   :  { %4890 = vmatmul.mubr.bf16.gmra.mrb[20].mxu1 %v6704_v49  ;;  %6282 = vmatprep.subr.bf16.mxu0 %v7965_v0  ;;  %v647_v52 = vadd.f32 %v391_v47, %v135_v42  ;;  %v264_v49 = vld [vmem:[%s11730_s0 + $0x7c8] sm:$0xff]  ;;  %v1361_v58 = vld [vmem:[%s11732_s2 + $0x610] sm:$0xff]  ;;  %v395_v53 = vld [vmem:[%s11731_s1 + $0x3e0] sm:$0xff] }
 0x271   :  { %4897 = vmatprep.mubr.bf16.mxu1 %v6721_v40  ;;  %5127 = vmatpush1.bf16.msra.mxu1 %v1097_v41  ;;  %v6768_v40 = vcombine.low %v1313_v32, %v1321_v15  ;;  %v6785_v41 = vcombine.high %v1329_v37, %v1337_v38  ;;  %v1369_v1 = vld [vmem:[%s11732_s2 + $0x650] sm:$0xff] }
 0x272   :  { %6046 = vmatmul.mubr.bf16.gmra.mrb[20].mxu0 %v6712_v44  ;;  %5128 = vmatprep.subr.bf16.mxu1 %v7965_v0  ;;  %v520_v44 = vld [vmem:[%s11731_s1 + $0x7c8] sm:$0xff]  ;;  %v903_v45 = vmax.f32 %v647_v52, 0.0  ;;  %v1365_v2 = vld [vmem:[%s11732_s2 + $0x630] sm:$0xff]  ;;  %v6816_v38 = vcombine.low %v1361_v58, %v1369_v1 }
 0x273   :  { %6053 = vmatprep.mubr.bf16.mxu0 %v6729_v51  ;;  %6283 = vmatpush1.bf16.msra.mxu0 %v1161_v59  ;;  %v775_v51 = vadd.f32 %v519_v43, %v263_v56  ;;  %v776_v50 = vadd.f32 %v520_v44, %v264_v49  ;;  %v904_v59 = vmax.f32 %v648_v54, 0.0  ;;  %v137_v13 = vld [vmem:[%s11730_s0 + $0x3d0] sm:$0xff]  ;;  %v139_v56 = vld [vmem:[%s11730_s0 + $0x3e0] sm:$0xff]  ;;  %v140_v49 = vld [vmem:[%s11730_s0 + $0x3e8] sm:$0xff] }
 0x274   :  { %6284 = vmatprep.subr.bf16.mxu0 %v7965_v0  ;;  %v393_v9 = vld [vmem:[%s11731_s1 + $0x3d0] sm:$0xff]  ;;  %v396_v54 = vld [vmem:[%s11731_s1 + $0x3e8] sm:$0xff]  ;;  %v651_v43 = vadd.f32 %v395_v53, %v139_v56  ;;  %v267_v44 = vld [vmem:[%s11730_s0 + $0x7e0] sm:$0xff] }
 0x275   :  { %5129 = vmatpush1.bf16.msra.mxu1 %v1098_v34  ;;  %v1031_v61 = vmax.f32 %v775_v51, 0.0  ;;  %v1032_v62 = vmax.f32 %v776_v50, 0.0  ;;  %v1099_v63 = vpack.c.bf16 %v904_v59, %v903_v45  ;;  %v649_v17 = vadd.f32 %v393_v9, %v137_v13  ;;  %v265_v14 = vld [vmem:[%s11730_s0 + $0x7d0] sm:$0xff]  ;;  %v523_v50 = vld [vmem:[%s11731_s1 + $0x7e0] sm:$0xff] }
 0x276   :  { %5130 = vmatprep.subr.bf16.mxu1 %v7965_v0  ;;  %v1373_v20 = vld [vmem:[%s11732_s2 + $0x670] sm:$0xff]  ;;  %v6817_v34 = vcombine.high %v1361_v58, %v1369_v1  ;;  %v652_v51 = vadd.f32 %v396_v54, %v140_v49  ;;  %v907_v59 = vmax.f32 %v651_v43, 0.0 }
 0x277   :  { %6285 = vmatpush1.bf16.msra.mxu0 %v1162_v31  ;;  %v521_v22 = vld [vmem:[%s11731_s1 + $0x7d0] sm:$0xff]  ;;  %v905_v29 = vmax.f32 %v649_v17, 0.0  ;;  %v906_v31 = vmax.f32 %v650_v21, 0.0  ;;  %v6825_v32 = vcombine.high %v1365_v2, %v1373_v20  ;;  %v6824_v39 = vcombine.low %v1365_v2, %v1373_v20  ;;  %v398_v20 = vld [vmem:[%s11731_s1 + $0x3f8] sm:$0xff] }
 0x278   :  { %4898 = vmatmul.mubr.bf16.gmra.mrb[24].mxu1 %v6720_v4  ;;  %6286 = vmatprep.subr.bf16.mxu0 %v7965_v0  ;;  %v1163_v4 = vpack.c.bf16 %v1032_v62, %v1031_v61  ;;  %v1389_v37 = vld [vmem:[%s11732_s2 + $0x6f0] sm:$0xff] }
 0x279   :  { %4905 = vmatprep.mubr.bf16.mxu1 %v6737_v8  ;;  %v1353_v8 = vld [vmem:[%s11732_s2 + $0x5d0] sm:$0xff]  ;;  %5131 = vmatpush1.bf16.msra.mxu1 %v1099_v63  ;;  %v1100_v33 = vpack.c.bf16 %v906_v31, %v905_v29 }
 0x27a   :  { %6054 = vmatmul.mubr.bf16.gmra.mrb[24].mxu0 %v6728_v7  ;;  %v1345_v7 = vld [vmem:[%s11732_s2 + $0x590] sm:$0xff]  ;;  %5132 = vmatprep.subr.bf16.mxu1 %v7965_v0 }
 0x27b   :  { %6061 = vmatprep.mubr.bf16.mxu0 %v6745_v10  ;;  %v1349_v10 = vld [vmem:[%s11732_s2 + $0x5b0] sm:$0xff]  ;;  %6287 = vmatpush1.bf16.msra.mxu0 %v1163_v4  ;;  %v6801_v12 = vcombine.high %v1345_v7, %v1353_v8  ;;  %v908_v4 = vmax.f32 %v652_v51, 0.0 }
 0x27c   :  { %6288 = vmatprep.subr.bf16.mxu0 %v7965_v0  ;;  %v6809_v55 = vcombine.high %v1349_v10, %v1357_v16  ;;  %v6808_v25 = vcombine.low %v1349_v10, %v1357_v16  ;;  %v1393_v47 = vld [vmem:[%s11732_s2 + $0x710] sm:$0xff] }
 0x27d   :  { %5133 = vmatpush1.bf16.msra.mxu1 %v1100_v33  ;;  %v1401_v48 = vld [vmem:[%s11732_s2 + $0x750] sm:$0xff]  ;;  %v1101_v16 = vpack.c.bf16 %v908_v4, %v907_v59 }
 0x27e   :  { %5134 = vmatprep.subr.bf16.mxu1 %v7965_v0  ;;  %v1397_v52 = vld [vmem:[%s11732_s2 + $0x730] sm:$0xff]  ;;  %v6849_v63 = vcombine.high %v1393_v47, %v1401_v48  ;;  %v6848_v1 = vcombine.low %v1393_v47, %v1401_v48 }
 0x27f   :  { %v1405_v45 = vld [vmem:[%s11732_s2 + $0x770] sm:$0xff] }
 0x280   :  { %4906 = vmatmul.mubr.bf16.gmra.mrb[28].mxu1 %v6736_v19  ;;  %v266_v19 = vld [vmem:[%s11730_s0 + $0x7d8] sm:$0xff]  ;;  %v1421_v58 = vld [vmem:[%s11732_s2 + $0x7f0] sm:$0xff]  ;;  %v6856_v2 = vcombine.low %v1397_v52, %v1405_v45 }
 0x281   :  { %4913 = vmatprep.mubr.bf16.mxu1 %v6753_v27  ;;  %v6800_v27 = vcombine.low %v1345_v7, %v1353_v8  ;;  %v6857_v7 = vcombine.high %v1397_v52, %v1405_v45  ;;  %5135 = vmatpush1.bf16.msra.mxu1 %v1101_v16  ;;  %v1425_v9 = vld [vmem:[%s11732_s2 + $0x810] sm:$0xff] }
 0x282   :  { %6062 = vmatmul.mubr.bf16.gmra.mrb[28].mxu0 %v6744_v23  ;;  %v522_v23 = vld [vmem:[%s11731_s1 + $0x7d8] sm:$0xff]  ;;  %5136 = vmatprep.subr.bf16.mxu1 %v7965_v0  ;;  %v1433_v6 = vld [vmem:[%s11732_s2 + $0x850] sm:$0xff] }
 0x283   :  { %6069 = vmatprep.mubr.bf16.mxu0 %v6761_v28  ;;  %v777_v28 = vadd.f32 %v521_v22, %v265_v14  ;;  %v778_v30 = vadd.f32 %v522_v23, %v266_v19  ;;  %v1429_v17 = vld [vmem:[%s11732_s2 + $0x830] sm:$0xff]  ;;  %v142_v14 = vld [vmem:[%s11730_s0 + $0x3f8] sm:$0xff]  ;;  %v6880_v47 = vcombine.low %v1425_v9, %v1433_v6 }
 0x284   :  { %v397_v19 = vld [vmem:[%s11731_s1 + $0x3f0] sm:$0xff]  ;;  %v270_v23 = vld [vmem:[%s11730_s0 + $0x7f8] sm:$0xff]  ;;  %v654_v29 = vadd.f32 %v398_v20, %v142_v14 }
 0x285   :  { %v1033_v15 = vmax.f32 %v777_v28, 0.0  ;;  %v1034_v36 = vmax.f32 %v778_v30, 0.0  ;;  %v269_v22 = vld [vmem:[%s11730_s0 + $0x7f0] sm:$0xff]  ;;  %v526_v30 = vld [vmem:[%s11731_s1 + $0x7f8] sm:$0xff] }
 0x286   :  { %v525_v28 = vld [vmem:[%s11731_s1 + $0x7f0] sm:$0xff]  ;;  %v910_v33 = vmax.f32 %v654_v29, 0.0 }
 0x287   :  { %v781_v31 = vadd.f32 %v525_v28, %v269_v22  ;;  %v1457_v49 = vld [vmem:[%s11732_s2 + $0x910] sm:$0xff] }
 0x288   :  { %4914 = vmatmul.mubr.bf16.gmra.mrb[32].mxu1 %v6752_v18  ;;  %v1164_v18 = vpack.c.bf16 %v1034_v36, %v1033_v15  ;;  %v6881_v36 = vcombine.high %v1425_v9, %v1433_v6  ;;  %v1465_v53 = vld [vmem:[%s11732_s2 + $0x950] sm:$0xff] }
 0x289   :  { %4921 = vmatprep.mubr.bf16.mxu1 %v6769_v26  ;;  %v1385_v26 = vld [vmem:[%s11732_s2 + $0x6d0] sm:$0xff]  ;;  %v6913_v45 = vcombine.high %v1457_v49, %v1465_v53 }
 0x28a   :  { %6070 = vmatmul.mubr.bf16.gmra.mrb[32].mxu0 %v6760_v24  ;;  %v1377_v24 = vld [vmem:[%s11732_s2 + $0x690] sm:$0xff] }
 0x28b   :  { %6077 = vmatprep.mubr.bf16.mxu0 %v6777_v35  ;;  %v1381_v35 = vld [vmem:[%s11732_s2 + $0x6b0] sm:$0xff]  ;;  %6289 = vmatpush1.bf16.msra.mxu0 %v1164_v18  ;;  %v6833_v42 = vcombine.high %v1377_v24, %v1385_v26 }
 0x28c   :  { %6290 = vmatprep.subr.bf16.mxu0 %v7965_v0  ;;  %v6841_v46 = vcombine.high %v1381_v35, %v1389_v37  ;;  %v6840_v62 = vcombine.low %v1381_v35, %v1389_v37  ;;  %v1461_v54 = vld [vmem:[%s11732_s2 + $0x930] sm:$0xff] }
 0x28d   :  { %v1469_v43 = vld [vmem:[%s11732_s2 + $0x970] sm:$0xff] }
 0x28e   :  { %v6921_v51 = vcombine.high %v1461_v54, %v1469_v43  ;;  %v1485_v59 = vld [vmem:[%s11732_s2 + $0x9f0] sm:$0xff] }
 0x28f   :  { %v1489_v4 = vld [vmem:[%s11732_s2 + $0xa10] sm:$0xff] }
 0x290   :  { %4922 = vmatmul.mubr.bf16.gmra.mrb[36].mxu1 %v6768_v40  ;;  %v268_v40 = vld [vmem:[%s11730_s0 + $0x7e8] sm:$0xff]  ;;  %v1525_v14 = vld [vmem:[%s11732_s2 + $0xb30] sm:$0xff] }
 0x291   :  { %4929 = vmatprep.mubr.bf16.mxu1 %v6785_v41  ;;  %v6832_v41 = vcombine.low %v1377_v24, %v1385_v26  ;;  %v1037_v24 = vmax.f32 %v781_v31, 0.0  ;;  %v1545_v29 = vld [vmem:[%s11732_s2 + $0xbd0] sm:$0xff] }
 0x292   :  { %6078 = vmatmul.mubr.bf16.gmra.mrb[36].mxu0 %v6776_v57  ;;  %v524_v57 = vld [vmem:[%s11731_s1 + $0x7e8] sm:$0xff]  ;;  %v1541_v28 = vld [vmem:[%s11732_s2 + $0xbb0] sm:$0xff] }
 0x293   :  { %6085 = vmatprep.mubr.bf16.mxu0 %v6793_v60  ;;  %v779_v60 = vadd.f32 %v523_v50, %v267_v44  ;;  %v780_v61 = vadd.f32 %v524_v57, %v268_v40  ;;  %v1473_v50 = vld [vmem:[%s11732_s2 + $0x990] sm:$0xff] }
 0x294   :  { %v1481_v57 = vld [vmem:[%s11732_s2 + $0x9d0] sm:$0xff] }
 0x295   :  { %v1035_v8 = vmax.f32 %v779_v60, 0.0  ;;  %v1036_v10 = vmax.f32 %v780_v61, 0.0  ;;  %v6912_v60 = vcombine.low %v1457_v49, %v1465_v53  ;;  %v6920_v61 = vcombine.low %v1461_v54, %v1469_v43  ;;  %v1585_v49 = vld [vmem:[%s11732_s2 + $0xd10] sm:$0xff] }
 0x296   :  { %v6928_v16 = vcombine.low %v1473_v50, %v1481_v57  ;;  %v1593_v53 = vld [vmem:[%s11732_s2 + $0xd50] sm:$0xff] }
 0x297   :  { %v1589_v54 = vld [vmem:[%s11732_s2 + $0xd30] sm:$0xff] }
 0x298   :  { %4930 = vmatmul.mubr.bf16.gmra.mrb[40].mxu1 %v6784_v5  ;;  %v1165_v5 = vpack.c.bf16 %v1036_v10, %v1035_v8  ;;  %v1493_v8 = vld [vmem:[%s11732_s2 + $0xa30] sm:$0xff] }
 0x299   :  { %4937 = vmatprep.mubr.bf16.mxu1 %v6801_v12  ;;  %v1417_v12 = vld [vmem:[%s11732_s2 + $0x7d0] sm:$0xff] }
 0x29a   :  { %6086 = vmatmul.mubr.bf16.gmra.mrb[40].mxu0 %v6792_v11  ;;  %v1409_v11 = vld [vmem:[%s11732_s2 + $0x790] sm:$0xff] }
 0x29b   :  { %6093 = vmatprep.mubr.bf16.mxu0 %v6809_v55  ;;  %v1413_v55 = vld [vmem:[%s11732_s2 + $0x7b0] sm:$0xff]  ;;  %6291 = vmatpush1.bf16.msra.mxu0 %v1165_v5  ;;  %v6865_v13 = vcombine.high %v1409_v11, %v1417_v12 }
 0x29c   :  { %6292 = vmatprep.subr.bf16.mxu0 %v7965_v0  ;;  %v6873_v3 = vcombine.high %v1413_v55, %v1421_v58  ;;  %v141_v0 = vld [vmem:[%s11730_s0 + $0x3f0] sm:$0xff]  ;;  %v6872_v15 = vcombine.low %v1413_v55, %v1421_v58 }
 0x29d   :  { %v653_v21 = vadd.f32 %v397_v19, %v141_v0  ;;  %v1501_v10 = vld [vmem:[%s11732_s2 + $0xa70] sm:$0xff] }
 0x29e   :  { %v1505_v55 = vld [vmem:[%s11732_s2 + $0xa90] sm:$0xff] }
 0x29f   :  { %v1513_v58 = vld [vmem:[%s11732_s2 + $0xad0] sm:$0xff] }
 0x2a0   :  { %4938 = vmatmul.mubr.bf16.gmra.mrb[44].mxu1 %v6800_v27  ;;  %v1437_v27 = vld [vmem:[%s11732_s2 + $0x870] sm:$0xff]  ;;  %v6961_v9 = vcombine.high %v1505_v55, %v1513_v58  ;;  %v6960_v20 = vcombine.low %v1505_v55, %v1513_v58 }
 0x2a1   :  { %4945 = vmatprep.mubr.bf16.mxu1 %v6817_v34  ;;  %v909_v34 = vmax.f32 %v653_v21, 0.0  ;;  %v6889_v18 = vcombine.high %v1429_v17, %v1437_v27  ;;  %v6888_v48 = vcombine.low %v1429_v17, %v1437_v27  ;;  %v1521_v17 = vld [vmem:[%s11732_s2 + $0xb10] sm:$0xff] }
 0x2a2   :  { %6094 = vmatmul.mubr.bf16.gmra.mrb[44].mxu0 %v6808_v25  ;;  %v6864_v25 = vcombine.low %v1409_v11, %v1417_v12  ;;  %v6953_v12 = vcombine.high %v1493_v8, %v1501_v10  ;;  %v1529_v0 = vld [vmem:[%s11732_s2 + $0xb50] sm:$0xff] }
 0x2a3   :  { %6101 = vmatprep.mubr.bf16.mxu0 %v6825_v32  ;;  %v782_v32 = vadd.f32 %v526_v30, %v270_v23  ;;  %v1102_v35 = vpack.c.bf16 %v910_v33, %v909_v34  ;;  %v1533_v19 = vld [vmem:[%s11732_s2 + $0xb70] sm:$0xff]  ;;  %v6977_v22 = vcombine.high %v1521_v17, %v1529_v0 }
 0x2a4   :  { %v6985_v23 = vcombine.high %v1525_v14, %v1533_v19  ;;  %v1537_v27 = vld [vmem:[%s11732_s2 + $0xb90] sm:$0xff]  ;;  %v6984_v34 = vcombine.low %v1525_v14, %v1533_v19 }
 0x2a5   :  { %v1038_v26 = vmax.f32 %v782_v32, 0.0  ;;  %5137 = vmatpush1.bf16.msra.mxu1 %v1102_v35  ;;  %v1549_v30 = vld [vmem:[%s11732_s2 + $0xbf0] sm:$0xff]  ;;  %v6993_v31 = vcombine.high %v1537_v27, %v1545_v29 }
 0x2a6   :  { %v7001_v32 = vcombine.high %v1541_v28, %v1549_v30  ;;  %v1557_v33 = vld [vmem:[%s11732_s2 + $0xc30] sm:$0xff] }
 0x2a7   :  { %v1166_v37 = vpack.c.bf16 %v1038_v26, %v1037_v24  ;;  %v6992_v24 = vcombine.low %v1537_v27, %v1545_v29  ;;  %v7000_v26 = vcombine.low %v1541_v28, %v1549_v30  ;;  %v1597_v43 = vld [vmem:[%s11732_s2 + $0xd70] sm:$0xff] }
 0x2a8   :  { %4946 = vmatmul.mubr.bf16.gmra.mrb[48].mxu1 %v6816_v38  ;;  %v1441_v38 = vld [vmem:[%s11732_s2 + $0x890] sm:$0xff] }
 0x2a9   :  { %4953 = vmatprep.mubr.bf16.mxu1 %v6833_v42  ;;  %v1445_v42 = vld [vmem:[%s11732_s2 + $0x8b0] sm:$0xff]  ;;  %6293 = vmatpush1.bf16.msra.mxu0 %v1166_v37 }
 0x2aa   :  { %6102 = vmatmul.mubr.bf16.gmra.mrb[48].mxu0 %v6824_v39  ;;  %v1449_v39 = vld [vmem:[%s11732_s2 + $0x8d0] sm:$0xff] }
 0x2ab   :  { %6109 = vmatprep.mubr.bf16.mxu0 %v6841_v46  ;;  %v1453_v46 = vld [vmem:[%s11732_s2 + $0x8f0] sm:$0xff]  ;;  %v6897_v52 = vcombine.high %v1441_v38, %v1449_v39  ;;  %v6896_v44 = vcombine.low %v1441_v38, %v1449_v39 }
 0x2ac   :  { %v6905_v56 = vcombine.high %v1445_v42, %v1453_v46  ;;  %v6904_v40 = vcombine.low %v1445_v42, %v1453_v46  ;;  %v1569_v38 = vld [vmem:[%s11732_s2 + $0xc90] sm:$0xff] }
 0x2ad   :  { %v1577_v39 = vld [vmem:[%s11732_s2 + $0xcd0] sm:$0xff] }
 0x2ae   :  { %v1573_v42 = vld [vmem:[%s11732_s2 + $0xcb0] sm:$0xff] }
 0x2af   :  { %v1581_v46 = vld [vmem:[%s11732_s2 + $0xcf0] sm:$0xff] }
 0x2b0   :  { %4954 = vmatmul.mubr.bf16.gmra.mrb[52].mxu1 %v6832_v41  ;;  %v1477_v41 = vld [vmem:[%s11732_s2 + $0x9b0] sm:$0xff] }
 0x2b1   :  { %4961 = vmatprep.mubr.bf16.mxu1 %v6849_v63  ;;  %v6937_v63 = vcombine.high %v1477_v41, %v1485_v59  ;;  %v6936_v5 = vcombine.low %v1477_v41, %v1485_v59  ;;  %v1605_v41 = vld [vmem:[%s11732_s2 + $0xdb0] sm:$0xff] }
 0x2b2   :  { %6110 = vmatmul.mubr.bf16.gmra.mrb[52].mxu0 %v6840_v62  ;;  %v6929_v62 = vcombine.high %v1473_v50, %v1481_v57  ;;  %v1601_v50 = vld [vmem:[%s11732_s2 + $0xd90] sm:$0xff] }
 0x2b3   :  { %6117 = vmatprep.mubr.bf16.mxu0 %v6857_v7  ;;  %v1497_v7 = vld [vmem:[%s11732_s2 + $0xa50] sm:$0xff] }
 0x2b4   :  { %v6945_v11 = vcombine.high %v1489_v4, %v1497_v7  ;;  %v1609_v57 = vld [vmem:[%s11732_s2 + $0xdd0] sm:$0xff] }
 0x2b5   :  { %v1613_v59 = vld [vmem:[%s11732_s2 + $0xdf0] sm:$0xff] }
 0x2b6   :  { %v1633_v55 = vld [vmem:[%s11732_s2 + $0xe90] sm:$0xff] }
 0x2b7   :  { %v1641_v58 = vld [vmem:[%s11732_s2 + $0xed0] sm:$0xff] }
 0x2b8   :  { %4962 = vmatmul.mubr.bf16.gmra.mrb[56].mxu1 %v6848_v1  ;;  %v1509_v1 = vld [vmem:[%s11732_s2 + $0xab0] sm:$0xff] }
 0x2b9   :  { %4969 = vmatprep.mubr.bf16.mxu1 %v6865_v13  ;;  %v6944_v13 = vcombine.low %v1489_v4, %v1497_v7  ;;  %v1617_v4 = vld [vmem:[%s11732_s2 + $0xe10] sm:$0xff] }
 0x2ba   :  { %6118 = vmatmul.mubr.bf16.gmra.mrb[56].mxu0 %v6856_v2  ;;  %v1517_v2 = vld [vmem:[%s11732_s2 + $0xaf0] sm:$0xff] }
 0x2bb   :  { %6125 = vmatprep.mubr.bf16.mxu0 %v6873_v3  ;;  %v6952_v3 = vcombine.low %v1493_v8, %v1501_v10  ;;  %v6969_v6 = vcombine.high %v1509_v1, %v1517_v2  ;;  %v6968_v21 = vcombine.low %v1509_v1, %v1517_v2  ;;  %v1625_v7 = vld [vmem:[%s11732_s2 + $0xe50] sm:$0xff] }
 0x2bc   :  { %v1621_v8 = vld [vmem:[%s11732_s2 + $0xe30] sm:$0xff] }
 0x2bd   :  { %v1629_v10 = vld [vmem:[%s11732_s2 + $0xe70] sm:$0xff] }
 0x2be   :  { %v1637_v1 = vld [vmem:[%s11732_s2 + $0xeb0] sm:$0xff] }
 0x2bf   :  { %v1645_v2 = vld [vmem:[%s11732_s2 + $0xef0] sm:$0xff] }
 0x2c0   :  { %4970 = vmatmul.mubr.bf16.gmra.mrb[60].mxu1 %v6864_v25  ;;  %v6976_v25 = vcombine.low %v1521_v17, %v1529_v0  ;;  %v1649_v17 = vld [vmem:[%s11732_s2 + $0xf10] sm:$0xff] }
 0x2c1   :  { %4977 = vmatprep.mubr.bf16.mxu1 %v6881_v36  ;;  %v1561_v36 = vld [vmem:[%s11732_s2 + $0xc50] sm:$0xff] }
 0x2c2   :  { %6126 = vmatmul.mubr.bf16.gmra.mrb[60].mxu0 %v6872_v15  ;;  %v1553_v15 = vld [vmem:[%s11732_s2 + $0xc10] sm:$0xff] }
 0x2c3   :  { %6133 = vmatprep.mubr.bf16.mxu0 %v6889_v18  ;;  %v1565_v18 = vld [vmem:[%s11732_s2 + $0xc70] sm:$0xff]  ;;  %v7009_v35 = vcombine.high %v1553_v15, %v1561_v36 }
 0x2c4   :  { %v7017_v37 = vcombine.high %v1557_v33, %v1565_v18  ;;  %v1657_v0 = vld [vmem:[%s11732_s2 + $0xf50] sm:$0xff] }
 0x2c5   :  { %v1653_v14 = vld [vmem:[%s11732_s2 + $0xf30] sm:$0xff] }
 0x2c6   :  { %v1661_v19 = vld [vmem:[%s11732_s2 + $0xf70] sm:$0xff] }
 0x2c7   :  { %v1665_v27 = vld [vmem:[%s11732_s2 + $0xf90] sm:$0xff] }
 0x2c8   :  { %4978 = vmatmul.mubr.bf16.gmra.mrb[64].mxu1 %v6880_v47  ;;  %v7008_v47 = vcombine.low %v1553_v15, %v1561_v36  ;;  %v1673_v29 = vld [vmem:[%s11732_s2 + $0xfd0] sm:$0xff]  ;;  %v1170_v15 = vld [vmem:[%s11732_s2 + $0x18] sm:$0xff] }
 0x2c9   :  { %4985 = vmatprep.mubr.bf16.mxu1 %v6897_v52  ;;  %v7025_v52 = vcombine.high %v1569_v38, %v1577_v39  ;;  %v1669_v28 = vld [vmem:[%s11732_s2 + $0xfb0] sm:$0xff]  ;;  %v1178_v36 = vld [vmem:[%s11732_s2 + $0x58] sm:$0xff] }
 0x2ca   :  { %6134 = vmatmul.mubr.bf16.gmra.mrb[64].mxu0 %v6888_v48  ;;  %v7016_v48 = vcombine.low %v1557_v33, %v1565_v18  ;;  %v1677_v30 = vld [vmem:[%s11732_s2 + $0xff0] sm:$0xff]  ;;  %v1174_v33 = vld [vmem:[%s11732_s2 + $0x38] sm:$0xff] }
 0x2cb   :  { %6141 = vmatprep.mubr.bf16.mxu0 %v6905_v56  ;;  %v7033_v56 = vcombine.high %v1573_v42, %v1581_v46  ;;  %v1182_v18 = vld [vmem:[%s11732_s2 + $0x78] sm:$0xff] }
 0x2d0   :  { %4986 = vmatmul.mubr.bf16.gmra.mrb[68].mxu1 %v6896_v44  ;;  %v7024_v44 = vcombine.low %v1569_v38, %v1577_v39  ;;  %v1186_v38 = vld [vmem:[%s11732_s2 + $0x98] sm:$0xff] }
 0x2d1   :  { %4993 = vmatprep.mubr.bf16.mxu1 %v6913_v45  ;;  %v7041_v45 = vcombine.high %v1585_v49, %v1593_v53  ;;  %v1194_v39 = vld [vmem:[%s11732_s2 + $0xd8] sm:$0xff] }
 0x2d2   :  { %6142 = vmatmul.mubr.bf16.gmra.mrb[68].mxu0 %v6904_v40  ;;  %v7032_v40 = vcombine.low %v1573_v42, %v1581_v46  ;;  %v1190_v42 = vld [vmem:[%s11732_s2 + $0xb8] sm:$0xff] }
 0x2d3   :  { %6149 = vmatprep.mubr.bf16.mxu0 %v6921_v51  ;;  %v7049_v51 = vcombine.high %v1589_v54, %v1597_v43  ;;  %v1198_v46 = vld [vmem:[%s11732_s2 + $0xf8] sm:$0xff] }
 0x2d8   :  { %4994 = vmatmul.mubr.bf16.gmra.mrb[72].mxu1 %v6912_v60  ;;  %v7040_v60 = vcombine.low %v1585_v49, %v1593_v53  ;;  %v1202_v49 = vld [vmem:[%s11732_s2 + $0x118] sm:$0xff] }
 0x2d9   :  { %5001 = vmatprep.mubr.bf16.mxu1 %v6929_v62  ;;  %v7057_v62 = vcombine.high %v1601_v50, %v1609_v57  ;;  %v1210_v53 = vld [vmem:[%s11732_s2 + $0x158] sm:$0xff] }
 0x2da   :  { %6150 = vmatmul.mubr.bf16.gmra.mrb[72].mxu0 %v6920_v61  ;;  %v7048_v61 = vcombine.low %v1589_v54, %v1597_v43  ;;  %v1206_v54 = vld [vmem:[%s11732_s2 + $0x138] sm:$0xff] }
 0x2db   :  { %6157 = vmatprep.mubr.bf16.mxu0 %v6937_v63  ;;  %v7065_v63 = vcombine.high %v1605_v41, %v1613_v59  ;;  %v1214_v43 = vld [vmem:[%s11732_s2 + $0x178] sm:$0xff] }
 0x2e0   :  { %5002 = vmatmul.mubr.bf16.gmra.mrb[76].mxu1 %v6928_v16  ;;  %v7056_v16 = vcombine.low %v1601_v50, %v1609_v57  ;;  %v1218_v50 = vld [vmem:[%s11732_s2 + $0x198] sm:$0xff] }
 0x2e1   :  { %5009 = vmatprep.mubr.bf16.mxu1 %v6945_v11  ;;  %v7073_v11 = vcombine.high %v1617_v4, %v1625_v7  ;;  %v1226_v57 = vld [vmem:[%s11732_s2 + $0x1d8] sm:$0xff] }
 0x2e2   :  { %6158 = vmatmul.mubr.bf16.gmra.mrb[76].mxu0 %v6936_v5  ;;  %v7064_v5 = vcombine.low %v1605_v41, %v1613_v59  ;;  %v1222_v41 = vld [vmem:[%s11732_s2 + $0x1b8] sm:$0xff] }
 0x2e3   :  { %6165 = vmatprep.mubr.bf16.mxu0 %v6953_v12  ;;  %v7081_v12 = vcombine.high %v1621_v8, %v1629_v10  ;;  %v1230_v59 = vld [vmem:[%s11732_s2 + $0x1f8] sm:$0xff] }
 0x2e8   :  { %5010 = vmatmul.mubr.bf16.gmra.mrb[80].mxu1 %v6944_v13  ;;  %v7072_v13 = vcombine.low %v1617_v4, %v1625_v7  ;;  %v1234_v4 = vld [vmem:[%s11732_s2 + $0x218] sm:$0xff] }
 0x2e9   :  { %5017 = vmatprep.mubr.bf16.mxu1 %v6961_v9  ;;  %v7089_v9 = vcombine.high %v1633_v55, %v1641_v58  ;;  %v1242_v7 = vld [vmem:[%s11732_s2 + $0x258] sm:$0xff] }
 0x2ea   :  { %6166 = vmatmul.mubr.bf16.gmra.mrb[80].mxu0 %v6952_v3  ;;  %v7080_v3 = vcombine.low %v1621_v8, %v1629_v10  ;;  %v1238_v8 = vld [vmem:[%s11732_s2 + $0x238] sm:$0xff] }
 0x2eb   :  { %6173 = vmatprep.mubr.bf16.mxu0 %v6969_v6  ;;  %v7097_v6 = vcombine.high %v1637_v1, %v1645_v2  ;;  %v1246_v10 = vld [vmem:[%s11732_s2 + $0x278] sm:$0xff] }
 0x2f0   :  { %5018 = vmatmul.mubr.bf16.gmra.mrb[84].mxu1 %v6960_v20  ;;  %v7088_v20 = vcombine.low %v1633_v55, %v1641_v58  ;;  %v1250_v55 = vld [vmem:[%s11732_s2 + $0x298] sm:$0xff] }
 0x2f1   :  { %5025 = vmatprep.mubr.bf16.mxu1 %v6977_v22  ;;  %v7105_v22 = vcombine.high %v1649_v17, %v1657_v0  ;;  %v1258_v58 = vld [vmem:[%s11732_s2 + $0x2d8] sm:$0xff] }
 0x2f2   :  { %6174 = vmatmul.mubr.bf16.gmra.mrb[84].mxu0 %v6968_v21  ;;  %v7096_v21 = vcombine.low %v1637_v1, %v1645_v2  ;;  %v1254_v1 = vld [vmem:[%s11732_s2 + $0x2b8] sm:$0xff] }
 0x2f3   :  { %6181 = vmatprep.mubr.bf16.mxu0 %v6985_v23  ;;  %v7113_v23 = vcombine.high %v1653_v14, %v1661_v19  ;;  %v1262_v2 = vld [vmem:[%s11732_s2 + $0x2f8] sm:$0xff] }
 0x2f8   :  { %5026 = vmatmul.mubr.bf16.gmra.mrb[88].mxu1 %v6976_v25  ;;  %v7104_v25 = vcombine.low %v1649_v17, %v1657_v0  ;;  %v1266_v17 = vld [vmem:[%s11732_s2 + $0x318] sm:$0xff] }
 0x2f9   :  { %5033 = vmatprep.mubr.bf16.mxu1 %v6993_v31  ;;  %v7121_v31 = vcombine.high %v1665_v27, %v1673_v29  ;;  %v1274_v0 = vld [vmem:[%s11732_s2 + $0x358] sm:$0xff] }
 0x2fa   :  { %6182 = vmatmul.mubr.bf16.gmra.mrb[88].mxu0 %v6984_v34  ;;  %v7112_v34 = vcombine.low %v1653_v14, %v1661_v19  ;;  %v1270_v14 = vld [vmem:[%s11732_s2 + $0x338] sm:$0xff] }
 0x2fb   :  { %6189 = vmatprep.mubr.bf16.mxu0 %v7001_v32  ;;  %v7129_v32 = vcombine.high %v1669_v28, %v1677_v30  ;;  %v1278_v19 = vld [vmem:[%s11732_s2 + $0x378] sm:$0xff] }
 0x300   :  { %5034 = vmatmul.mubr.bf16.gmra.mrb[92].mxu1 %v6992_v24  ;;  %v7120_v24 = vcombine.low %v1665_v27, %v1673_v29  ;;  %v1282_v27 = vld [vmem:[%s11732_s2 + $0x398] sm:$0xff] }
 0x301   :  { %5041 = vmatprep.mubr.bf16.mxu1 %v7009_v35  ;;  %v6627_v35 = vcombine.high %v1170_v15, %v1178_v36  ;;  %v1290_v29 = vld [vmem:[%s11732_s2 + $0x3d8] sm:$0xff] }
 0x302   :  { %6190 = vmatmul.mubr.bf16.gmra.mrb[92].mxu0 %v7000_v26  ;;  %v7128_v26 = vcombine.low %v1669_v28, %v1677_v30  ;;  %v1286_v28 = vld [vmem:[%s11732_s2 + $0x3b8] sm:$0xff] }
 0x303   :  { %6197 = vmatprep.mubr.bf16.mxu0 %v7017_v37  ;;  %v6635_v37 = vcombine.high %v1174_v33, %v1182_v18  ;;  %v1294_v30 = vld [vmem:[%s11732_s2 + $0x3f8] sm:$0xff] }
 0x308   :  { %5042 = vmatmul.mubr.bf16.gmra.mrb[96].mxu1 %v7008_v47  ;;  %v6626_v47 = vcombine.low %v1170_v15, %v1178_v36  ;;  %v1298_v15 = vld [vmem:[%s11732_s2 + $0x418] sm:$0xff] }
 0x309   :  { %5049 = vmatprep.mubr.bf16.mxu1 %v7025_v52  ;;  %v6643_v52 = vcombine.high %v1186_v38, %v1194_v39  ;;  %v1306_v36 = vld [vmem:[%s11732_s2 + $0x458] sm:$0xff] }
 0x30a   :  { %6198 = vmatmul.mubr.bf16.gmra.mrb[96].mxu0 %v7016_v48  ;;  %v6634_v48 = vcombine.low %v1174_v33, %v1182_v18  ;;  %v1302_v33 = vld [vmem:[%s11732_s2 + $0x438] sm:$0xff] }
 0x30b   :  { %6205 = vmatprep.mubr.bf16.mxu0 %v7033_v56  ;;  %v6651_v56 = vcombine.high %v1190_v42, %v1198_v46  ;;  %v1310_v18 = vld [vmem:[%s11732_s2 + $0x478] sm:$0xff] }
 0x310   :  { %5050 = vmatmul.mubr.bf16.gmra.mrb[100].mxu1 %v7024_v44  ;;  %v6642_v44 = vcombine.low %v1186_v38, %v1194_v39  ;;  %v1314_v38 = vld [vmem:[%s11732_s2 + $0x498] sm:$0xff] }
 0x311   :  { %5057 = vmatprep.mubr.bf16.mxu1 %v7041_v45  ;;  %v6659_v45 = vcombine.high %v1202_v49, %v1210_v53  ;;  %v1322_v39 = vld [vmem:[%s11732_s2 + $0x4d8] sm:$0xff] }
 0x312   :  { %6206 = vmatmul.mubr.bf16.gmra.mrb[100].mxu0 %v7032_v40  ;;  %v6650_v40 = vcombine.low %v1190_v42, %v1198_v46  ;;  %v1318_v42 = vld [vmem:[%s11732_s2 + $0x4b8] sm:$0xff] }
 0x313   :  { %6213 = vmatprep.mubr.bf16.mxu0 %v7049_v51  ;;  %v6667_v51 = vcombine.high %v1206_v54, %v1214_v43  ;;  %v1326_v46 = vld [vmem:[%s11732_s2 + $0x4f8] sm:$0xff] }
 0x318   :  { %5058 = vmatmul.mubr.bf16.gmra.mrb[104].mxu1 %v7040_v60  ;;  %v6658_v60 = vcombine.low %v1202_v49, %v1210_v53  ;;  %v1330_v49 = vld [vmem:[%s11732_s2 + $0x518] sm:$0xff] }
 0x319   :  { %5065 = vmatprep.mubr.bf16.mxu1 %v7057_v62  ;;  %v6675_v62 = vcombine.high %v1218_v50, %v1226_v57  ;;  %v1338_v53 = vld [vmem:[%s11732_s2 + $0x558] sm:$0xff] }
 0x31a   :  { %6214 = vmatmul.mubr.bf16.gmra.mrb[104].mxu0 %v7048_v61  ;;  %v6666_v61 = vcombine.low %v1206_v54, %v1214_v43  ;;  %v1334_v54 = vld [vmem:[%s11732_s2 + $0x538] sm:$0xff] }
 0x31b   :  { %6221 = vmatprep.mubr.bf16.mxu0 %v7065_v63  ;;  %v6683_v63 = vcombine.high %v1222_v41, %v1230_v59  ;;  %v1342_v43 = vld [vmem:[%s11732_s2 + $0x578] sm:$0xff] }
 0x320   :  { %5066 = vmatmul.mubr.bf16.gmra.mrb[108].mxu1 %v7056_v16  ;;  %v6674_v16 = vcombine.low %v1218_v50, %v1226_v57  ;;  %v1346_v50 = vld [vmem:[%s11732_s2 + $0x598] sm:$0xff] }
 0x321   :  { %5073 = vmatprep.mubr.bf16.mxu1 %v7073_v11  ;;  %v6691_v11 = vcombine.high %v1234_v4, %v1242_v7  ;;  %v1354_v57 = vld [vmem:[%s11732_s2 + $0x5d8] sm:$0xff] }
 0x322   :  { %6222 = vmatmul.mubr.bf16.gmra.mrb[108].mxu0 %v7064_v5  ;;  %v6682_v5 = vcombine.low %v1222_v41, %v1230_v59  ;;  %v1350_v41 = vld [vmem:[%s11732_s2 + $0x5b8] sm:$0xff] }
 0x323   :  { %6229 = vmatprep.mubr.bf16.mxu0 %v7081_v12  ;;  %v6699_v12 = vcombine.high %v1238_v8, %v1246_v10  ;;  %v1358_v59 = vld [vmem:[%s11732_s2 + $0x5f8] sm:$0xff] }
 0x328   :  { %5074 = vmatmul.mubr.bf16.gmra.mrb[112].mxu1 %v7072_v13  ;;  %v6690_v13 = vcombine.low %v1234_v4, %v1242_v7  ;;  %v1362_v4 = vld [vmem:[%s11732_s2 + $0x618] sm:$0xff] }
 0x329   :  { %5081 = vmatprep.mubr.bf16.mxu1 %v7089_v9  ;;  %v6707_v9 = vcombine.high %v1250_v55, %v1258_v58  ;;  %v1370_v7 = vld [vmem:[%s11732_s2 + $0x658] sm:$0xff] }
 0x32a   :  { %6230 = vmatmul.mubr.bf16.gmra.mrb[112].mxu0 %v7080_v3  ;;  %v6698_v3 = vcombine.low %v1238_v8, %v1246_v10  ;;  %v1366_v8 = vld [vmem:[%s11732_s2 + $0x638] sm:$0xff] }
 0x32b   :  { %6237 = vmatprep.mubr.bf16.mxu0 %v7097_v6  ;;  %v6715_v6 = vcombine.high %v1254_v1, %v1262_v2  ;;  %v1374_v10 = vld [vmem:[%s11732_s2 + $0x678] sm:$0xff] }
 0x330   :  { %5082 = vmatmul.mubr.bf16.gmra.mrb[116].mxu1 %v7088_v20  ;;  %v6706_v20 = vcombine.low %v1250_v55, %v1258_v58  ;;  %v1378_v55 = vld [vmem:[%s11732_s2 + $0x698] sm:$0xff] }
 0x331   :  { %5089 = vmatprep.mubr.bf16.mxu1 %v7105_v22  ;;  %v6723_v22 = vcombine.high %v1266_v17, %v1274_v0  ;;  %v1386_v58 = vld [vmem:[%s11732_s2 + $0x6d8] sm:$0xff] }
 0x332   :  { %6238 = vmatmul.mubr.bf16.gmra.mrb[116].mxu0 %v7096_v21  ;;  %v6714_v21 = vcombine.low %v1254_v1, %v1262_v2  ;;  %v1382_v1 = vld [vmem:[%s11732_s2 + $0x6b8] sm:$0xff] }
 0x333   :  { %6245 = vmatprep.mubr.bf16.mxu0 %v7113_v23  ;;  %v6731_v23 = vcombine.high %v1270_v14, %v1278_v19  ;;  %v1390_v2 = vld [vmem:[%s11732_s2 + $0x6f8] sm:$0xff] }
 0x338   :  { %5090 = vmatmul.mubr.bf16.gmra.mrb[120].mxu1 %v7104_v25  ;;  %v6722_v25 = vcombine.low %v1266_v17, %v1274_v0  ;;  %v1394_v17 = vld [vmem:[%s11732_s2 + $0x718] sm:$0xff] }
 0x339   :  { %5097 = vmatprep.mubr.bf16.mxu1 %v7121_v31  ;;  %v6739_v31 = vcombine.high %v1282_v27, %v1290_v29  ;;  %v1402_v0 = vld [vmem:[%s11732_s2 + $0x758] sm:$0xff] }
 0x33a   :  { %6246 = vmatmul.mubr.bf16.gmra.mrb[120].mxu0 %v7112_v34  ;;  %v6730_v34 = vcombine.low %v1270_v14, %v1278_v19  ;;  %v1398_v14 = vld [vmem:[%s11732_s2 + $0x738] sm:$0xff] }
 0x33b   :  { %6253 = vmatprep.mubr.bf16.mxu0 %v7129_v32  ;;  %v6747_v32 = vcombine.high %v1286_v28, %v1294_v30  ;;  %v1406_v19 = vld [vmem:[%s11732_s2 + $0x778] sm:$0xff] }
 0x340   :  { %5098 = vmatmul.mubr.bf16.gmra.mrb[124].mxu1 %v7120_v24  ;;  %v6738_v24 = vcombine.low %v1282_v27, %v1290_v29  ;;  %v1410_v27 = vld [vmem:[%s11732_s2 + $0x798] sm:$0xff] }
 0x341   :  { %5138 = vmatprep.mubr.bf16.mxu1 %v6627_v35  ;;  %v6755_v35 = vcombine.high %v1298_v15, %v1306_v36  ;;  %v1418_v29 = vld [vmem:[%s11732_s2 + $0x7d8] sm:$0xff] }
 0x342   :  { %6254 = vmatmul.mubr.bf16.gmra.mrb[124].mxu0 %v7128_v26  ;;  %v6746_v26 = vcombine.low %v1286_v28, %v1294_v30  ;;  %v1414_v28 = vld [vmem:[%s11732_s2 + $0x7b8] sm:$0xff] }
 0x343   :  { %6294 = vmatprep.mubr.bf16.mxu0 %v6635_v37  ;;  %v6763_v37 = vcombine.high %v1302_v33, %v1310_v18  ;;  %v1422_v30 = vld [vmem:[%s11732_s2 + $0x7f8] sm:$0xff] }
 0x348   :  { %5139 = vmatmul.mubr.bf16.vlgmr.msra.gmra.mrb[0].mxu1 %v6626_v47  ;;  %v6754_v47 = vcombine.low %v1298_v15, %v1306_v36  ;;  %v1426_v15 = vld [vmem:[%s11732_s2 + $0x818] sm:$0xff] }
 0x349   :  { %5146 = vmatprep.mubr.bf16.mxu1 %v6643_v52  ;;  %v6771_v52 = vcombine.high %v1314_v38, %v1322_v39  ;;  %v1434_v36 = vld [vmem:[%s11732_s2 + $0x858] sm:$0xff] }
 0x34a   :  { %6295 = vmatmul.mubr.bf16.vlgmr.msra.gmra.mrb[0].mxu0 %v6634_v48  ;;  %v6762_v48 = vcombine.low %v1302_v33, %v1310_v18  ;;  %v1430_v33 = vld [vmem:[%s11732_s2 + $0x838] sm:$0xff] }
 0x34b   :  { %6302 = vmatprep.mubr.bf16.mxu0 %v6651_v56  ;;  %v6779_v56 = vcombine.high %v1318_v42, %v1326_v46  ;;  %v1438_v18 = vld [vmem:[%s11732_s2 + $0x878] sm:$0xff] }
 0x350   :  { %5147 = vmatmul.mubr.bf16.gmra.mrb[4].mxu1 %v6642_v44  ;;  %v6770_v44 = vcombine.low %v1314_v38, %v1322_v39  ;;  %v1442_v38 = vld [vmem:[%s11732_s2 + $0x898] sm:$0xff] }
 0x351   :  { %5154 = vmatprep.mubr.bf16.mxu1 %v6659_v45  ;;  %v6787_v45 = vcombine.high %v1330_v49, %v1338_v53  ;;  %v1450_v39 = vld [vmem:[%s11732_s2 + $0x8d8] sm:$0xff] }
 0x352   :  { %6303 = vmatmul.mubr.bf16.gmra.mrb[4].mxu0 %v6650_v40  ;;  %v6778_v40 = vcombine.low %v1318_v42, %v1326_v46  ;;  %v1446_v42 = vld [vmem:[%s11732_s2 + $0x8b8] sm:$0xff] }
 0x353   :  { %6310 = vmatprep.mubr.bf16.mxu0 %v6667_v51  ;;  %v6795_v51 = vcombine.high %v1334_v54, %v1342_v43  ;;  %v1454_v46 = vld [vmem:[%s11732_s2 + $0x8f8] sm:$0xff] }
 0x358   :  { %5155 = vmatmul.mubr.bf16.gmra.mrb[8].mxu1 %v6658_v60  ;;  %v6786_v60 = vcombine.low %v1330_v49, %v1338_v53  ;;  %v1458_v49 = vld [vmem:[%s11732_s2 + $0x918] sm:$0xff] }
 0x359   :  { %5162 = vmatprep.mubr.bf16.mxu1 %v6675_v62  ;;  %v6803_v62 = vcombine.high %v1346_v50, %v1354_v57  ;;  %v1466_v53 = vld [vmem:[%s11732_s2 + $0x958] sm:$0xff] }
 0x35a   :  { %6311 = vmatmul.mubr.bf16.gmra.mrb[8].mxu0 %v6666_v61  ;;  %v6794_v61 = vcombine.low %v1334_v54, %v1342_v43  ;;  %v1462_v54 = vld [vmem:[%s11732_s2 + $0x938] sm:$0xff] }
 0x35b   :  { %6318 = vmatprep.mubr.bf16.mxu0 %v6683_v63  ;;  %v6811_v63 = vcombine.high %v1350_v41, %v1358_v59  ;;  %v1470_v43 = vld [vmem:[%s11732_s2 + $0x978] sm:$0xff] }
 0x360   :  { %5163 = vmatmul.mubr.bf16.gmra.mrb[12].mxu1 %v6674_v16  ;;  %v6802_v16 = vcombine.low %v1346_v50, %v1354_v57  ;;  %v1474_v50 = vld [vmem:[%s11732_s2 + $0x998] sm:$0xff] }
 0x361   :  { %5170 = vmatprep.mubr.bf16.mxu1 %v6691_v11  ;;  %v6819_v11 = vcombine.high %v1362_v4, %v1370_v7  ;;  %v1482_v57 = vld [vmem:[%s11732_s2 + $0x9d8] sm:$0xff] }
 0x362   :  { %6319 = vmatmul.mubr.bf16.gmra.mrb[12].mxu0 %v6682_v5  ;;  %v6810_v5 = vcombine.low %v1350_v41, %v1358_v59  ;;  %v1478_v41 = vld [vmem:[%s11732_s2 + $0x9b8] sm:$0xff] }
 0x363   :  { %6326 = vmatprep.mubr.bf16.mxu0 %v6699_v12  ;;  %v6827_v12 = vcombine.high %v1366_v8, %v1374_v10  ;;  %v1486_v59 = vld [vmem:[%s11732_s2 + $0x9f8] sm:$0xff] }
 0x368   :  { %5171 = vmatmul.mubr.bf16.gmra.mrb[16].mxu1 %v6690_v13  ;;  %v6818_v13 = vcombine.low %v1362_v4, %v1370_v7  ;;  %v1490_v4 = vld [vmem:[%s11732_s2 + $0xa18] sm:$0xff] }
 0x369   :  { %5178 = vmatprep.mubr.bf16.mxu1 %v6707_v9  ;;  %v6835_v9 = vcombine.high %v1378_v55, %v1386_v58  ;;  %v1498_v7 = vld [vmem:[%s11732_s2 + $0xa58] sm:$0xff] }
 0x36a   :  { %6327 = vmatmul.mubr.bf16.gmra.mrb[16].mxu0 %v6698_v3  ;;  %v6826_v3 = vcombine.low %v1366_v8, %v1374_v10  ;;  %v1494_v8 = vld [vmem:[%s11732_s2 + $0xa38] sm:$0xff] }
 0x36b   :  { %6334 = vmatprep.mubr.bf16.mxu0 %v6715_v6  ;;  %v6843_v6 = vcombine.high %v1382_v1, %v1390_v2  ;;  %v1502_v10 = vld [vmem:[%s11732_s2 + $0xa78] sm:$0xff] }
 0x370   :  { %5179 = vmatmul.mubr.bf16.gmra.mrb[20].mxu1 %v6706_v20  ;;  %v6834_v20 = vcombine.low %v1378_v55, %v1386_v58  ;;  %v1506_v55 = vld [vmem:[%s11732_s2 + $0xa98] sm:$0xff] }
 0x371   :  { %5186 = vmatprep.mubr.bf16.mxu1 %v6723_v22  ;;  %v6851_v22 = vcombine.high %v1394_v17, %v1402_v0  ;;  %v1514_v58 = vld [vmem:[%s11732_s2 + $0xad8] sm:$0xff] }
 0x372   :  { %6335 = vmatmul.mubr.bf16.gmra.mrb[20].mxu0 %v6714_v21  ;;  %v6842_v21 = vcombine.low %v1382_v1, %v1390_v2  ;;  %v1510_v1 = vld [vmem:[%s11732_s2 + $0xab8] sm:$0xff] }
 0x373   :  { %6342 = vmatprep.mubr.bf16.mxu0 %v6731_v23  ;;  %v6859_v23 = vcombine.high %v1398_v14, %v1406_v19  ;;  %v1518_v2 = vld [vmem:[%s11732_s2 + $0xaf8] sm:$0xff] }
 0x378   :  { %5187 = vmatmul.mubr.bf16.gmra.mrb[24].mxu1 %v6722_v25  ;;  %v6850_v25 = vcombine.low %v1394_v17, %v1402_v0  ;;  %v1522_v17 = vld [vmem:[%s11732_s2 + $0xb18] sm:$0xff] }
 0x379   :  { %5194 = vmatprep.mubr.bf16.mxu1 %v6739_v31  ;;  %v6867_v31 = vcombine.high %v1410_v27, %v1418_v29  ;;  %v1530_v0 = vld [vmem:[%s11732_s2 + $0xb58] sm:$0xff] }
 0x37a   :  { %6343 = vmatmul.mubr.bf16.gmra.mrb[24].mxu0 %v6730_v34  ;;  %v6858_v34 = vcombine.low %v1398_v14, %v1406_v19  ;;  %v1526_v14 = vld [vmem:[%s11732_s2 + $0xb38] sm:$0xff] }
 0x37b   :  { %6350 = vmatprep.mubr.bf16.mxu0 %v6747_v32  ;;  %v6875_v32 = vcombine.high %v1414_v28, %v1422_v30  ;;  %v1534_v19 = vld [vmem:[%s11732_s2 + $0xb78] sm:$0xff] }
 0x380   :  { %5195 = vmatmul.mubr.bf16.gmra.mrb[28].mxu1 %v6738_v24  ;;  %v6866_v24 = vcombine.low %v1410_v27, %v1418_v29  ;;  %v1538_v27 = vld [vmem:[%s11732_s2 + $0xb98] sm:$0xff] }
 0x381   :  { %5202 = vmatprep.mubr.bf16.mxu1 %v6755_v35  ;;  %v6883_v35 = vcombine.high %v1426_v15, %v1434_v36  ;;  %v1546_v29 = vld [vmem:[%s11732_s2 + $0xbd8] sm:$0xff] }
 0x382   :  { %6351 = vmatmul.mubr.bf16.gmra.mrb[28].mxu0 %v6746_v26  ;;  %v6874_v26 = vcombine.low %v1414_v28, %v1422_v30  ;;  %v1542_v28 = vld [vmem:[%s11732_s2 + $0xbb8] sm:$0xff] }
 0x383   :  { %6358 = vmatprep.mubr.bf16.mxu0 %v6763_v37  ;;  %v6891_v37 = vcombine.high %v1430_v33, %v1438_v18  ;;  %v1550_v30 = vld [vmem:[%s11732_s2 + $0xbf8] sm:$0xff] }
 0x388   :  { %5203 = vmatmul.mubr.bf16.gmra.mrb[32].mxu1 %v6754_v47  ;;  %v6882_v47 = vcombine.low %v1426_v15, %v1434_v36  ;;  %v1554_v15 = vld [vmem:[%s11732_s2 + $0xc18] sm:$0xff] }
 0x389   :  { %5210 = vmatprep.mubr.bf16.mxu1 %v6771_v52  ;;  %v6899_v52 = vcombine.high %v1442_v38, %v1450_v39  ;;  %v1562_v36 = vld [vmem:[%s11732_s2 + $0xc58] sm:$0xff] }
 0x38a   :  { %6359 = vmatmul.mubr.bf16.gmra.mrb[32].mxu0 %v6762_v48  ;;  %v6890_v48 = vcombine.low %v1430_v33, %v1438_v18  ;;  %v1558_v33 = vld [vmem:[%s11732_s2 + $0xc38] sm:$0xff] }
 0x38b   :  { %6366 = vmatprep.mubr.bf16.mxu0 %v6779_v56  ;;  %v6907_v56 = vcombine.high %v1446_v42, %v1454_v46  ;;  %v1566_v18 = vld [vmem:[%s11732_s2 + $0xc78] sm:$0xff] }
 0x390   :  { %5211 = vmatmul.mubr.bf16.gmra.mrb[36].mxu1 %v6770_v44  ;;  %v6898_v44 = vcombine.low %v1442_v38, %v1450_v39  ;;  %v1570_v38 = vld [vmem:[%s11732_s2 + $0xc98] sm:$0xff] }
 0x391   :  { %5218 = vmatprep.mubr.bf16.mxu1 %v6787_v45  ;;  %v6915_v45 = vcombine.high %v1458_v49, %v1466_v53  ;;  %v1578_v39 = vld [vmem:[%s11732_s2 + $0xcd8] sm:$0xff] }
 0x392   :  { %6367 = vmatmul.mubr.bf16.gmra.mrb[36].mxu0 %v6778_v40  ;;  %v6906_v40 = vcombine.low %v1446_v42, %v1454_v46  ;;  %v1574_v42 = vld [vmem:[%s11732_s2 + $0xcb8] sm:$0xff] }
 0x393   :  { %6374 = vmatprep.mubr.bf16.mxu0 %v6795_v51  ;;  %v6923_v51 = vcombine.high %v1462_v54, %v1470_v43  ;;  %v1582_v46 = vld [vmem:[%s11732_s2 + $0xcf8] sm:$0xff] }
 0x398   :  { %5219 = vmatmul.mubr.bf16.gmra.mrb[40].mxu1 %v6786_v60  ;;  %v6914_v60 = vcombine.low %v1458_v49, %v1466_v53  ;;  %v1586_v49 = vld [vmem:[%s11732_s2 + $0xd18] sm:$0xff] }
 0x399   :  { %5226 = vmatprep.mubr.bf16.mxu1 %v6803_v62  ;;  %v6931_v62 = vcombine.high %v1474_v50, %v1482_v57  ;;  %v1594_v53 = vld [vmem:[%s11732_s2 + $0xd58] sm:$0xff] }
 0x39a   :  { %6375 = vmatmul.mubr.bf16.gmra.mrb[40].mxu0 %v6794_v61  ;;  %v6922_v61 = vcombine.low %v1462_v54, %v1470_v43  ;;  %v1590_v54 = vld [vmem:[%s11732_s2 + $0xd38] sm:$0xff] }
 0x39b   :  { %6382 = vmatprep.mubr.bf16.mxu0 %v6811_v63  ;;  %v6939_v63 = vcombine.high %v1478_v41, %v1486_v59  ;;  %v1598_v43 = vld [vmem:[%s11732_s2 + $0xd78] sm:$0xff] }
 0x3a0   :  { %5227 = vmatmul.mubr.bf16.gmra.mrb[44].mxu1 %v6802_v16  ;;  %v6930_v16 = vcombine.low %v1474_v50, %v1482_v57  ;;  %v1602_v50 = vld [vmem:[%s11732_s2 + $0xd98] sm:$0xff] }
 0x3a1   :  { %5234 = vmatprep.mubr.bf16.mxu1 %v6819_v11  ;;  %v6947_v11 = vcombine.high %v1490_v4, %v1498_v7  ;;  %v1610_v57 = vld [vmem:[%s11732_s2 + $0xdd8] sm:$0xff] }
 0x3a2   :  { %6383 = vmatmul.mubr.bf16.gmra.mrb[44].mxu0 %v6810_v5  ;;  %v6938_v5 = vcombine.low %v1478_v41, %v1486_v59  ;;  %v1606_v41 = vld [vmem:[%s11732_s2 + $0xdb8] sm:$0xff] }
 0x3a3   :  { %6390 = vmatprep.mubr.bf16.mxu0 %v6827_v12  ;;  %v6955_v12 = vcombine.high %v1494_v8, %v1502_v10  ;;  %v1614_v59 = vld [vmem:[%s11732_s2 + $0xdf8] sm:$0xff] }
 0x3a8   :  { %5235 = vmatmul.mubr.bf16.gmra.mrb[48].mxu1 %v6818_v13  ;;  %v6946_v13 = vcombine.low %v1490_v4, %v1498_v7  ;;  %v1618_v4 = vld [vmem:[%s11732_s2 + $0xe18] sm:$0xff] }
 0x3a9   :  { %5242 = vmatprep.mubr.bf16.mxu1 %v6835_v9  ;;  %v6963_v9 = vcombine.high %v1506_v55, %v1514_v58  ;;  %v1626_v7 = vld [vmem:[%s11732_s2 + $0xe58] sm:$0xff] }
 0x3aa   :  { %6391 = vmatmul.mubr.bf16.gmra.mrb[48].mxu0 %v6826_v3  ;;  %v6954_v3 = vcombine.low %v1494_v8, %v1502_v10  ;;  %v1622_v10 = vld [vmem:[%s11732_s2 + $0xe38] sm:$0xff] }
 0x3ab   :  { %6398 = vmatprep.mubr.bf16.mxu0 %v6843_v6  ;;  %v6971_v6 = vcombine.high %v1510_v1, %v1518_v2 }
 0x3b0   :  { %5243 = vmatmul.mubr.bf16.gmra.mrb[52].mxu1 %v6834_v20  ;;  %v6962_v20 = vcombine.low %v1506_v55, %v1514_v58 }
 0x3b1   :  { %5250 = vmatprep.mubr.bf16.mxu1 %v6851_v22  ;;  %v6979_v22 = vcombine.high %v1522_v17, %v1530_v0 }
 0x3b2   :  { %6399 = vmatmul.mubr.bf16.gmra.mrb[52].mxu0 %v6842_v21  ;;  %v6970_v21 = vcombine.low %v1510_v1, %v1518_v2  ;;  %v7066_v2 = vcombine.low %v1606_v41, %v1614_v59 }
 0x3b3   :  { %6406 = vmatprep.mubr.bf16.mxu0 %v6859_v23  ;;  %v6987_v23 = vcombine.high %v1526_v14, %v1534_v19 }
 0x3b8   :  { %5251 = vmatmul.mubr.bf16.gmra.mrb[56].mxu1 %v6850_v25  ;;  %v6978_v25 = vcombine.low %v1522_v17, %v1530_v0 }
 0x3b9   :  { %5258 = vmatprep.mubr.bf16.mxu1 %v6867_v31  ;;  %v6995_v31 = vcombine.high %v1538_v27, %v1546_v29 }
 0x3ba   :  { %6407 = vmatmul.mubr.bf16.gmra.mrb[56].mxu0 %v6858_v34  ;;  %v6986_v34 = vcombine.low %v1526_v14, %v1534_v19  ;;  %v1634_v14 = vld [vmem:[%s11732_s2 + $0xe98] sm:$0xff] }
 0x3bb   :  { %6414 = vmatprep.mubr.bf16.mxu0 %v6875_v32  ;;  %v7003_v32 = vcombine.high %v1542_v28, %v1550_v30  ;;  %v1642_v19 = vld [vmem:[%s11732_s2 + $0xed8] sm:$0xff] }
 0x3c0   :  { %5259 = vmatmul.mubr.bf16.gmra.mrb[60].mxu1 %v6866_v24  ;;  %v6994_v24 = vcombine.low %v1538_v27, %v1546_v29  ;;  %v7074_v29 = vcombine.low %v1618_v4, %v1626_v7 }
 0x3c1   :  { %5266 = vmatprep.mubr.bf16.mxu1 %v6883_v35  ;;  %v7011_v35 = vcombine.high %v1554_v15, %v1562_v36 }
 0x3c2   :  { %6415 = vmatmul.mubr.bf16.gmra.mrb[60].mxu0 %v6874_v26  ;;  %v7002_v26 = vcombine.low %v1542_v28, %v1550_v30 }
 0x3c3   :  { %6422 = vmatprep.mubr.bf16.mxu0 %v6891_v37  ;;  %v7019_v37 = vcombine.high %v1558_v33, %v1566_v18 }
 0x3c8   :  { %5267 = vmatmul.mubr.bf16.gmra.mrb[64].mxu1 %v6882_v47  ;;  %v7010_v47 = vcombine.low %v1554_v15, %v1562_v36 }
 0x3c9   :  { %5274 = vmatprep.mubr.bf16.mxu1 %v6899_v52  ;;  %v7027_v52 = vcombine.high %v1570_v38, %v1578_v39 }
 0x3ca   :  { %6423 = vmatmul.mubr.bf16.gmra.mrb[64].mxu0 %v6890_v48  ;;  %v7018_v48 = vcombine.low %v1558_v33, %v1566_v18 }
 0x3cb   :  { %6430 = vmatprep.mubr.bf16.mxu0 %v6907_v56  ;;  %v7035_v56 = vcombine.high %v1574_v42, %v1582_v46 }
 0x3d0   :  { %5275 = vmatmul.mubr.bf16.gmra.mrb[68].mxu1 %v6898_v44  ;;  %v7026_v44 = vcombine.low %v1570_v38, %v1578_v39  ;;  %v1662_v38 = vld [vmem:[%s11732_s2 + $0xf78] sm:$0xff] }
 0x3d1   :  { %5282 = vmatprep.mubr.bf16.mxu1 %v6915_v45  ;;  %v7043_v45 = vcombine.high %v1586_v49, %v1594_v53 }
 0x3d2   :  { %6431 = vmatmul.mubr.bf16.gmra.mrb[68].mxu0 %v6906_v40  ;;  %v7034_v40 = vcombine.low %v1574_v42, %v1582_v46  ;;  %v7090_v46 = vcombine.low %v1634_v14, %v1642_v19 }
 0x3d3   :  { %6438 = vmatprep.mubr.bf16.mxu0 %v6923_v51  ;;  %v7051_v51 = vcombine.high %v1590_v54, %v1598_v43 }
 0x3d8   :  { %5283 = vmatmul.mubr.bf16.gmra.mrb[72].mxu1 %v6914_v60  ;;  %v7042_v60 = vcombine.low %v1586_v49, %v1594_v53 }
 0x3d9   :  { %5290 = vmatprep.mubr.bf16.mxu1 %v6931_v62  ;;  %v7059_v62 = vcombine.high %v1602_v50, %v1610_v57 }
 0x3da   :  { %6439 = vmatmul.mubr.bf16.gmra.mrb[72].mxu0 %v6922_v61  ;;  %v7050_v61 = vcombine.low %v1590_v54, %v1598_v43 }
 0x3db   :  { %6446 = vmatprep.mubr.bf16.mxu0 %v6939_v63  ;;  %v7067_v63 = vcombine.high %v1606_v41, %v1614_v59  ;;  %v1678_v41 = vld [vmem:[%s11732_s2 + $0xff8] sm:$0xff] }
 0x3e0   :  { %5291 = vmatmul.mubr.bf16.gmra.mrb[76].mxu1 %v6930_v16  ;;  %v1630_v16 = vld [vmem:[%s11732_s2 + $0xe78] sm:$0xff] }
 0x3e1   :  { %5298 = vmatprep.mubr.bf16.mxu1 %v6947_v11 }
 0x3e2   :  { %6447 = vmatmul.mubr.bf16.gmra.mrb[76].mxu0 %v6938_v5 }
 0x3e3   :  { %6454 = vmatprep.mubr.bf16.mxu0 %v6955_v12  ;;  %v7058_v12 = vcombine.low %v1602_v50, %v1610_v57  ;;  %v1670_v57 = vld [vmem:[%s11732_s2 + $0xfb8] sm:$0xff] }
 0x3e8   :  { %5299 = vmatmul.mubr.bf16.gmra.mrb[80].mxu1 %v6946_v13  ;;  %v7075_v13 = vcombine.high %v1618_v4, %v1626_v7 }
 0x3e9   :  { %5306 = vmatprep.mubr.bf16.mxu1 %v6963_v9 }
 0x3ea   :  { %6455 = vmatmul.mubr.bf16.gmra.mrb[80].mxu0 %v6954_v3 }
 0x3eb   :  { %6462 = vmatprep.mubr.bf16.mxu0 %v6971_v6  ;;  %v7083_v6 = vcombine.high %v1622_v10, %v1630_v16 }
 0x3f0   :  { %5307 = vmatmul.mubr.bf16.gmra.mrb[84].mxu1 %v6962_v20 }
 0x3f1   :  { %5314 = vmatprep.mubr.bf16.mxu1 %v6979_v22  ;;  %v1646_v22 = vld [vmem:[%s11732_s2 + $0xef8] sm:$0xff] }
 0x3f2   :  { %6463 = vmatmul.mubr.bf16.gmra.mrb[84].mxu0 %v6970_v21  ;;  %v1638_v21 = vld [vmem:[%s11732_s2 + $0xeb8] sm:$0xff] }
 0x3f3   :  { %6470 = vmatprep.mubr.bf16.mxu0 %v6987_v23  ;;  %v7099_v36 = vcombine.high %v1638_v21, %v1646_v22 }
 0x3f8   :  { %5315 = vmatmul.mubr.bf16.gmra.mrb[88].mxu1 %v6978_v25 }
 0x3f9   :  { %5322 = vmatprep.mubr.bf16.mxu1 %v6995_v31  ;;  %v7091_v31 = vcombine.high %v1634_v14, %v1642_v19 }
 0x3fa   :  { %6471 = vmatmul.mubr.bf16.gmra.mrb[88].mxu0 %v6986_v34  ;;  %v7082_v34 = vcombine.low %v1622_v10, %v1630_v16 }
 0x3fb   :  { %6478 = vmatprep.mubr.bf16.mxu0 %v7003_v32 }
 0x400   :  { %5323 = vmatmul.mubr.bf16.gmra.mrb[92].mxu1 %v6994_v24  ;;  %v1650_v24 = vld [vmem:[%s11732_s2 + $0xf18] sm:$0xff] }
 0x401   :  { %5330 = vmatprep.mubr.bf16.mxu1 %v7011_v35 }
 0x402   :  { %6479 = vmatmul.mubr.bf16.gmra.mrb[92].mxu0 %v7002_v26  ;;  %v1658_v26 = vld [vmem:[%s11732_s2 + $0xf58] sm:$0xff] }
 0x403   :  { %6486 = vmatprep.mubr.bf16.mxu0 %v7019_v37  ;;  %v1654_v37 = vld [vmem:[%s11732_s2 + $0xf38] sm:$0xff]  ;;  %v7107_v49 = vcombine.high %v1650_v24, %v1658_v26 }
 0x404   :  { %v7115_v43 = vcombine.high %v1654_v37, %v1662_v38  ;;  %v7114_v7 = vcombine.low %v1654_v37, %v1662_v38 }
 0x408   :  { %5331 = vmatmul.mubr.bf16.gmra.mrb[96].mxu1 %v7010_v47 }
 0x409   :  { %5338 = vmatprep.mubr.bf16.mxu1 %v7027_v52 }
 0x40a   :  { %6487 = vmatmul.mubr.bf16.gmra.mrb[96].mxu0 %v7018_v48 }
 0x40b   :  { %6494 = vmatprep.mubr.bf16.mxu0 %v7035_v56  ;;  %v7098_v56 = vcombine.low %v1638_v21, %v1646_v22 }
 0x410   :  { %5339 = vmatmul.mubr.bf16.gmra.mrb[100].mxu1 %v7026_v44 }
 0x411   :  { %5346 = vmatprep.mubr.bf16.mxu1 %v7043_v45  ;;  %v1666_v45 = vld [vmem:[%s11732_s2 + $0xf98] sm:$0xff] }
 0x412   :  { %6495 = vmatmul.mubr.bf16.gmra.mrb[100].mxu0 %v7034_v40 }
 0x413   :  { %6502 = vmatprep.mubr.bf16.mxu0 %v7051_v51  ;;  %v1674_v51 = vld [vmem:[%s11732_s2 + $0xfd8] sm:$0xff] }
 0x418   :  { %5347 = vmatmul.mubr.bf16.gmra.mrb[104].mxu1 %v7042_v60 }
 0x419   :  { %5354 = vmatprep.mubr.bf16.mxu1 %v7059_v62 }
 0x41a   :  { %6503 = vmatmul.mubr.bf16.gmra.mrb[104].mxu0 %v7050_v61  ;;  %v7106_v61 = vcombine.low %v1650_v24, %v1658_v26 }
 0x41b   :  { %6510 = vmatprep.mubr.bf16.mxu0 %v7067_v63  ;;  %v5140_v8 = vpop.f32.mrb[0].mxu1 }
 0x41c   :  { %v5142_v11 = vpop.f32.mrb[1].mxu1 }
 0x41d   :  { %v6296_v5 = vpop.f32.mrb[0].mxu0  ;;  %v5143_v1 = vpop.f32.mrb[2].mxu1 }
 0x41e   :  { %v7132_v55 = vadd.f32 %v6296_v5, %v5140_v8  ;;  %v6298_v58 = vpop.f32.mrb[1].mxu0  ;;  %v5145_v9 = vpop.f32.mrb[3].mxu1  ;;  %v7123_v8 = vcombine.high %v1666_v45, %v1674_v51  ;;  %v7131_v5 = vcombine.high %v1670_v57, %v1678_v41 }
 0x41f   :  { %v6299_v3 = vpop.f32.mrb[2].mxu0 }
 0x420   :  { %6552 = vst.msk [vmem:[%s11733_s3] sm:$0xff] %vm6551_vm0, %v7132_v55  ;;  %v7133_v17 = vadd.f32 %v6299_v3, %v5143_v1  ;;  %v6301_v0 = vpop.f32.mrb[3].mxu0  ;;  %5355 = vmatmul.mubr.bf16.gmra.mrb[108].mxu1 %v7058_v12 }
 0x421   :  { %5362 = vmatprep.mubr.bf16.mxu1 %v7075_v13 }
 0x422   :  { %6553 = vst.msk [vmem:[%s11733_s3 + $0x8] sm:$0xff] %vm6551_vm0, %v7133_v17  ;;  %6511 = vmatmul.mubr.bf16.gmra.mrb[108].mxu0 %v7066_v2  ;;  %v7122_v2 = vcombine.low %v1666_v45, %v1674_v51 }
 0x423   :  { %6518 = vmatprep.mubr.bf16.mxu0 %v7083_v6  ;;  %v5148_v20 = vpop.f32.mrb[4].mxu1  ;;  %v7130_v6 = vcombine.low %v1670_v57, %v1678_v41 }
 0x424   :  { %v5150_v27 = vpop.f32.mrb[5].mxu1 }
 0x425   :  { %v6304_v23 = vpop.f32.mrb[4].mxu0  ;;  %v5151_v25 = vpop.f32.mrb[6].mxu1 }
 0x426   :  { %v7134_v28 = vadd.f32 %v6304_v23, %v5148_v20  ;;  %v6306_v30 = vpop.f32.mrb[5].mxu0  ;;  %v5153_v15 = vpop.f32.mrb[7].mxu1 }
 0x427   :  { %v6307_v32 = vpop.f32.mrb[6].mxu0 }
 0x428   :  { %6554 = vst.msk [vmem:[%s11733_s3 + $0x10] sm:$0xff] %vm6551_vm0, %v7134_v28  ;;  %v7135_v33 = vadd.f32 %v6307_v32, %v5151_v25  ;;  %v6309_v18 = vpop.f32.mrb[7].mxu0  ;;  %5363 = vmatmul.mubr.bf16.gmra.mrb[112].mxu1 %v7074_v29 }
 0x429   :  { %5370 = vmatprep.mubr.bf16.mxu1 %v7091_v31 }
 0x42a   :  { %6555 = vst.msk [vmem:[%s11733_s3 + $0x18] sm:$0xff] %vm6551_vm0, %v7135_v33  ;;  %6519 = vmatmul.mubr.bf16.gmra.mrb[112].mxu0 %v7082_v34 }
 0x42b   :  { %6526 = vmatprep.mubr.bf16.mxu0 %v7099_v36  ;;  %v5156_v35 = vpop.f32.mrb[8].mxu1 }
 0x42c   :  { %v5158_v42 = vpop.f32.mrb[9].mxu1 }
 0x42d   :  { %v6312_v39 = vpop.f32.mrb[8].mxu0  ;;  %v5159_v52 = vpop.f32.mrb[10].mxu1 }
 0x42e   :  { %v7136_v47 = vadd.f32 %v6312_v39, %v5156_v35  ;;  %v6314_v48 = vpop.f32.mrb[9].mxu0  ;;  %v5161_v54 = vpop.f32.mrb[11].mxu1 }
 0x42f   :  { %v6315_v53 = vpop.f32.mrb[10].mxu0 }
 0x430   :  { %6556 = vst.msk [vmem:[%s11733_s3 + $0x20] sm:$0xff] %vm6551_vm0, %v7136_v47  ;;  %v7137_v44 = vadd.f32 %v6315_v53, %v5159_v52  ;;  %v6317_v40 = vpop.f32.mrb[11].mxu0  ;;  %5371 = vmatmul.mubr.bf16.gmra.mrb[116].mxu1 %v7090_v46 }
 0x431   :  { %5378 = vmatprep.mubr.bf16.mxu1 %v7107_v49 }
 0x432   :  { %6557 = vst.msk [vmem:[%s11733_s3 + $0x28] sm:$0xff] %vm6551_vm0, %v7137_v44  ;;  %6527 = vmatmul.mubr.bf16.gmra.mrb[116].mxu0 %v7098_v56 }
 0x433   :  { %6534 = vmatprep.mubr.bf16.mxu0 %v7115_v43  ;;  %v5164_v50 = vpop.f32.mrb[12].mxu1 }
 0x434   :  { %v5166_v60 = vpop.f32.mrb[13].mxu1 }
 0x435   :  { %v6320_v59 = vpop.f32.mrb[12].mxu0  ;;  %v5167_v4 = vpop.f32.mrb[14].mxu1 }
 0x436   :  { %v7138_v62 = vadd.f32 %v6320_v59, %v5164_v50  ;;  %v6322_v63 = vpop.f32.mrb[13].mxu0  ;;  %v5169_v16 = vpop.f32.mrb[15].mxu1 }
 0x437   :  { %v6323_v10 = vpop.f32.mrb[14].mxu0 }
 0x438   :  { %6558 = vst.msk [vmem:[%s11733_s3 + $0x30] sm:$0xff] %vm6551_vm0, %v7138_v62  ;;  %v7139_v11 = vadd.f32 %v6323_v10, %v5167_v4  ;;  %v6325_v12 = vpop.f32.mrb[15].mxu0  ;;  %5379 = vmatmul.mubr.bf16.gmra.mrb[120].mxu1 %v7106_v61 }
 0x439   :  { %5386 = vmatprep.mubr.bf16.mxu1 %v7123_v8 }
 0x43a   :  { %6559 = vst.msk [vmem:[%s11733_s3 + $0x38] sm:$0xff] %vm6551_vm0, %v7139_v11  ;;  %6535 = vmatmul.mubr.bf16.gmra.mrb[120].mxu0 %v7114_v7 }
 0x43b   :  { %6542 = vmatprep.mubr.bf16.mxu0 %v7131_v5  ;;  %v5172_v55 = vpop.f32.mrb[16].mxu1 }
 0x43c   :  { %v5174_v1 = vpop.f32.mrb[17].mxu1 }
 0x43d   :  { %v6328_v58 = vpop.f32.mrb[16].mxu0  ;;  %v5175_v9 = vpop.f32.mrb[18].mxu1 }
 0x43e   :  { %v7140_v13 = vadd.f32 %v6328_v58, %v5172_v55  ;;  %v6330_v3 = vpop.f32.mrb[17].mxu0  ;;  %v5177_v0 = vpop.f32.mrb[19].mxu1 }
 0x43f   :  { %v6331_v17 = vpop.f32.mrb[18].mxu0 }
 0x440   :  { %6560 = vst.msk [vmem:[%s11733_s3 + $0x40] sm:$0xff] %vm6551_vm0, %v7140_v13  ;;  %v7141_v14 = vadd.f32 %v6331_v17, %v5175_v9  ;;  %v6333_v19 = vpop.f32.mrb[19].mxu0  ;;  %5387 = vmatmul.mubr.bf16.gmra.mrb[124].mxu1 %v7122_v2 }
 0x442   :  { %6561 = vst.msk [vmem:[%s11733_s3 + $0x48] sm:$0xff] %vm6551_vm0, %v7141_v14  ;;  %6543 = vmatmul.mubr.bf16.gmra.mrb[124].mxu0 %v7130_v6 }
 0x443   :  { %v5180_v20 = vpop.f32.mrb[20].mxu1 }
 0x444   :  { %v5182_v22 = vpop.f32.mrb[21].mxu1 }
 0x445   :  { %v6336_v21 = vpop.f32.mrb[20].mxu0  ;;  %v5183_v29 = vpop.f32.mrb[22].mxu1 }
 0x446   :  { %v7142_v23 = vadd.f32 %v6336_v21, %v5180_v20  ;;  %v6338_v27 = vpop.f32.mrb[21].mxu0  ;;  %v5185_v30 = vpop.f32.mrb[23].mxu1 }
 0x447   :  { %v6339_v28 = vpop.f32.mrb[22].mxu0 }
 0x448   :  { %6562 = vst.msk [vmem:[%s11733_s3 + $0x50] sm:$0xff] %vm6551_vm0, %v7142_v23  ;;  %v7143_v25 = vadd.f32 %v6339_v28, %v5183_v29  ;;  %v6341_v34 = vpop.f32.mrb[23].mxu0 }
 0x44a   :  { %6563 = vst.msk [vmem:[%s11733_s3 + $0x58] sm:$0xff] %vm6551_vm0, %v7143_v25 }
 0x44b   :  { %v5188_v31 = vpop.f32.mrb[24].mxu1 }
 0x44c   :  { %v5190_v15 = vpop.f32.mrb[25].mxu1 }
 0x44d   :  { %v6344_v32 = vpop.f32.mrb[24].mxu0  ;;  %v5191_v18 = vpop.f32.mrb[26].mxu1 }
 0x44e   :  { %v7144_v36 = vadd.f32 %v6344_v32, %v5188_v31  ;;  %v6346_v33 = vpop.f32.mrb[25].mxu0  ;;  %v5193_v26 = vpop.f32.mrb[27].mxu1 }
 0x44f   :  { %v6347_v24 = vpop.f32.mrb[26].mxu0 }
 0x450   :  { %6564 = vst.msk [vmem:[%s11733_s3 + $0x60] sm:$0xff] %vm6551_vm0, %v7144_v36  ;;  %v7145_v35 = vadd.f32 %v6347_v24, %v5191_v18  ;;  %v6349_v37 = vpop.f32.mrb[27].mxu0 }
 0x452   :  { %6565 = vst.msk [vmem:[%s11733_s3 + $0x68] sm:$0xff] %vm6551_vm0, %v7145_v35 }
 0x453   :  { %v5196_v38 = vpop.f32.mrb[28].mxu1 }
 0x454   :  { %v5198_v42 = vpop.f32.mrb[29].mxu1 }
 0x455   :  { %v6352_v39 = vpop.f32.mrb[28].mxu0  ;;  %v5199_v48 = vpop.f32.mrb[30].mxu1 }
 0x456   :  { %v7146_v46 = vadd.f32 %v6352_v39, %v5196_v38  ;;  %v6354_v47 = vpop.f32.mrb[29].mxu0  ;;  %v5201_v56 = vpop.f32.mrb[31].mxu1 }
 0x457   :  { %v6355_v52 = vpop.f32.mrb[30].mxu0 }
 0x458   :  { %6566 = vst.msk [vmem:[%s11733_s3 + $0x70] sm:$0xff] %vm6551_vm0, %v7146_v46  ;;  %v7147_v49 = vadd.f32 %v6355_v52, %v5199_v48  ;;  %v6357_v53 = vpop.f32.mrb[31].mxu0 }
 0x45a   :  { %6567 = vst.msk [vmem:[%s11733_s3 + $0x78] sm:$0xff] %vm6551_vm0, %v7147_v49 }
 0x45b   :  { %v5204_v54 = vpop.f32.mrb[32].mxu1 }
 0x45c   :  { %v5206_v44 = vpop.f32.mrb[33].mxu1 }
 0x45d   :  { %v6360_v43 = vpop.f32.mrb[32].mxu0  ;;  %v5207_v51 = vpop.f32.mrb[34].mxu1 }
 0x45e   :  { %v7148_v40 = vadd.f32 %v6360_v43, %v5204_v54  ;;  %v6362_v45 = vpop.f32.mrb[33].mxu0  ;;  %v5209_v57 = vpop.f32.mrb[35].mxu1 }
 0x45f   :  { %v6363_v50 = vpop.f32.mrb[34].mxu0 }
 0x460   :  { %6568 = vst.msk [vmem:[%s11733_s3 + $0x80] sm:$0xff] %vm6551_vm0, %v7148_v40  ;;  %v7149_v41 = vadd.f32 %v6363_v50, %v5207_v51  ;;  %v6365_v59 = vpop.f32.mrb[35].mxu0 }
 0x462   :  { %6569 = vst.msk [vmem:[%s11733_s3 + $0x88] sm:$0xff] %vm6551_vm0, %v7149_v41 }
 0x463   :  { %v5212_v60 = vpop.f32.mrb[36].mxu1 }
 0x464   :  { %v5214_v62 = vpop.f32.mrb[37].mxu1 }
 0x465   :  { %v6368_v61 = vpop.f32.mrb[36].mxu0  ;;  %v5215_v7 = vpop.f32.mrb[38].mxu1 }
 0x466   :  { %v7150_v63 = vadd.f32 %v6368_v61, %v5212_v60  ;;  %v6370_v4 = vpop.f32.mrb[37].mxu0  ;;  %v5217_v10 = vpop.f32.mrb[39].mxu1 }
 0x467   :  { %v6371_v8 = vpop.f32.mrb[38].mxu0 }
 0x468   :  { %6570 = vst.msk [vmem:[%s11733_s3 + $0x90] sm:$0xff] %vm6551_vm0, %v7150_v63  ;;  %v7151_v16 = vadd.f32 %v6371_v8, %v5215_v7  ;;  %v6373_v5 = vpop.f32.mrb[39].mxu0 }
 0x46a   :  { %6571 = vst.msk [vmem:[%s11733_s3 + $0x98] sm:$0xff] %vm6551_vm0, %v7151_v16 }
 0x46b   :  { %v5220_v11 = vpop.f32.mrb[40].mxu1 }
 0x46c   :  { %v5222_v55 = vpop.f32.mrb[41].mxu1 }
 0x46d   :  { %v6376_v12 = vpop.f32.mrb[40].mxu0  ;;  %v5223_v2 = vpop.f32.mrb[42].mxu1 }
 0x46e   :  { %v7152_v58 = vadd.f32 %v6376_v12, %v5220_v11  ;;  %v6378_v1 = vpop.f32.mrb[41].mxu0  ;;  %v5225_v3 = vpop.f32.mrb[43].mxu1 }
 0x46f   :  { %v6379_v13 = vpop.f32.mrb[42].mxu0 }
 0x470   :  { %6572 = vst.msk [vmem:[%s11733_s3 + $0xa0] sm:$0xff] %vm6551_vm0, %v7152_v58  ;;  %v7153_v9 = vadd.f32 %v6379_v13, %v5223_v2  ;;  %v6381_v6 = vpop.f32.mrb[43].mxu0 }
 0x472   :  { %6573 = vst.msk [vmem:[%s11733_s3 + $0xa8] sm:$0xff] %vm6551_vm0, %v7153_v9 }
 0x473   :  { %v5228_v17 = vpop.f32.mrb[44].mxu1 }
 0x474   :  { %v5230_v14 = vpop.f32.mrb[45].mxu1 }
 0x475   :  { %v6384_v0 = vpop.f32.mrb[44].mxu0  ;;  %v5231_v21 = vpop.f32.mrb[46].mxu1 }
 0x476   :  { %v7154_v19 = vadd.f32 %v6384_v0, %v5228_v17  ;;  %v6386_v20 = vpop.f32.mrb[45].mxu0  ;;  %v5233_v23 = vpop.f32.mrb[47].mxu1 }
 0x477   :  { %v6387_v22 = vpop.f32.mrb[46].mxu0 }
 0x478   :  { %6574 = vst.msk [vmem:[%s11733_s3 + $0xb0] sm:$0xff] %vm6551_vm0, %v7154_v19  ;;  %v7155_v27 = vadd.f32 %v6387_v22, %v5231_v21  ;;  %v6389_v29 = vpop.f32.mrb[47].mxu0 }
 0x47a   :  { %6575 = vst.msk [vmem:[%s11733_s3 + $0xb8] sm:$0xff] %vm6551_vm0, %v7155_v27 }
 0x47b   :  { %v5236_v28 = vpop.f32.mrb[48].mxu1 }
 0x47c   :  { %v5238_v25 = vpop.f32.mrb[49].mxu1 }
 0x47d   :  { %v6392_v30 = vpop.f32.mrb[48].mxu0  ;;  %v5239_v32 = vpop.f32.mrb[50].mxu1 }
 0x47e   :  { %v7156_v34 = vadd.f32 %v6392_v30, %v5236_v28  ;;  %v6394_v31 = vpop.f32.mrb[49].mxu0  ;;  %v5241_v36 = vpop.f32.mrb[51].mxu1 }
 0x47f   :  { %v6395_v15 = vpop.f32.mrb[50].mxu0 }
 0x480   :  { %6576 = vst.msk [vmem:[%s11733_s3 + $0xc0] sm:$0xff] %vm6551_vm0, %v7156_v34  ;;  %v7157_v33 = vadd.f32 %v6395_v15, %v5239_v32  ;;  %v6397_v18 = vpop.f32.mrb[51].mxu0 }
 0x482   :  { %6577 = vst.msk [vmem:[%s11733_s3 + $0xc8] sm:$0xff] %vm6551_vm0, %v7157_v33 }
 0x483   :  { %v5244_v24 = vpop.f32.mrb[52].mxu1 }
 0x484   :  { %v5246_v35 = vpop.f32.mrb[53].mxu1 }
 0x485   :  { %v6400_v26 = vpop.f32.mrb[52].mxu0  ;;  %v5247_v39 = vpop.f32.mrb[54].mxu1 }
 0x486   :  { %v7158_v37 = vadd.f32 %v6400_v26, %v5244_v24  ;;  %v6402_v38 = vpop.f32.mrb[53].mxu0  ;;  %v5249_v46 = vpop.f32.mrb[55].mxu1 }
 0x487   :  { %v6403_v42 = vpop.f32.mrb[54].mxu0 }
 0x488   :  { %6578 = vst.msk [vmem:[%s11733_s3 + $0xd0] sm:$0xff] %vm6551_vm0, %v7158_v37  ;;  %v7159_v47 = vadd.f32 %v6403_v42, %v5247_v39  ;;  %v6405_v48 = vpop.f32.mrb[55].mxu0 }
 0x48a   :  { %6579 = vst.msk [vmem:[%s11733_s3 + $0xd8] sm:$0xff] %vm6551_vm0, %v7159_v47 }
 0x48b   :  { %v5252_v52 = vpop.f32.mrb[56].mxu1 }
 0x48c   :  { %v5254_v49 = vpop.f32.mrb[57].mxu1 }
 0x48d   :  { %v6408_v56 = vpop.f32.mrb[56].mxu0  ;;  %v5255_v43 = vpop.f32.mrb[58].mxu1 }
 0x48e   :  { %v7160_v53 = vadd.f32 %v6408_v56, %v5252_v52  ;;  %v6410_v54 = vpop.f32.mrb[57].mxu0  ;;  %v5257_v40 = vpop.f32.mrb[59].mxu1 }
 0x48f   :  { %v6411_v44 = vpop.f32.mrb[58].mxu0 }
 0x490   :  { %6580 = vst.msk [vmem:[%s11733_s3 + $0xe0] sm:$0xff] %vm6551_vm0, %v7160_v53  ;;  %v7161_v45 = vadd.f32 %v6411_v44, %v5255_v43  ;;  %v6413_v51 = vpop.f32.mrb[59].mxu0 }
 0x492   :  { %6581 = vst.msk [vmem:[%s11733_s3 + $0xe8] sm:$0xff] %vm6551_vm0, %v7161_v45 }
 0x493   :  { %v5260_v50 = vpop.f32.mrb[60].mxu1 }
 0x494   :  { %v5262_v41 = vpop.f32.mrb[61].mxu1 }
 0x495   :  { %v6416_v57 = vpop.f32.mrb[60].mxu0  ;;  %v5263_v61 = vpop.f32.mrb[62].mxu1 }
 0x496   :  { %v7162_v59 = vadd.f32 %v6416_v57, %v5260_v50  ;;  %v6418_v60 = vpop.f32.mrb[61].mxu0  ;;  %v5265_v63 = vpop.f32.mrb[63].mxu1 }
 0x497   :  { %v6419_v62 = vpop.f32.mrb[62].mxu0 }
 0x498   :  { %6582 = vst.msk [vmem:[%s11733_s3 + $0xf0] sm:$0xff] %vm6551_vm0, %v7162_v59  ;;  %v7163_v4 = vadd.f32 %v6419_v62, %v5263_v61  ;;  %v6421_v7 = vpop.f32.mrb[63].mxu0 }
 0x49a   :  { %6583 = vst.msk [vmem:[%s11733_s3 + $0xf8] sm:$0xff] %vm6551_vm0, %v7163_v4 }
 0x49b   :  { %v5268_v8 = vpop.f32.mrb[64].mxu1 }
 0x49c   :  { %v5270_v16 = vpop.f32.mrb[65].mxu1 }
 0x49d   :  { %v6424_v10 = vpop.f32.mrb[64].mxu0  ;;  %v5271_v12 = vpop.f32.mrb[66].mxu1 }
 0x49e   :  { %v7164_v5 = vadd.f32 %v6424_v10, %v5268_v8  ;;  %v6426_v11 = vpop.f32.mrb[65].mxu0  ;;  %v5273_v58 = vpop.f32.mrb[67].mxu1 }
 0x49f   :  { %v6427_v55 = vpop.f32.mrb[66].mxu0 }
 0x4a0   :  { %6584 = vst.msk [vmem:[%s11733_s3 + $0x100] sm:$0xff] %vm6551_vm0, %v7164_v5  ;;  %v7165_v1 = vadd.f32 %v6427_v55, %v5271_v12  ;;  %v6429_v2 = vpop.f32.mrb[67].mxu0 }
 0x4a2   :  { %6585 = vst.msk [vmem:[%s11733_s3 + $0x108] sm:$0xff] %vm6551_vm0, %v7165_v1 }
 0x4a3   :  { %v5276_v13 = vpop.f32.mrb[68].mxu1 }
 0x4a4   :  { %v5278_v9 = vpop.f32.mrb[69].mxu1 }
 0x4a5   :  { %v6432_v3 = vpop.f32.mrb[68].mxu0  ;;  %v5279_v0 = vpop.f32.mrb[70].mxu1 }
 0x4a6   :  { %v7166_v6 = vadd.f32 %v6432_v3, %v5276_v13  ;;  %v6434_v17 = vpop.f32.mrb[69].mxu0  ;;  %v5281_v19 = vpop.f32.mrb[71].mxu1 }
 0x4a7   :  { %v6435_v14 = vpop.f32.mrb[70].mxu0 }
 0x4a8   :  { %6586 = vst.msk [vmem:[%s11733_s3 + $0x110] sm:$0xff] %vm6551_vm0, %v7166_v6  ;;  %v7167_v20 = vadd.f32 %v6435_v14, %v5279_v0  ;;  %v6437_v21 = vpop.f32.mrb[71].mxu0 }
 0x4aa   :  { %6587 = vst.msk [vmem:[%s11733_s3 + $0x118] sm:$0xff] %vm6551_vm0, %v7167_v20 }
 0x4ab   :  { %v5284_v22 = vpop.f32.mrb[72].mxu1 }
 0x4ac   :  { %v5286_v27 = vpop.f32.mrb[73].mxu1 }
 0x4ad   :  { %v6440_v23 = vpop.f32.mrb[72].mxu0  ;;  %v5287_v30 = vpop.f32.mrb[74].mxu1 }
 0x4ae   :  { %v7168_v29 = vadd.f32 %v6440_v23, %v5284_v22  ;;  %v6442_v28 = vpop.f32.mrb[73].mxu0  ;;  %v5289_v34 = vpop.f32.mrb[75].mxu1 }
 0x4af   :  { %v6443_v25 = vpop.f32.mrb[74].mxu0 }
 0x4b0   :  { %6588 = vst.msk [vmem:[%s11733_s3 + $0x120] sm:$0xff] %vm6551_vm0, %v7168_v29  ;;  %v7169_v31 = vadd.f32 %v6443_v25, %v5287_v30  ;;  %v6445_v32 = vpop.f32.mrb[75].mxu0 }
 0x4b2   :  { %6589 = vst.msk [vmem:[%s11733_s3 + $0x128] sm:$0xff] %vm6551_vm0, %v7169_v31 }
 0x4b3   :  { %v5292_v15 = vpop.f32.mrb[76].mxu1 }
 0x4b4   :  { %v5294_v33 = vpop.f32.mrb[77].mxu1 }
 0x4b5   :  { %v6448_v36 = vpop.f32.mrb[76].mxu0  ;;  %v5295_v26 = vpop.f32.mrb[78].mxu1 }
 0x4b6   :  { %v7170_v18 = vadd.f32 %v6448_v36, %v5292_v15  ;;  %v6450_v24 = vpop.f32.mrb[77].mxu0  ;;  %v5297_v37 = vpop.f32.mrb[79].mxu1 }
 0x4b7   :  { %v6451_v35 = vpop.f32.mrb[78].mxu0 }
 0x4b8   :  { %6590 = vst.msk [vmem:[%s11733_s3 + $0x130] sm:$0xff] %vm6551_vm0, %v7170_v18  ;;  %v7171_v38 = vadd.f32 %v6451_v35, %v5295_v26  ;;  %v6453_v39 = vpop.f32.mrb[79].mxu0 }
 0x4ba   :  { %6591 = vst.msk [vmem:[%s11733_s3 + $0x138] sm:$0xff] %vm6551_vm0, %v7171_v38 }
 0x4bb   :  { %v5300_v42 = vpop.f32.mrb[80].mxu1 }
 0x4bc   :  { %v5302_v47 = vpop.f32.mrb[81].mxu1 }
 0x4bd   :  { %v6456_v46 = vpop.f32.mrb[80].mxu0  ;;  %v5303_v56 = vpop.f32.mrb[82].mxu1 }
 0x4be   :  { %v7172_v48 = vadd.f32 %v6456_v46, %v5300_v42  ;;  %v6458_v52 = vpop.f32.mrb[81].mxu0  ;;  %v5305_v53 = vpop.f32.mrb[83].mxu1 }
 0x4bf   :  { %v6459_v49 = vpop.f32.mrb[82].mxu0 }
 0x4c0   :  { %6592 = vst.msk [vmem:[%s11733_s3 + $0x140] sm:$0xff] %vm6551_vm0, %v7172_v48  ;;  %v7173_v54 = vadd.f32 %v6459_v49, %v5303_v56  ;;  %v6461_v43 = vpop.f32.mrb[83].mxu0 }
 0x4c2   :  { %6593 = vst.msk [vmem:[%s11733_s3 + $0x148] sm:$0xff] %vm6551_vm0, %v7173_v54 }
 0x4c3   :  { %v5308_v44 = vpop.f32.mrb[84].mxu1 }
 0x4c4   :  { %v5310_v45 = vpop.f32.mrb[85].mxu1 }
 0x4c5   :  { %v6464_v40 = vpop.f32.mrb[84].mxu0  ;;  %v5311_v57 = vpop.f32.mrb[86].mxu1 }
 0x4c6   :  { %v7174_v51 = vadd.f32 %v6464_v40, %v5308_v44  ;;  %v6466_v50 = vpop.f32.mrb[85].mxu0  ;;  %v5313_v59 = vpop.f32.mrb[87].mxu1 }
 0x4c7   :  { %v6467_v41 = vpop.f32.mrb[86].mxu0 }
 0x4c8   :  { %6594 = vst.msk [vmem:[%s11733_s3 + $0x150] sm:$0xff] %vm6551_vm0, %v7174_v51  ;;  %v7175_v60 = vadd.f32 %v6467_v41, %v5311_v57  ;;  %v6469_v61 = vpop.f32.mrb[87].mxu0 }
 0x4ca   :  { %6595 = vst.msk [vmem:[%s11733_s3 + $0x158] sm:$0xff] %vm6551_vm0, %v7175_v60 }
 0x4cb   :  { %v5316_v62 = vpop.f32.mrb[88].mxu1 }
 0x4cc   :  { %v5318_v4 = vpop.f32.mrb[89].mxu1 }
 0x4cd   :  { %v6472_v63 = vpop.f32.mrb[88].mxu0  ;;  %v5319_v10 = vpop.f32.mrb[90].mxu1 }
 0x4ce   :  { %v7176_v7 = vadd.f32 %v6472_v63, %v5316_v62  ;;  %v6474_v8 = vpop.f32.mrb[89].mxu0  ;;  %v5321_v5 = vpop.f32.mrb[91].mxu1 }
 0x4cf   :  { %v6475_v16 = vpop.f32.mrb[90].mxu0 }
 0x4d0   :  { %6596 = vst.msk [vmem:[%s11733_s3 + $0x160] sm:$0xff] %vm6551_vm0, %v7176_v7  ;;  %v7177_v11 = vadd.f32 %v6475_v16, %v5319_v10  ;;  %v6477_v12 = vpop.f32.mrb[91].mxu0 }
 0x4d2   :  { %6597 = vst.msk [vmem:[%s11733_s3 + $0x168] sm:$0xff] %vm6551_vm0, %v7177_v11 }
 0x4d3   :  { %v5324_v55 = vpop.f32.mrb[92].mxu1 }
 0x4d4   :  { %v5326_v1 = vpop.f32.mrb[93].mxu1 }
 0x4d5   :  { %v6480_v58 = vpop.f32.mrb[92].mxu0  ;;  %v5327_v3 = vpop.f32.mrb[94].mxu1 }
 0x4d6   :  { %v7178_v2 = vadd.f32 %v6480_v58, %v5324_v55  ;;  %v6482_v13 = vpop.f32.mrb[93].mxu0  ;;  %v5329_v6 = vpop.f32.mrb[95].mxu1 }
 0x4d7   :  { %v6483_v9 = vpop.f32.mrb[94].mxu0 }
 0x4d8   :  { %6598 = vst.msk [vmem:[%s11733_s3 + $0x170] sm:$0xff] %vm6551_vm0, %v7178_v2  ;;  %v7179_v17 = vadd.f32 %v6483_v9, %v5327_v3  ;;  %v6485_v0 = vpop.f32.mrb[95].mxu0 }
 0x4da   :  { %6599 = vst.msk [vmem:[%s11733_s3 + $0x178] sm:$0xff] %vm6551_vm0, %v7179_v17 }
 0x4db   :  { %v5332_v14 = vpop.f32.mrb[96].mxu1 }
 0x4dc   :  { %v5334_v20 = vpop.f32.mrb[97].mxu1 }
 0x4dd   :  { %v6488_v19 = vpop.f32.mrb[96].mxu0  ;;  %v5335_v23 = vpop.f32.mrb[98].mxu1 }
 0x4de   :  { %v7180_v21 = vadd.f32 %v6488_v19, %v5332_v14  ;;  %v6490_v22 = vpop.f32.mrb[97].mxu0  ;;  %v5337_v29 = vpop.f32.mrb[99].mxu1 }
 0x4df   :  { %v6491_v27 = vpop.f32.mrb[98].mxu0 }
 0x4e0   :  { %6600 = vst.msk [vmem:[%s11733_s3 + $0x180] sm:$0xff] %vm6551_vm0, %v7180_v21  ;;  %v7181_v28 = vadd.f32 %v6491_v27, %v5335_v23  ;;  %v6493_v30 = vpop.f32.mrb[99].mxu0 }
 0x4e2   :  { %6601 = vst.msk [vmem:[%s11733_s3 + $0x188] sm:$0xff] %vm6551_vm0, %v7181_v28 }
 0x4e3   :  { %v5340_v25 = vpop.f32.mrb[100].mxu1 }
 0x4e4   :  { %v5342_v31 = vpop.f32.mrb[101].mxu1 }
 0x4e5   :  { %v6496_v34 = vpop.f32.mrb[100].mxu0  ;;  %v5343_v36 = vpop.f32.mrb[102].mxu1 }
 0x4e6   :  { %v7182_v32 = vadd.f32 %v6496_v34, %v5340_v25  ;;  %v6498_v15 = vpop.f32.mrb[101].mxu0  ;;  %v5345_v18 = vpop.f32.mrb[103].mxu1 }
 0x4e7   :  { %v6499_v33 = vpop.f32.mrb[102].mxu0 }
 0x4e8   :  { %6602 = vst.msk [vmem:[%s11733_s3 + $0x190] sm:$0xff] %vm6551_vm0, %v7182_v32  ;;  %v7183_v24 = vadd.f32 %v6499_v33, %v5343_v36  ;;  %v6501_v26 = vpop.f32.mrb[103].mxu0 }
 0x4ea   :  { %6603 = vst.msk [vmem:[%s11733_s3 + $0x198] sm:$0xff] %vm6551_vm0, %v7183_v24 }
 0x4eb   :  { %v5348_v35 = vpop.f32.mrb[104].mxu1 }
 0x4ec   :  { %v5350_v38 = vpop.f32.mrb[105].mxu1 }
 0x4ed   :  { %v6504_v37 = vpop.f32.mrb[104].mxu0  ;;  %v5351_v46 = vpop.f32.mrb[106].mxu1 }
 0x4ee   :  { %v7184_v39 = vadd.f32 %v6504_v37, %v5348_v35  ;;  %v6506_v42 = vpop.f32.mrb[105].mxu0  ;;  %v5353_v48 = vpop.f32.mrb[107].mxu1 }
 0x4ef   :  { %v6507_v47 = vpop.f32.mrb[106].mxu0 }
 0x4f0   :  { %6604 = vst.msk [vmem:[%s11733_s3 + $0x1a0] sm:$0xff] %vm6551_vm0, %v7184_v39  ;;  %v7185_v52 = vadd.f32 %v6507_v47, %v5351_v46  ;;  %v6509_v56 = vpop.f32.mrb[107].mxu0 }
 0x4f2   :  { %6605 = vst.msk [vmem:[%s11733_s3 + $0x1a8] sm:$0xff] %vm6551_vm0, %v7185_v52 }
 0x4f3   :  { %v5356_v49 = vpop.f32.mrb[108].mxu1 }
 0x4f4   :  { %v5358_v54 = vpop.f32.mrb[109].mxu1 }
 0x4f5   :  { %v6512_v53 = vpop.f32.mrb[108].mxu0  ;;  %v5359_v40 = vpop.f32.mrb[110].mxu1 }
 0x4f6   :  { %v7186_v43 = vadd.f32 %v6512_v53, %v5356_v49  ;;  %v6514_v44 = vpop.f32.mrb[109].mxu0  ;;  %v5361_v51 = vpop.f32.mrb[111].mxu1 }
 0x4f7   :  { %v6515_v45 = vpop.f32.mrb[110].mxu0 }
 0x4f8   :  { %6606 = vst.msk [vmem:[%s11733_s3 + $0x1b0] sm:$0xff] %vm6551_vm0, %v7186_v43  ;;  %v7187_v50 = vadd.f32 %v6515_v45, %v5359_v40  ;;  %v6517_v57 = vpop.f32.mrb[111].mxu0 }
 0x4fa   :  { %6607 = vst.msk [vmem:[%s11733_s3 + $0x1b8] sm:$0xff] %vm6551_vm0, %v7187_v50 }
 0x4fb   :  { %v5364_v41 = vpop.f32.mrb[112].mxu1 }
 0x4fc   :  { %v5366_v60 = vpop.f32.mrb[113].mxu1 }
 0x4fd   :  { %v6520_v59 = vpop.f32.mrb[112].mxu0  ;;  %v5367_v63 = vpop.f32.mrb[114].mxu1 }
 0x4fe   :  { %v7188_v61 = vadd.f32 %v6520_v59, %v5364_v41  ;;  %v6522_v62 = vpop.f32.mrb[113].mxu0  ;;  %v5369_v7 = vpop.f32.mrb[115].mxu1 }
 0x4ff   :  { %v6523_v4 = vpop.f32.mrb[114].mxu0 }
 0x500   :  { %6608 = vst.msk [vmem:[%s11733_s3 + $0x1c0] sm:$0xff] %vm6551_vm0, %v7188_v61  ;;  %v7189_v8 = vadd.f32 %v6523_v4, %v5367_v63  ;;  %v6525_v10 = vpop.f32.mrb[115].mxu0 }
 0x502   :  { %6609 = vst.msk [vmem:[%s11733_s3 + $0x1c8] sm:$0xff] %vm6551_vm0, %v7189_v8 }
 0x503   :  { %v5372_v16 = vpop.f32.mrb[116].mxu1 }
 0x504   :  { %v5374_v11 = vpop.f32.mrb[117].mxu1 }
 0x505   :  { %v6528_v5 = vpop.f32.mrb[116].mxu0  ;;  %v5375_v58 = vpop.f32.mrb[118].mxu1 }
 0x506   :  { %v7190_v12 = vadd.f32 %v6528_v5, %v5372_v16  ;;  %v6530_v55 = vpop.f32.mrb[117].mxu0  ;;  %v5377_v2 = vpop.f32.mrb[119].mxu1 }
 0x507   :  { %v6531_v1 = vpop.f32.mrb[118].mxu0 }
 0x508   :  { %6610 = vst.msk [vmem:[%s11733_s3 + $0x1d0] sm:$0xff] %vm6551_vm0, %v7190_v12  ;;  %v7191_v13 = vadd.f32 %v6531_v1, %v5375_v58  ;;  %v6533_v3 = vpop.f32.mrb[119].mxu0 }
 0x50a   :  { %6611 = vst.msk [vmem:[%s11733_s3 + $0x1d8] sm:$0xff] %vm6551_vm0, %v7191_v13 }
 0x50b   :  { %v5380_v9 = vpop.f32.mrb[120].mxu1 }
 0x50c   :  { %v5382_v17 = vpop.f32.mrb[121].mxu1 }
 0x50d   :  { %v6536_v6 = vpop.f32.mrb[120].mxu0  ;;  %v5383_v19 = vpop.f32.mrb[122].mxu1 }
 0x50e   :  { %v7192_v0 = vadd.f32 %v6536_v6, %v5380_v9  ;;  %v6538_v14 = vpop.f32.mrb[121].mxu0  ;;  %v5385_v21 = vpop.f32.mrb[123].mxu1 }
 0x50f   :  { %v6539_v20 = vpop.f32.mrb[122].mxu0 }
 0x510   :  { %6612 = vst.msk [vmem:[%s11733_s3 + $0x1e0] sm:$0xff] %vm6551_vm0, %v7192_v0  ;;  %v7193_v22 = vadd.f32 %v6539_v20, %v5383_v19  ;;  %v6541_v23 = vpop.f32.mrb[123].mxu0 }
 0x512   :  { %6613 = vst.msk [vmem:[%s11733_s3 + $0x1e8] sm:$0xff] %vm6551_vm0, %v7193_v22 }
 0x513   :  { %v5388_v27 = vpop.f32.mrb[124].mxu1 }
 0x514   :  { %v5390_v28 = vpop.f32.mrb[125].mxu1 }
 0x515   :  { %v6544_v29 = vpop.f32.mrb[124].mxu0  ;;  %v5391_v34 = vpop.f32.mrb[126].mxu1 }
 0x516   :  { %v7194_v30 = vadd.f32 %v6544_v29, %v5388_v27  ;;  %v6546_v25 = vpop.f32.mrb[125].mxu0  ;;  %v5393_v32 = vpop.f32.mrb[127].mxu1 }
 0x517   :  { %v6547_v31 = vpop.f32.mrb[126].mxu0 }
 0x518   :  { %6614 = vst.msk [vmem:[%s11733_s3 + $0x1f0] sm:$0xff] %vm6551_vm0, %v7194_v30  ;;  %v7195_v15 = vadd.f32 %v6547_v31, %v5391_v34  ;;  %v6549_v36 = vpop.f32.mrb[127].mxu0 }
 0x51a   :  { %6615 = vst.msk [vmem:[%s11733_s3 + $0x1f8] sm:$0xff] %vm6551_vm0, %v7195_v15 }

</bundles_post_ra>
